<compile_context>
chip_gen: v6e
topology: v6e:2x2x1
jax: 0.10.0
libtpu: 0.0.40
codegen_flags: <defaults>
</compile_context>

<pallas_src>
import math

import jax
import jax.numpy as jnp
from jax import lax
from jax.experimental import pallas as pl
from jax.experimental.pallas import tpu as pltpu


# ----------------------------- Pallas kernel ------------------------------ #
def _filter_init_kernel(bias_ref, x_ref, swyb_ref, swx_ref, ex_ref, w3_ref,
                        out_ref):
    """One grid step = TS sequences x 1 image.

    Grid = (seq_blocks, num_images).  The image axis MUST stay the innermost
    ("arbitrary") grid axis: out_ref is resident across it, initialized at
    program_id(1) == 0 and accumulated for every image.

    bias_ref: (TS, C)      f32  conv bias * sum(pool weights), pre-summed over
                                images and pre-scaled by mean / filter_norm
    x_ref   : (TS, C, HW)  feat raw NCHW feature, spatial flattened (lane-dense)
    swyb_ref: (TS, 3, HW)  f32  PrRoI row tent-weights, pre-shifted for the 3
                                conv dy taps, 1/area folded in, expanded to the
                                flat H*W lane layout (value at p is row p // W)
    swx_ref : (3, TS, W)   f32  PrRoI col tent-weights, pre-shifted for the 3
                                conv dx taps (dx-major: leading-dim indexable)
    ex_ref  : (W, HW)      f32  constant column-expansion matrix,
                                ex[w, p] = 1 iff p % W == w  (fetched once)
    w3_ref  : (9, C, C)    f32  3x3 conv weight per tap (t = dy*3 + dx),
                                pre-scaled by filter_norm / num_images
    out_ref : (TS, C)      f32  resident accumulator
    """
    @pl.when(pl.program_id(1) == 0)
    def _init():
        out_ref[...] = bias_ref[...]

    x = x_ref[...]                # (TS, C, HW)
    swyb = swyb_ref[...]          # (TS, 3, HW); kept f32 on purpose (bf16 would
                                  # lose precision on 1/area-scaled tent weights)
    ex = ex_ref[...]              # (W, HW)

    acc = jnp.zeros(out_ref.shape, jnp.float32)
    for dx in range(3):
        # Expand this column tap's (TS, W) weights to the flat (TS, HW) lane
        # layout with one tiny MXU matmul (no strided loads / relayouts).
        swxb = jnp.dot(swx_ref[dx], ex,
                       preferred_element_type=jnp.float32)           # (TS, HW)
        # 3 row-shifted maps x this col-shifted map = 3 of the 9 PrRoI tap
        # weight maps, rebuilt on-chip instead of streamed 9x from HBM.
        wst3 = swyb * swxb[:, None, :]                                # (TS, 3, HW)
        # Stage 1: pooled conv taps; batched MXU contraction over H*W.
        t3 = jnp.einsum('syp,scp->syc', wst3, x,
                        preferred_element_type=jnp.float32)           # (TS, 3, C)
        # Stage 2: contract taps with the 3x3 conv weight.  Kept as small
        # per-tap dots (a single K=9*C matmul would need a (TS,3,C)->(TS,3C)
        # minor-dim relayout; DMA/overhead is the roofline here anyway).
        for dy in range(3):
            acc = acc + jnp.dot(t3[:, dy, :], w3_ref[dy * 3 + dx],
                                preferred_element_type=jnp.float32)

    out_ref[...] = out_ref[...] + acc


# ------------------------- tiling / VMEM sizing ---------------------------- #
def _step_vmem_bytes(tb, C, H, W, x_bytes):
    """Rough per-grid-step VMEM footprint (double-buffered pipelined inputs +
    resident constants + in-kernel intermediates)."""
    HW = H * W
    n = 0
    n += 2 * tb * C * HW * x_bytes          # feature tile (double-buffered)
    n += 2 * tb * 8 * HW * 4                # row-weight tile (3 -> 8 sublane pad)
    n += 2 * 3 * tb * 128 * 4               # col-weight tile (W -> 128 lane pad)
    n += 2 * (2 * tb * C * 4)               # bias tile + output accumulator
    n += 2 * (W * HW + 9 * C * C) * 4       # resident constants (ex, w3)
    n += tb * 8 * HW * 4 + tb * C * HW * 4  # in-kernel wst3 / einsum temporaries
    return n


def _choose_seq_block(ns, C, H, W, x_bytes, *, max_seq_block=64,
                      vmem_budget_bytes=24 * 1024 * 1024):
    """Largest multiple-of-8 sequence block that (a) divides the 8-padded
    sequence count, (b) leaves >= 2 sequence blocks when possible (so both v7x
    TensorCores get work on the 'parallel' grid axis), and (c) keeps the
    per-step working set under a VMEM budget sized for v7x's 64 MiB."""
    ns8 = ((ns + 7) // 8) * 8
    best = 8
    tb = 8
    while tb <= min(max_seq_block, ns8):
        if (ns8 % tb == 0 and (ns8 // tb >= 2 or ns8 == 8)
                and _step_vmem_bytes(tb, C, H, W, x_bytes) <= vmem_budget_bytes):
            best = tb
        tb += 8
    return best


def _filter_init_pallas(bias_init, x4, swyb4, swx4, ex, w3, *, seq_block):
    ni, ns_p, C, HW = x4.shape
    W = swx4.shape[-1]
    H = HW // W
    # Image axis innermost ("arbitrary"): output block is revisited across it
    # and used as an accumulator.  Sequence axis "parallel" (megacore).
    grid = (ns_p // seq_block, ni)
    vmem_limit = int(min(48 * 1024 * 1024,
                         max(16 * 1024 * 1024,
                             2 * _step_vmem_bytes(seq_block, C, H, W,
                                                  jnp.dtype(x4.dtype).itemsize))))
    return pl.pallas_call(
        _filter_init_kernel,
        out_shape=jax.ShapeDtypeStruct((ns_p, C), jnp.float32),
        grid=grid,
        in_specs=[
            pl.BlockSpec((seq_block, C), lambda s, i: (s, 0)),
            pl.BlockSpec((pl.Squeezed(), seq_block, C, HW),
                         lambda s, i: (i, s, 0, 0)),
            pl.BlockSpec((pl.Squeezed(), seq_block, 3, HW),
                         lambda s, i: (i, s, 0, 0)),
            pl.BlockSpec((pl.Squeezed(), 3, seq_block, W),
                         lambda s, i: (i, 0, s, 0)),
            pl.BlockSpec((W, HW), lambda s, i: (0, 0)),
            pl.BlockSpec((9, C, C), lambda s, i: (0, 0, 0)),
        ],
        out_specs=pl.BlockSpec((seq_block, C), lambda s, i: (s, 0)),
        compiler_params=pltpu.CompilerParams(
            dimension_semantics=("parallel", "arbitrary"),
            vmem_limit_bytes=vmem_limit),
    )(bias_init, x4, swyb4, swx4, ex, w3)


# ------------------------- PrRoIPool weight glue --------------------------- #
def _tent_cdf(t):
    # Antiderivative of the bilinear "tent" basis tri(t) = max(0, 1-|t|).
    return jnp.where(t <= -1.0, 0.0,
           jnp.where(t <= 0.0, 0.5 * (t + 1.0) ** 2,
           jnp.where(t <= 1.0, 1.0 - 0.5 * (1.0 - t) ** 2, 1.0)))


def _prroi_weights(bb_flat, H, W, feature_stride):
    # Exact PrRoIPool2D (filter_size=1) separable integration weights.
    s = 1.0 / feature_stride
    x1 = bb_flat[:, 0] * s
    y1 = bb_flat[:, 1] * s
    x2 = (bb_flat[:, 0] + bb_flat[:, 2]) * s
    y2 = (bb_flat[:, 1] + bb_flat[:, 3]) * s
    hs = jnp.arange(H, dtype=jnp.float32)
    ws = jnp.arange(W, dtype=jnp.float32)
    wy = _tent_cdf(y2[:, None] - hs[None, :]) - _tent_cdf(y1[:, None] - hs[None, :])
    wx = _tent_cdf(x2[:, None] - ws[None, :]) - _tent_cdf(x1[:, None] - ws[None, :])
    area = (x2 - x1) * (y2 - y1)
    inv_area = jnp.where(area > 0.0, 1.0 / jnp.maximum(area, 1e-30), 0.0)
    return wy, wx, inv_area


def _shift3(v):
    """v: (B, L) -> (B, 3, L) with out[:, d, j] = v[:, j - d + 1] (zero fill).
    The three conv-tap shifts (kernel offsets -1, 0, +1) applied host-side to
    the tiny separable PrRoI weight vectors; the conv's zero padding is folded
    into the zero fill."""
    z = jnp.zeros_like(v[:, :1])
    left = jnp.concatenate([v[:, 1:], z], axis=1)    # d = 0  (offset -1)
    right = jnp.concatenate([z, v[:, :-1]], axis=1)  # d = 2  (offset +1)
    return jnp.stack([left, v, right], axis=1)


# ------------------------------ Forward pass ------------------------------- #
def filter_initializer_linear(feat, bb, conv_w, conv_b, *, filter_size=1,
                              feature_stride=16, pool_square=False,
                              filter_norm=True, seq_block=None,
                              max_seq_block=64):
    """feat: (num_images, num_seq, C, H, W); bb: (num_images, num_seq, 4) (x,y,w,h)
       returns (num_seq, C, 1, 1)"""
    if filter_size != 1:
        # TODO(synk): filter_size > 1 would need a fsz x fsz PrRoI bin decomposition.
        raise NotImplementedError("only filter_size=1 is implemented")
    ni, ns, C, H, W = feat.shape
    HW = H * W
    B = ni * ns

    # Raw feature, spatial flattened (contiguous reshape -- no data movement).
    x4 = feat.reshape(ni, ns, C, HW)

    bbf = bb.reshape(B, 4).astype(jnp.float32)
    if pool_square:
        bsz = jnp.sqrt(bbf[:, 2] * bbf[:, 3])
        bbf = jnp.stack([bbf[:, 0] + bbf[:, 2] / 2 - bsz / 2,
                         bbf[:, 1] + bbf[:, 3] / 2 - bsz / 2, bsz, bsz], axis=1)
    wy, wx, inv_area = _prroi_weights(bbf, H, W, feature_stride)

    # Tiny, pre-shifted separable PrRoI weights (f32 regardless of feat dtype).
    swy3 = _shift3(wy) * inv_area[:, None, None]                     # (B, 3, H)
    swx3 = _shift3(wx)                                               # (B, 3, W)
    # Row taps expanded to the flat lane-dense H*W layout (value at p = row p//W)
    # so the kernel's batched-einsum lhs needs no on-chip relayout.
    swyb = jnp.repeat(swy3, W, axis=-1).reshape(ni, ns, 3, HW)       # (ni,ns,3,HW)
    # Column taps stay tiny; dx-major so the kernel indexes the leading dim.
    swx4 = jnp.transpose(swx3.reshape(ni, ns, 3, W), (0, 2, 1, 3))   # (ni,3,ns,W)
    # Constant column-expansion matrix ex[w, p] = 1 iff p % W == w (DMA'd once).
    col = jnp.arange(HW, dtype=jnp.int32) % W
    ex = (col[None, :] == jnp.arange(W, dtype=jnp.int32)[:, None]).astype(jnp.float32)

    # Fold image-mean and filter_norm into the (tiny) conv weight & bias.
    scale = (1.0 / ni) * ((1.0 / (C * filter_size * filter_size)) if filter_norm else 1.0)
    w3 = jnp.transpose(conv_w.astype(jnp.float32), (2, 3, 1, 0)).reshape(9, C, C) * scale
    sum_ws = (inv_area * wy.sum(1) * wx.sum(1)).reshape(ni, ns)      # (ni, ns)
    bias_init = (sum_ws.sum(0)[:, None]
                 * conv_b.astype(jnp.float32)[None, :]) * scale      # (ns, C)

    x_bytes = jnp.dtype(feat.dtype).itemsize
    if seq_block is None:
        seq_block = _choose_seq_block(ns, C, H, W, x_bytes,
                                      max_seq_block=max_seq_block)

    # Pad the sequence axis to a multiple of the per-step ROI batch.
    ns_p = ((ns + seq_block - 1) // seq_block) * seq_block
    if ns_p != ns:
        pad = ns_p - ns
        x4 = jnp.pad(x4, ((0, 0), (0, pad), (0, 0), (0, 0)))
        swyb = jnp.pad(swyb, ((0, 0), (0, pad), (0, 0), (0, 0)))
        swx4 = jnp.pad(swx4, ((0, 0), (0, 0), (0, pad), (0, 0)))
        bias_init = jnp.pad(bias_init, ((0, pad), (0, 0)))

    out = _filter_init_pallas(bias_init, x4, swyb.astype(jnp.float32),
                              swx4.astype(jnp.float32), ex, w3,
                              seq_block=seq_block)
    return out[:ns].reshape(ns, C, filter_size, filter_size)


# --------------------------- pure-JAX reference ---------------------------- #
def _reference(feat, bb, conv_w, conv_b, *, filter_size=1, feature_stride=16,
               pool_square=False, filter_norm=True):
    ni, ns, C, H, W = feat.shape
    B = ni * ns
    x = feat.reshape(B, C, H, W).astype(jnp.float32)
    y = lax.conv_general_dilated(
        x, conv_w.astype(jnp.float32), (1, 1), 'SAME',
        dimension_numbers=('NCHW', 'OIHW', 'NCHW'))
    y = y + conv_b.astype(jnp.float32)[None, :, None, None]
    bbf = bb.reshape(B, 4).astype(jnp.float32)
    if pool_square:
        bsz = jnp.sqrt(bbf[:, 2] * bbf[:, 3])
        bbf = jnp.stack([bbf[:, 0] + bbf[:, 2] / 2 - bsz / 2,
                         bbf[:, 1] + bbf[:, 3] / 2 - bsz / 2, bsz, bsz], axis=1)
    wy, wx, inv_area = _prroi_weights(bbf, H, W, feature_stride)
    pooled = jnp.einsum('bchw,bh,bw->bc', y, wy, wx) * inv_area[:, None]
    weights = pooled.reshape(ni, ns, C).mean(0).reshape(ns, C, filter_size,
                                                        filter_size)
    if filter_norm:
        weights = weights / (C * filter_size * filter_size)
    return weights


# ----------------------------------- main ---------------------------------- #
if __name__ == "__main__":
    key = jax.random.PRNGKey(0)
    ni, ns, C, H, W = 2, 32, 32, 16, 16       # images, sequences, feat_dim, H, W
    feature_stride = 16
    k1, k2, k3, k4, k5 = jax.random.split(key, 5)

    feat = jax.random.normal(k1, (ni, ns, C, H, W), dtype=jnp.float32)
    # boxes (x, y, w, h) in image pixel coords (image size = H*stride = 256)
    xy = jax.random.uniform(k2, (ni, ns, 2), minval=20.0, maxval=150.0)
    wh = jax.random.uniform(k3, (ni, ns, 2), minval=30.0, maxval=100.0)
    bb = jnp.concatenate([xy, wh], axis=-1).astype(jnp.float32)

    # Conv2d init: normal(0, sqrt(2/(k*k*out_channels))); small nonzero bias to
    # exercise the bias path (module zeroes it at init, forward supports any).
    n = 3 * 3 * C
    conv_w = jax.random.normal(k4, (C, C, 3, 3),
                               dtype=jnp.float32) * math.sqrt(2.0 / n)
    conv_b = 0.01 * jax.random.normal(k5, (C,), dtype=jnp.float32)

    out = filter_initializer_linear(feat, bb, conv_w, conv_b,
                                    feature_stride=feature_stride)
    out = jax.block_until_ready(out)
    assert out.shape == (ns, C, 1, 1), out.shape

    ref = _reference(feat, bb, conv_w, conv_b, feature_stride=feature_stride)
    if not jnp.allclose(out, ref, atol=2e-3, rtol=2e-3):
        max_err = float(jnp.max(jnp.abs(out - ref)))
        raise AssertionError(
            f"Pallas output mismatch vs JAX reference (max |err|={max_err})")

    print("KERNEL_OK")
</pallas_src>

<mosaic_0001>
module attributes {stable_mosaic.version = 11 : i64} {
  func.func @_filter_init_kernel(%arg0: i32, %arg1: i32, %arg2: memref<16x32xf32, #tpu.memory_space<vmem>>, %arg3: memref<1x16x32x256xf32, #tpu.memory_space<vmem>>, %arg4: memref<1x16x3x256xf32, #tpu.memory_space<vmem>>, %arg5: memref<1x3x16x16xf32, #tpu.memory_space<vmem>>, %arg6: memref<16x256xf32, #tpu.memory_space<vmem>>, %arg7: memref<9x32x32xf32, #tpu.memory_space<vmem>>, %arg8: memref<16x32xf32, #tpu.memory_space<vmem>>) attributes {dimension_semantics = [#tpu.dimension_semantics<parallel>, #tpu.dimension_semantics<arbitrary>], iteration_bounds = array<i64: 2, 2>, scalar_prefetch = 0 : i64, scratch_operands = 0 : i64, tpu.core_type = #tpu.core_type<tc>, window_params = [{transform_indices = @transform_0, window_bounds = array<i64: 16, 32>}, {transform_indices = @transform_1, window_bounds = array<i64: 1, 16, 32, 256>}, {transform_indices = @transform_2, window_bounds = array<i64: 1, 16, 3, 256>}, {transform_indices = @transform_3, window_bounds = array<i64: 1, 3, 16, 16>}, {pipeline_mode = #tpu.pipeline_mode<synchronous>, transform_indices = @transform_4, window_bounds = array<i64: 16, 256>}, {pipeline_mode = #tpu.pipeline_mode<synchronous>, transform_indices = @transform_5, window_bounds = array<i64: 9, 32, 32>}, {transform_indices = @transform_6, window_bounds = array<i64: 16, 32>}]} {
    %c0_i32 = arith.constant 0 : i32
    %0 = arith.cmpi eq, %arg1, %c0_i32 : i32
    %1 = arith.extui %0 : i1 to i32
    %c0_i32_0 = arith.constant 0 : i32
    %2 = arith.cmpi ne, %1, %c0_i32_0 : i32
    scf.if %2 {
      %c0_60 = arith.constant 0 : index
      %c0_61 = arith.constant 0 : index
      %87 = vector.load %arg2[%c0_60, %c0_61] : memref<16x32xf32, #tpu.memory_space<vmem>>, vector<16x32xf32>
      %c0_62 = arith.constant 0 : index
      %c0_63 = arith.constant 0 : index
      %88 = vector.load %arg8[%c0_62, %c0_63] : memref<16x32xf32, #tpu.memory_space<vmem>>, vector<16x32xf32>
      tpu.vector_store %arg8[%c0_62, %c0_63], %87 {strides = array<i32>} : memref<16x32xf32, #tpu.memory_space<vmem>>, vector<16x32xf32>,
    } else {
    }
    %c0 = arith.constant 0 : index
    %c0_1 = arith.constant 0 : index
    %c0_2 = arith.constant 0 : index
    %c0_3 = arith.constant 0 : index
    %3 = vector.load %arg3[%c0, %c0_1, %c0_2, %c0_3] : memref<1x16x32x256xf32, #tpu.memory_space<vmem>>, vector<1x16x32x256xf32>
    %4 = vector.shape_cast %3 : vector<1x16x32x256xf32> to vector<16x32x256xf32>
    %c0_4 = arith.constant 0 : index
    %c0_5 = arith.constant 0 : index
    %c0_6 = arith.constant 0 : index
    %c0_7 = arith.constant 0 : index
    %5 = vector.load %arg4[%c0_4, %c0_5, %c0_6, %c0_7] : memref<1x16x3x256xf32, #tpu.memory_space<vmem>>, vector<1x16x3x256xf32>
    %6 = vector.shape_cast %5 : vector<1x16x3x256xf32> to vector<16x3x256xf32>
    %c0_8 = arith.constant 0 : index
    %c0_9 = arith.constant 0 : index
    %7 = vector.load %arg6[%c0_8, %c0_9] : memref<16x256xf32, #tpu.memory_space<vmem>>, vector<16x256xf32>
    %cst = arith.constant 0.000000e+00 : f32
    %8 = vector.broadcast %cst : f32 to vector<16x32xf32>
    %c0_10 = arith.constant 0 : index
    %c0_11 = arith.constant 0 : index
    %c0_12 = arith.constant 0 : index
    %c0_13 = arith.constant 0 : index
    %9 = vector.load %arg5[%c0_10, %c0_11, %c0_12, %c0_13] : memref<1x3x16x16xf32, #tpu.memory_space<vmem>>, vector<1x1x16x16xf32>
    %10 = vector.shape_cast %9 : vector<1x1x16x16xf32> to vector<16x16xf32>
    %cst_14 = arith.constant dense<0.000000e+00> : vector<16x256xf32>
    %11 = tpu.matmul %10, %7, %cst_14 {dimension_numbers = #tpu.dot_dimension_numbers<[1], [0], [0], [1], [0, 0, 1, 1], [], []>} : vector<16x16xf32>, vector<16x256xf32>, vector<16x256xf32> -> vector<16x256xf32>
    %12 = vector.shape_cast %11 : vector<16x256xf32> to vector<16x1x256xf32>
    %13 = vector.broadcast %12 : vector<16x1x256xf32> to vector<16x3x256xf32>
    %14 = arith.mulf %6, %13 : vector<16x3x256xf32>
    "tpu.trace_start"() <{level = 10 : i32, message = "syp,scp->syc"}> : () -> ()
    %cst_15 = arith.constant dense<0.000000e+00> : vector<16x3x32xf32>
    %15 = tpu.matmul %14, %4, %cst_15 {dimension_numbers = #tpu.dot_dimension_numbers<[2], [2], [1], [1], [0, 0, 0, 1, 1, 1], [0], [0]>} : vector<16x3x256xf32>, vector<16x32x256xf32>, vector<16x3x32xf32> -> vector<16x3x32xf32>
    "tpu.trace_stop"() : () -> ()
    %16 = vector.extract_strided_slice %15 {offsets = [0, 0, 0], sizes = [16, 1, 32], strides = [1, 1, 1]} : vector<16x3x32xf32> to vector<16x1x32xf32>
    %17 = vector.shape_cast %16 : vector<16x1x32xf32> to vector<16x32xf32>
    %c0_16 = arith.constant 0 : index
    %c0_17 = arith.constant 0 : index
    %c0_18 = arith.constant 0 : index
    %18 = vector.load %arg7[%c0_16, %c0_17, %c0_18] : memref<9x32x32xf32, #tpu.memory_space<vmem>>, vector<1x32x32xf32>
    %19 = vector.shape_cast %18 : vector<1x32x32xf32> to vector<32x32xf32>
    %cst_19 = arith.constant dense<0.000000e+00> : vector<16x32xf32>
    %20 = tpu.matmul %17, %19, %cst_19 {dimension_numbers = #tpu.dot_dimension_numbers<[1], [0], [0], [1], [0, 0, 1, 1], [], []>} : vector<16x32xf32>, vector<32x32xf32>, vector<16x32xf32> -> vector<16x32xf32>
    %21 = arith.addf %8, %20 : vector<16x32xf32>
    %22 = vector.extract_strided_slice %15 {offsets = [0, 1, 0], sizes = [16, 1, 32], strides = [1, 1, 1]} : vector<16x3x32xf32> to vector<16x1x32xf32>
    %23 = vector.shape_cast %22 : vector<16x1x32xf32> to vector<16x32xf32>
    %c3 = arith.constant 3 : index
    %c0_20 = arith.constant 0 : index
    %c0_21 = arith.constant 0 : index
    %24 = vector.load %arg7[%c3, %c0_20, %c0_21] : memref<9x32x32xf32, #tpu.memory_space<vmem>>, vector<1x32x32xf32>
    %25 = vector.shape_cast %24 : vector<1x32x32xf32> to vector<32x32xf32>
    %cst_22 = arith.constant dense<0.000000e+00> : vector<16x32xf32>
    %26 = tpu.matmul %23, %25, %cst_22 {dimension_numbers = #tpu.dot_dimension_numbers<[1], [0], [0], [1], [0, 0, 1, 1], [], []>} : vector<16x32xf32>, vector<32x32xf32>, vector<16x32xf32> -> vector<16x32xf32>
    %27 = arith.addf %21, %26 : vector<16x32xf32>
    %28 = vector.extract_strided_slice %15 {offsets = [0, 2, 0], sizes = [16, 1, 32], strides = [1, 1, 1]} : vector<16x3x32xf32> to vector<16x1x32xf32>
    %29 = vector.shape_cast %28 : vector<16x1x32xf32> to vector<16x32xf32>
    %c6 = arith.constant 6 : index
    %c0_23 = arith.constant 0 : index
    %c0_24 = arith.constant 0 : index
    %30 = vector.load %arg7[%c6, %c0_23, %c0_24] : memref<9x32x32xf32, #tpu.memory_space<vmem>>, vector<1x32x32xf32>
    %31 = vector.shape_cast %30 : vector<1x32x32xf32> to vector<32x32xf32>
    %cst_25 = arith.constant dense<0.000000e+00> : vector<16x32xf32>
    %32 = tpu.matmul %29, %31, %cst_25 {dimension_numbers = #tpu.dot_dimension_numbers<[1], [0], [0], [1], [0, 0, 1, 1], [], []>} : vector<16x32xf32>, vector<32x32xf32>, vector<16x32xf32> -> vector<16x32xf32>
    %33 = arith.addf %27, %32 : vector<16x32xf32>
    %c0_26 = arith.constant 0 : index
    %c1 = arith.constant 1 : index
    %c0_27 = arith.constant 0 : index
    %c0_28 = arith.constant 0 : index
    %34 = vector.load %arg5[%c0_26, %c1, %c0_27, %c0_28] : memref<1x3x16x16xf32, #tpu.memory_space<vmem>>, vector<1x1x16x16xf32>
    %35 = vector.shape_cast %34 : vector<1x1x16x16xf32> to vector<16x16xf32>
    %cst_29 = arith.constant dense<0.000000e+00> : vector<16x256xf32>
    %36 = tpu.matmul %35, %7, %cst_29 {dimension_numbers = #tpu.dot_dimension_numbers<[1], [0], [0], [1], [0, 0, 1, 1], [], []>} : vector<16x16xf32>, vector<16x256xf32>, vector<16x256xf32> -> vector<16x256xf32>
    %37 = vector.shape_cast %36 : vector<16x256xf32> to vector<16x1x256xf32>
    %38 = vector.broadcast %37 : vector<16x1x256xf32> to vector<16x3x256xf32>
    %39 = arith.mulf %6, %38 : vector<16x3x256xf32>
    "tpu.trace_start"() <{level = 10 : i32, message = "syp,scp->syc"}> : () -> ()
    %cst_30 = arith.constant dense<0.000000e+00> : vector<16x3x32xf32>
    %40 = tpu.matmul %39, %4, %cst_30 {dimension_numbers = #tpu.dot_dimension_numbers<[2], [2], [1], [1], [0, 0, 0, 1, 1, 1], [0], [0]>} : vector<16x3x256xf32>, vector<16x32x256xf32>, vector<16x3x32xf32> -> vector<16x3x32xf32>
    "tpu.trace_stop"() : () -> ()
    %41 = vector.extract_strided_slice %40 {offsets = [0, 0, 0], sizes = [16, 1, 32], strides = [1, 1, 1]} : vector<16x3x32xf32> to vector<16x1x32xf32>
    %42 = vector.shape_cast %41 : vector<16x1x32xf32> to vector<16x32xf32>
    %c1_31 = arith.constant 1 : index
    %c0_32 = arith.constant 0 : index
    %c0_33 = arith.constant 0 : index
    %43 = vector.load %arg7[%c1_31, %c0_32, %c0_33] : memref<9x32x32xf32, #tpu.memory_space<vmem>>, vector<1x32x32xf32>
    %44 = vector.shape_cast %43 : vector<1x32x32xf32> to vector<32x32xf32>
    %cst_34 = arith.constant dense<0.000000e+00> : vector<16x32xf32>
    %45 = tpu.matmul %42, %44, %cst_34 {dimension_numbers = #tpu.dot_dimension_numbers<[1], [0], [0], [1], [0, 0, 1, 1], [], []>} : vector<16x32xf32>, vector<32x32xf32>, vector<16x32xf32> -> vector<16x32xf32>
    %46 = arith.addf %33, %45 : vector<16x32xf32>
    %47 = vector.extract_strided_slice %40 {offsets = [0, 1, 0], sizes = [16, 1, 32], strides = [1, 1, 1]} : vector<16x3x32xf32> to vector<16x1x32xf32>
    %48 = vector.shape_cast %47 : vector<16x1x32xf32> to vector<16x32xf32>
    %c4 = arith.constant 4 : index
    %c0_35 = arith.constant 0 : index
    %c0_36 = arith.constant 0 : index
    %49 = vector.load %arg7[%c4, %c0_35, %c0_36] : memref<9x32x32xf32, #tpu.memory_space<vmem>>, vector<1x32x32xf32>
    %50 = vector.shape_cast %49 : vector<1x32x32xf32> to vector<32x32xf32>
    %cst_37 = arith.constant dense<0.000000e+00> : vector<16x32xf32>
    %51 = tpu.matmul %48, %50, %cst_37 {dimension_numbers = #tpu.dot_dimension_numbers<[1], [0], [0], [1], [0, 0, 1, 1], [], []>} : vector<16x32xf32>, vector<32x32xf32>, vector<16x32xf32> -> vector<16x32xf32>
    %52 = arith.addf %46, %51 : vector<16x32xf32>
    %53 = vector.extract_strided_slice %40 {offsets = [0, 2, 0], sizes = [16, 1, 32], strides = [1, 1, 1]} : vector<16x3x32xf32> to vector<16x1x32xf32>
    %54 = vector.shape_cast %53 : vector<16x1x32xf32> to vector<16x32xf32>
    %c7 = arith.constant 7 : index
    %c0_38 = arith.constant 0 : index
    %c0_39 = arith.constant 0 : index
    %55 = vector.load %arg7[%c7, %c0_38, %c0_39] : memref<9x32x32xf32, #tpu.memory_space<vmem>>, vector<1x32x32xf32>
    %56 = vector.shape_cast %55 : vector<1x32x32xf32> to vector<32x32xf32>
    %cst_40 = arith.constant dense<0.000000e+00> : vector<16x32xf32>
    %57 = tpu.matmul %54, %56, %cst_40 {dimension_numbers = #tpu.dot_dimension_numbers<[1], [0], [0], [1], [0, 0, 1, 1], [], []>} : vector<16x32xf32>, vector<32x32xf32>, vector<16x32xf32> -> vector<16x32xf32>
    %58 = arith.addf %52, %57 : vector<16x32xf32>
    %c0_41 = arith.constant 0 : index
    %c2 = arith.constant 2 : index
    %c0_42 = arith.constant 0 : index
    %c0_43 = arith.constant 0 : index
    %59 = vector.load %arg5[%c0_41, %c2, %c0_42, %c0_43] : memref<1x3x16x16xf32, #tpu.memory_space<vmem>>, vector<1x1x16x16xf32>
    %60 = vector.shape_cast %59 : vector<1x1x16x16xf32> to vector<16x16xf32>
    %cst_44 = arith.constant dense<0.000000e+00> : vector<16x256xf32>
    %61 = tpu.matmul %60, %7, %cst_44 {dimension_numbers = #tpu.dot_dimension_numbers<[1], [0], [0], [1], [0, 0, 1, 1], [], []>} : vector<16x16xf32>, vector<16x256xf32>, vector<16x256xf32> -> vector<16x256xf32>
    %62 = vector.shape_cast %61 : vector<16x256xf32> to vector<16x1x256xf32>
    %63 = vector.broadcast %62 : vector<16x1x256xf32> to vector<16x3x256xf32>
    %64 = arith.mulf %6, %63 : vector<16x3x256xf32>
    "tpu.trace_start"() <{level = 10 : i32, message = "syp,scp->syc"}> : () -> ()
    %cst_45 = arith.constant dense<0.000000e+00> : vector<16x3x32xf32>
    %65 = tpu.matmul %64, %4, %cst_45 {dimension_numbers = #tpu.dot_dimension_numbers<[2], [2], [1], [1], [0, 0, 0, 1, 1, 1], [0], [0]>} : vector<16x3x256xf32>, vector<16x32x256xf32>, vector<16x3x32xf32> -> vector<16x3x32xf32>
    "tpu.trace_stop"() : () -> ()
    %66 = vector.extract_strided_slice %65 {offsets = [0, 0, 0], sizes = [16, 1, 32], strides = [1, 1, 1]} : vector<16x3x32xf32> to vector<16x1x32xf32>
    %67 = vector.shape_cast %66 : vector<16x1x32xf32> to vector<16x32xf32>
    %c2_46 = arith.constant 2 : index
    %c0_47 = arith.constant 0 : index
    %c0_48 = arith.constant 0 : index
    %68 = vector.load %arg7[%c2_46, %c0_47, %c0_48] : memref<9x32x32xf32, #tpu.memory_space<vmem>>, vector<1x32x32xf32>
    %69 = vector.shape_cast %68 : vector<1x32x32xf32> to vector<32x32xf32>
    %cst_49 = arith.constant dense<0.000000e+00> : vector<16x32xf32>
    %70 = tpu.matmul %67, %69, %cst_49 {dimension_numbers = #tpu.dot_dimension_numbers<[1], [0], [0], [1], [0, 0, 1, 1], [], []>} : vector<16x32xf32>, vector<32x32xf32>, vector<16x32xf32> -> vector<16x32xf32>
    %71 = arith.addf %58, %70 : vector<16x32xf32>
    %72 = vector.extract_strided_slice %65 {offsets = [0, 1, 0], sizes = [16, 1, 32], strides = [1, 1, 1]} : vector<16x3x32xf32> to vector<16x1x32xf32>
    %73 = vector.shape_cast %72 : vector<16x1x32xf32> to vector<16x32xf32>
    %c5 = arith.constant 5 : index
    %c0_50 = arith.constant 0 : index
    %c0_51 = arith.constant 0 : index
    %74 = vector.load %arg7[%c5, %c0_50, %c0_51] : memref<9x32x32xf32, #tpu.memory_space<vmem>>, vector<1x32x32xf32>
    %75 = vector.shape_cast %74 : vector<1x32x32xf32> to vector<32x32xf32>
    %cst_52 = arith.constant dense<0.000000e+00> : vector<16x32xf32>
    %76 = tpu.matmul %73, %75, %cst_52 {dimension_numbers = #tpu.dot_dimension_numbers<[1], [0], [0], [1], [0, 0, 1, 1], [], []>} : vector<16x32xf32>, vector<32x32xf32>, vector<16x32xf32> -> vector<16x32xf32>
    %77 = arith.addf %71, %76 : vector<16x32xf32>
    %78 = vector.extract_strided_slice %65 {offsets = [0, 2, 0], sizes = [16, 1, 32], strides = [1, 1, 1]} : vector<16x3x32xf32> to vector<16x1x32xf32>
    %79 = vector.shape_cast %78 : vector<16x1x32xf32> to vector<16x32xf32>
    %c8 = arith.constant 8 : index
    %c0_53 = arith.constant 0 : index
    %c0_54 = arith.constant 0 : index
    %80 = vector.load %arg7[%c8, %c0_53, %c0_54] : memref<9x32x32xf32, #tpu.memory_space<vmem>>, vector<1x32x32xf32>
    %81 = vector.shape_cast %80 : vector<1x32x32xf32> to vector<32x32xf32>
    %cst_55 = arith.constant dense<0.000000e+00> : vector<16x32xf32>
    %82 = tpu.matmul %79, %81, %cst_55 {dimension_numbers = #tpu.dot_dimension_numbers<[1], [0], [0], [1], [0, 0, 1, 1], [], []>} : vector<16x32xf32>, vector<32x32xf32>, vector<16x32xf32> -> vector<16x32xf32>
    %83 = arith.addf %77, %82 : vector<16x32xf32>
    %c0_56 = arith.constant 0 : index
    %c0_57 = arith.constant 0 : index
    %84 = vector.load %arg8[%c0_56, %c0_57] : memref<16x32xf32, #tpu.memory_space<vmem>>, vector<16x32xf32>
    %85 = arith.addf %84, %83 : vector<16x32xf32>
    %c0_58 = arith.constant 0 : index
    %c0_59 = arith.constant 0 : index
    %86 = vector.load %arg8[%c0_58, %c0_59] : memref<16x32xf32, #tpu.memory_space<vmem>>, vector<16x32xf32>
    tpu.vector_store %arg8[%c0_58, %c0_59], %85 {strides = array<i32>} : memref<16x32xf32, #tpu.memory_space<vmem>>, vector<16x32xf32>,
    return
  }
  func.func @transform_0(%arg0: i32, %arg1: i32) -> (i32, i32) {
    %c0_i32 = arith.constant 0 : i32
    %c0_i32_0 = arith.constant 0 : i32
    return %arg0, %c0_i32 : i32, i32
  }
  func.func @transform_1(%arg0: i32, %arg1: i32) -> (i32, i32, i32, i32) {
    %c0_i32 = arith.constant 0 : i32
    %c0_i32_0 = arith.constant 0 : i32
    %c0_i32_1 = arith.constant 0 : i32
    return %arg1, %arg0, %c0_i32, %c0_i32_0 : i32, i32, i32, i32
  }
  func.func @transform_2(%arg0: i32, %arg1: i32) -> (i32, i32, i32, i32) {
    %c0_i32 = arith.constant 0 : i32
    %c0_i32_0 = arith.constant 0 : i32
    %c0_i32_1 = arith.constant 0 : i32
    return %arg1, %arg0, %c0_i32, %c0_i32_0 : i32, i32, i32, i32
  }
  func.func @transform_3(%arg0: i32, %arg1: i32) -> (i32, i32, i32, i32) {
    %c0_i32 = arith.constant 0 : i32
    %c0_i32_0 = arith.constant 0 : i32
    %c0_i32_1 = arith.constant 0 : i32
    return %arg1, %c0_i32, %arg0, %c0_i32_0 : i32, i32, i32, i32
  }
  func.func @transform_4(%arg0: i32, %arg1: i32) -> (i32, i32) {
    %c0_i32 = arith.constant 0 : i32
    %c0_i32_0 = arith.constant 0 : i32
    %c0_i32_1 = arith.constant 0 : i32
    return %c0_i32, %c0_i32_0 : i32, i32
  }
  func.func @transform_5(%arg0: i32, %arg1: i32) -> (i32, i32, i32) {
    %c0_i32 = arith.constant 0 : i32
    %c0_i32_0 = arith.constant 0 : i32
    %c0_i32_1 = arith.constant 0 : i32
    %c0_i32_2 = arith.constant 0 : i32
    return %c0_i32, %c0_i32_0, %c0_i32_1 : i32, i32, i32
  }
  func.func @transform_6(%arg0: i32, %arg1: i32) -> (i32, i32) {
    %c0_i32 = arith.constant 0 : i32
    %c0_i32_0 = arith.constant 0 : i32
    return %arg0, %c0_i32 : i32, i32
  }
}

</mosaic_0001>

<bundles_post_ra>
// kernel: tpu_custom_call.1
= control target key start
LH: loop header
LB: loop body
LE: loop exit
PB: predicated region body
PF: predicated region fallthrough
CT: control target
= control target key end

     0   :  { %s8933_s0 = inlined_call_operand.hbm [shape: f32[32,32], index: 0, kind: input, shape index: {}]   ;;  %s8934_s1 = inlined_call_operand.hbm [shape: f32[2,32,32,256], index: 1, kind: input, shape index: {}]   ;;  %s8935_s2 = inlined_call_operand.vmem [shape: f32[2,32,3,256], index: 2, kind: input, shape index: {}]   ;;  %s8936_s3 = inlined_call_operand.vmem [shape: f32[2,3,32,16], index: 3, kind: input, shape index: {}]   ;;  %s8937_s4 = inlined_call_operand.hbm [shape: f32[16,256], index: 4, kind: input, shape index: {}]   ;;  %s8938_s5 = inlined_call_operand.hbm [shape: f32[9,32,32], index: 5, kind: input, shape index: {}]   ;;  %s8939_s6 = inlined_call_operand.hbm [shape: f32[32,32], index: 6, kind: output, shape index: {}]  }
   0x1   :  { %9058 = sst [smem:[#allocation129_spill]] %s8933_s0 }
   0x2   :  { %9059 = sst [smem:[#allocation130_spill]] %s8935_s2 }
   0x3   :  { %9060 = sst [smem:[#allocation131_spill]] %s8937_s4 }
   0x4   :  { %9061 = sst [smem:[#allocation132_spill]] %s8938_s5 }
   0x5   :  { %9062 = sst [smem:[#allocation133_spill]] %s8939_s6 }
   0x6   :  { %11 = vsyncpa [#allocation3], 0 }
   0x7   :  { %13 = vsyncpa [#allocation3 + $0x1], 0 }
   0x8   :  { %14 = vsyncpa [#allocation6], 0 }
   0x9   :  { %16 = vsyncpa [#allocation6 + $0x1], 0 }
   0xa   :  { %17 = vsyncpa [#allocation10], 0 }
   0xb   :  { %18 = vsyncpa [#allocation4], 0 }
   0xc   :  { %20 = vsyncpa [#allocation4 + $0x1], 0  ;;  %s7295_s21 = smov 0   ;;  %s7297_s22 = smov 0  }
   0xd   :  { %s7299_s23 = smov 0   ;;  %s7301_s24 = smov 0  }
   0xe   :  { %s7303_s25 = smov 0   ;;  %s7305_s26 = smov 0  }
   0xf   :  { %s7307_s27 = smov 0   ;;  %s7309_s28 = smov 0  }
  0x10   :  { %s7311_s29 = smov 0   ;;  %s7313_s30 = smov 0  }
  0x11   :  { %s7315_s7 = smov 0  }
  0x12 LB: > { %9063 = sst [smem:[#allocation17_spill]] %s7205_s22  ;;  %s7351_s8 = sadd.s32 4294967295, %s7241_s7   ;;  %s7241_s7 = sphi %s7315_s7, %s26_s7   ;;  %s7237_s30 = sphi %s7313_s30, %s9321_s30   ;;  %s7233_s29 = sphi %s7311_s29, %s9320_s29   ;;  %s7229_s28 = sphi %s7309_s28, %s9319_s28   ;;  %s7225_s27 = sphi %s7307_s27, %s9318_s27   ;;  %s7221_s26 = sphi %s7305_s26, %s9317_s26   ;;  %s7217_s25 = sphi %s7303_s25, %s9316_s25   ;;  %s7213_s24 = sphi %s7301_s24, %s9315_s24   ;;  %s7209_s23 = sphi %s7299_s23, %s9314_s23   ;;  %s7205_s22 = sphi %s7297_s22, %s9313_s22   ;;  %s7201_s21 = sphi %s7295_s21, %s9307_s21  }
  0x13   : > { %9064 = sst [smem:[#allocation18_spill]] %s7213_s24  ;;  %s6507_s9 = sadd.s32 4294967294, %s7241_s7  }
  0x14   : > { %9065 = sst [smem:[#allocation19_spill]] %s7221_s26  ;;  %s35_s10 = sadd.s32 1, %s7233_s29 }
  0x15   : > { %9066 = sst [smem:[#allocation20_spill]] %s7225_s27  ;;  %s38_s11 = sadd.s32 1, %s7237_s30 }
  0x16   : > { %9067 = sst [smem:[#allocation21_spill]] %s7229_s28  ;;  %p36_p0 = scmp.ge.s32.totalorder %s35_s10, 2 }
  0x17   : > { %s45_s12 = sadd.s32 1, %s7221_s26  ;;  %p52_p1 = scmp.ne.s32.totalorder %s7221_s26, %s7217_s25 }
  0x18   : > { %p53_p2 = scmp.eq.s32.totalorder %s7241_s7, 0  ;;  %s9323_s10 = smov (%p36_p0, %s35_s10), 0 }
  0x19   : > { %9068 = sst [smem:[#allocation22_spill]] %s9323_s10  ;;  %s9325_s11 = smov (!%p36_p0, %s38_s11), %s7237_s30 }
  0x1a   : > { %p7368_p3 = por %p53_p2, %p52_p1  ;;  %p8942_p4 = scmp.ne.s32.totalorder %s7217_s25, %s7213_s24 }
  0x1b   : > { %p40_p5 = scmp.ge.s32.totalorder %s9325_s11, 2  ;;  %p8948_p6 = scmp.eq.s32.totalorder %s7351_s8, 0 }
  0x1c   : > { %s68_s14 = ssub.s32 %s7233_s29, %s9323_s10  ;;  %s73_s15 = sadd.s32 1, %s7209_s23 }
  0x1d   : > { %s9327_s11 = smov (%p40_p5, %s9325_s11), 0  ;;  %p7385_p7 = por %p8948_p6, %p8942_p4 }
  0x1e   : > { %9070 = sst [smem:[#allocation23_spill]] %s9327_s11  ;;  %p80_p8 = scmp.ne.s32.totalorder %s7209_s23, %s7205_s22 }
  0x1f   : > { %s9071_s16 = scalar_select %p7385_p7, 1, 0 }
  0x20   : > { %s42_s17 = ssub.s32 %s7237_s30, %s9327_s11  ;;  %p86_p9 = scmp.ne.s32.totalorder %s7205_s22, %s7201_s21 }
  0x21   : > { %p43_p10 = scmp.eq.s32.totalorder %s42_s17, 0  ;;  %s70_s18 = sor.u32 %s68_s14, %s42_s17 }
  0x22   : > { %p71_p11 = scmp.eq.s32.totalorder %s70_s18, 0  ;;  %p7397_p12 = por %p80_p8, %p53_p2 }
  0x23   : > { %s7402_s20 = scalar_select %p43_p10, %s7221_s26, %s45_s12  }
  0x24   : > { %s9072_s19 = scalar_select %p7397_p12, 1, 0 }
  0x25   : > { %9073 = sst [smem:[#allocation24_spill]] %s7402_s20  ;;  %p7409_p13 = por %p86_p9, %p8948_p6 }
  0x26   : > { %s7405_s10 = scalar_select %p71_p11, %s7209_s23, %s73_s15  }
  0x27   : > { %s9075_s6 = scalar_select %p7409_p13, 1, 0 }
  0x28   : > { %9074 = sst [smem:[#allocation25_spill]] %s7405_s10  ;;  %p208_p0 = scmp.eq.s32.totalorder %s7351_s8, 3 }
  0x29   : > { %9076 = sst [smem:[#allocation26_spill]] %s9075_s6  ;;  %p214_p5 = scmp.eq.s32.totalorder %s6507_s9, 3 }
  0x2a   : > { %p6508_p4 = scmp.ge.s32.totalorder %s7241_s7, 1  ;;  %p7418_p7 = por %p208_p0, %p52_p1 }
  0x2b   : > { %p221_p2 = scmp.lt.s32.totalorder %s7241_s7, 5  ;;  %p9079_p8 = scmp.ne.s32.totalorder %s7217_s25, %s7213_s24 }
  0x2c   : > { %s9077_s21 = scalar_select %p7418_p7, 1, 0 }
  0x2d   : > { %p7426_p12 = por %p214_p5, %p9079_p8  ;;  %p7430_p10 = pnand %p6508_p4, %p221_p2 }
  0x2e   : > { %9078 = sst [smem:[#allocation27_spill]] %s9077_s21  ;;  %s7243_s15 = smov [#allocation8]  }
  0x2f   : > { %s9080_s12 = scalar_select %p7426_p12, 1, 0 }
  0x30   : > { %s233_s17 = sshll.u32 %s7243_s15, 4  ;;  %p6739_p9 = pneg %p7430_p10  ;;  %s234_s17 = int_to_ptr.vmem [resolvable:$true] %s233_s17 }
  0x31   : > { %9081 = sst [smem:[#allocation28_spill]] %s9080_s12  ;;  %s7244_s18 = smov [#allocation9]  }
  0x32   : > { %p7438_p1 = pnand %p6739_p9, %p8948_p6  ;;  %s246_s11 = sshll.u32 %s7244_s18, 4  ;;  %s247_s11 = int_to_ptr.vmem [resolvable:$true] %s246_s11 }
  0x33   : > { %s7016_s20 = scalar_lea.vmem %s234_s17, 512  ;;  %p7024_p2 = scmp.lt.s32.totalorder %s234_s17, %s234_s17 }
  0x34   : > { %p7007_p4 = pneg %p7438_p1  ;;  %p7017_p11 = scmp.ne.s32.totalorder %s234_s17, %s7016_s20 }
  0x35   : > { %p7025_p8 = scmp.lt.s32.totalorder %s7016_s20, %s7016_s20 }
  0x36   : > { %p7019_p0 = pnand %p7017_p11, %p7007_p4 }
  0x37   : > { %p7026_p12 = por %p7025_p8, %p7024_p2 }
  0x38   : > { %p7020_p5 = pneg %p7019_p0 }
  0x3a   : > { %p7027_p9 = pnand %p7026_p12, %p7020_p5 }
  0x3c   : > { %7030 = shalt.err (!%p7027_p9)
}
  0x3d   : > { %s7245_s15 = smov 256   ;;  %s7246_s10 = smov 16  }
  0x3e   : > { %s9084_s4 = sld [smem:[#allocation131_spill]]  ;;  %s7042_s24 = scalar_lea.vmem %s247_s11, 4608 }
  0x3f   : > { %p7043_p6 = scmp.ne.s32.totalorder %s247_s11, %s7042_s24  ;;  %p7050_p7 = scmp.lt.s32.totalorder %s247_s11, %s247_s11 }
  0x40   : > { %p7051_p13 = scmp.lt.s32.totalorder %s7042_s24, %s7042_s24 }
  0x41   : > { %p7045_p11 = pnand %p7043_p6, %p7007_p4 }
  0x42   : > { %p7052_p2 = por %p7051_p13, %p7050_p7 }
  0x43   : > { %p7046_p0 = pneg %p7045_p11 }
  0x44   : > { %6742 = dma.hbm_to_vmem [thread:$0]  (!%p7438_p1), %s9084_s4, 512, %s234_s17, [#allocation6], %s7245_s15, %s7245_s15, %s7246_s10  }
  0x45   : > { %p7053_p12 = pnand %p7052_p2, %p7046_p0 }
  0x47   : > { %7056 = shalt.err (!%p7053_p12)
}
  0x48   : > { %s7247_s20 = smov 128   ;;  %s7248_s21 = smov 8  }
  0x49   : > { %s9085_s5 = sld [smem:[#allocation132_spill]]  ;;  %p6511_p5 = scmp.ge.s32.totalorder %s7241_s7, 4 }
  0x4a   : > { %s260_s10 = sand.u32 (!%p6511_p5), 1, %s7221_s26   ;;  %s6566_s12 = sshll.u32 (!%p6511_p5), %s7237_s30, 8 }
  0x4b   : > { %256 = sbr.rel (%p6511_p5) target bundleno = 122 (0x7a), region = 24  ;;  %s6512_s24 = sshll.u32 (!%p6511_p5), %s260_s10, 4 }
  0x4c   : > { %s9086_s0 = sld [smem:[#allocation129_spill]] (!%p6511_p5)  ;;  %s264_s4 = scalar_lea.vmem (!%p6511_p5), [#allocation2], %s6512_s24 }
  0x4d   : > { %s271_s28 = sshll.u32 (!%p6511_p5), %s264_s4, 4  ;;  %s261_s9 = scalar_lea.sflag (!%p6511_p5), [#allocation3], %s260_s10  ;;  %s272_s28 = int_to_ptr.vmem [resolvable:$true] %s271_s28 }
  0x4e   : > { %s7069_s6 = scalar_lea.vmem (!%p6511_p5), %s272_s28, 256  ;;  %s7249_s2 = smov (!%p6511_p5), [#allocation2]  }
  0x4f   : > { %6745 = dma.hbm_to_vmem [thread:$0]  (!%p7438_p1), %s9085_s5, 4608, %s247_s11, [#allocation10], %s7247_s20, %s7247_s20, %s7248_s21  }
  0x50   : > { %p7070_p6 = scmp.ne.s32.totalorder %s272_s28, %s7069_s6  ;;  %s7073_s27 = sshll.u32 %s7249_s2, 4  ;;  %s7074_s27 = int_to_ptr.vmem [resolvable:$false] %s7073_s27 }
  0x51   : > { %s7075_s11 = scalar_lea.vmem %s7074_s27, 512  ;;  %p7076_p1 = scmp.lt.s32.totalorder %s272_s28, %s7074_s27 }
  0x52   : > { %s270_s18 = scalar_lea.hbm %s9086_s0, %s6566_s12  ;;  %p7071_p7 = pnand %p7070_p6, %p7368_p3 }
  0x53   : > { %p7077_p4 = scmp.lt.s32.totalorder %s7075_s11, %s7069_s6 }
  0x54   : > { %p7072_p13 = pneg %p7071_p7 }
  0x55   : > { %p7078_p8 = por %p7077_p4, %p7076_p1 }
  0x57   : > { %p7079_p9 = pnand %p7078_p8, %p7072_p13 }
  0x59   : > { %7082 = shalt.err (!%p7079_p9)
}
  0x5a   : > { %s7250_s21 = smov 128   ;;  %s7251_s4 = smov 8  }
  0x5b   : > { %6729 = dma.hbm_to_vmem [thread:$0]  (%p7368_p3), %s270_s18, 256, %s272_s28, %s261_s9, %s7250_s21, %s7250_s21, %s7251_s4  }
  0x5c   : > { %s281_s20 = sand.u32 1, %s7241_s7   ;;  %s283_s10 = sand.u32 1, %s7209_s23  }
  0x5d   : > { %s6515_s12 = sshll.u32 %s283_s10, 10  ;;  %s6567_s24 = sshll.u32 %s7237_s30, 7 }
  0x5e   : > { %s6518_s6 = sshll.u32 %s7233_s29, 8  ;;  %s285_s17 = scalar_lea.vmem [#allocation5], %s6515_s12 }
  0x5f   : > { %s295_s15 = sshll.u32 %s285_s17, 4  ;;  %s292_s2 = sadd.s32 %s6567_s24, %s6518_s6  ;;  %s296_s15 = int_to_ptr.vmem [resolvable:$true] %s295_s15 }
  0x60   : > { %s6519_s27 = sshll.u32 %s292_s2, 7  ;;  %s282_s26 = scalar_lea.sflag [#allocation6], %s281_s20 }
  0x61   : > { %s294_s5 = scalar_lea.hbm %s8934_s1, %s6519_s27  ;;  %s7095_s22 = scalar_lea.vmem %s296_s15, 16384 }
  0x62   : > { %p7096_p11 = scmp.ne.s32.totalorder %s296_s15, %s7095_s22  ;;  %p9087_p0 = scmp.ne.s32.totalorder %s9072_s19, 0 }
  0x63   : > { %s7252_s28 = smov [#allocation5]  }
  0x64   : > { %p7097_p3 = pnand %p7096_p11, %p9087_p0  ;;  %s7099_s13 = sshll.u32 %s7252_s28, 4  ;;  %s7100_s13 = int_to_ptr.vmem [resolvable:$false] %s7099_s13 }
  0x65   : > { %s7101_s18 = scalar_lea.vmem %s7100_s13, 32768  ;;  %p7102_p12 = scmp.lt.s32.totalorder %s296_s15, %s7100_s13 }
  0x66   : > { %p7098_p2 = pneg %p7097_p3  ;;  %p7103_p5 = scmp.lt.s32.totalorder %s7101_s18, %s7095_s22 }
  0x68   : > { %p7104_p6 = por %p7103_p5, %p7102_p12 }
  0x6a   : > { %p7105_p7 = pnand %p7104_p6, %p7098_p2 }
  0x6c   : > { %7108 = shalt.err (!%p7105_p7)
}
  0x6d   : > { %s7253_s9 = smov 256   ;;  %s7254_s21 = smov 16  }
  0x6e   : > { %6730 = dma.hbm_to_vmem [thread:$0]  (%p9087_p0), %s294_s5, 16384, %s296_s15, %s282_s26, %s7253_s9, %s7253_s9, %s7254_s21  }
  0x6f   : > { %318 = sbr.rel (!%p9087_p0) target bundleno = 122 (0x7a), region = 40  ;;  %s6520_s4 = sshll.u32 (%p9087_p0), %s7237_s30, 1 }
  0x70   : > { %s6722_s0 = smul.u32 (%p9087_p0), 48, %s283_s10 }
  0x71   : > { %s6723_s20 = smul.u32 (%p9087_p0), 12, %s7233_s29 }
  0x72   : > { %s322_s5 = scalar_lea.vmem (%p9087_p0), [#allocation7], %s6722_s0 }
  0x73   : > { %s325_s12 = sadd.s32 (%p9087_p0), %s6723_s20, %s6520_s4 }
  0x74   : > { %s6521_s22 = sshll.u32 %s325_s12, 3 }
  0x75   : > { %s327_s17 = scalar_lea.vmem %s8936_s3, %s6521_s22 }
  0x76   : > { %v366_v0 = vld [vmem:[%s327_s17] sm:$0xff]  ;;  %v368_v1 = vld [vmem:[%s327_s17 + $0x8] sm:$0xff] }
  0x77   : > { %v370_v2 = vld [vmem:[%s327_s17 + $0x20] sm:$0xff]  ;;  %367 = vst [vmem:[%s322_s5] sm:$0xff] %v366_v0  ;;  %369 = vst [vmem:[%s322_s5 + $0x8] sm:$0xff] %v368_v1  ;;  %v372_v3 = vld [vmem:[%s327_s17 + $0x28] sm:$0xff] }
  0x78   : > { %371 = vst [vmem:[%s322_s5 + $0x10] sm:$0xff] %v370_v2  ;;  %v374_v4 = vld [vmem:[%s327_s17 + $0x40] sm:$0xff]  ;;  %v376_v5 = vld [vmem:[%s327_s17 + $0x48] sm:$0xff]  ;;  %373 = vst [vmem:[%s322_s5 + $0x18] sm:$0xff] %v372_v3 }
  0x79   : > { %375 = vst [vmem:[%s322_s5 + $0x20] sm:$0xff] %v374_v4  ;;  %377 = vst [vmem:[%s322_s5 + $0x28] sm:$0xff] %v376_v5 }
  0x7a PF: > { %386 = sbr.rel (%p7430_p10) target bundleno = 1966 (0x7ae), region = 78 }
  0x7f   : > { %s7495_s26 = sand.u32 1, %s7217_s25   ;;  %p9088_p13 = scmp.ne.s32.totalorder %s9071_s16, 0 }
  0x80   : > { %s6523_s19 = sshll.u32 %s7495_s26, 4  ;;  %s389_s10 = scalar_lea.sflag [#allocation3], %s7495_s26 }
  0x81   : > { %s7499_s15 = scalar_lea.vmem [#allocation2], %s6523_s19 }
  0x82   : > { %7180 = dma.done.wait (%p9088_p13), %s389_s10, 256  }
  0x83   : > { %7182 = vsyncadd (%p9088_p13), %s389_s10, 4294967040  ;;  %s9089_s2 = sld [smem:[#allocation17_spill]]  ;;  %s397_s14 = sand.u32 1, %s7351_s8  }
  0x84   : > { %s9090_s27 = sld [smem:[#allocation26_spill]]  ;;  %s398_s13 = scalar_lea.sflag [#allocation6], %s397_s14 }
  0x89   : > { %s399_s11 = sand.u32 1, %s9089_s2  }
  0x8a   : > { %s6524_s28 = sshll.u32 %s399_s11, 10  ;;  %p9091_p10 = scmp.ne.s32.totalorder %s9090_s27, 0 }
  0x8b   : > { %s7507_s18 = scalar_lea.vmem [#allocation5], %s6524_s28 }
  0x8c   : > { %7184 = dma.done.wait (%p9091_p10), %s398_s13, 16384  }
  0x8d   : > { %7186 = vsyncadd (%p9091_p10), %s398_s13, 4294950912  ;;  %s6724_s9 = smul.u32 48, %s399_s11  ;;  %p9092_p1 = scmp.eq.s32.totalorder %s7351_s8, 0 }
  0x8f   : > { %s7513_s21 = scalar_lea.vmem [#allocation7], %s6724_s9 }
  0x90   : > { %7188 = dma.done.wait (%p9092_p1), [#allocation6], 512   ;;  %p9093_p4 = pmov %p9092_p1 }
  0x91   : > { %p9094_p8 = pmov %p9092_p1 }
  0x92   : > { %7190 = vsyncadd (%p9093_p4), [#allocation6], 4294966784 }
  0x93   : > { %7192 = dma.done.wait (%p9094_p8), [#allocation10], 4608   ;;  %p9095_p9 = pmov %p9092_p1 }
  0x94   : > { %s9096_s16 = sld [smem:[#allocation21_spill]]  ;;  %s7531_s27 = scalar_lea.vmem [#allocation11], %s6523_s19 }
  0x95   : > { %7194 = vsyncadd (%p9095_p9), [#allocation10], 4294962688  ;;  %s9097_s0 = sld [smem:[#allocation20_spill]] }
  0x96   : > { %s9098_s10 = sld [smem:[#allocation130_spill]] }
  0x9a   : > { %s6528_s4 = sshll.u32 %s9096_s16, 4 }
  0x9b   : > { %p467_p11 = scmp.lt.s32.totalorder %s9097_s0, 1  ;;  %p469_p0 = scmp.lt.s32.totalorder %s6528_s4, 31 }
  0x9c   : > { %p6532_p3 = scmp.ne.s32.totalorder %s9097_s0, 0 }
  0x9d   : > { %s468_s20 = scalar_select %p467_p11, %s9097_s0, 1 }
  0x9e   : > { %s9329_s4 = smov (!%p469_p0, %s6528_s4), 31  ;;  %482 = sbr.rel (%p6532_p3) target bundleno = 165 (0xa5), region = 102 }
  0x9f   : > { %s6530_s12 = sshll.u32 %s468_s20, 6  ;;  %s6529_s22 = sshll.u32 %s9329_s4, 1 }
  0xa0   : > { %s473_s24 = sadd.s32 %s6530_s12, %s6529_s22 }
  0xa1   : > { %s6531_s6 = sshll.u32 %s473_s24, 2 }
  0xa2   : > { %s7529_s2 = scalar_lea.vmem %s9098_s10, %s6531_s6 }
  0xa3   : > { %v483_v6 = vld [vmem:[%s7499_s15] sm:$0xff]  ;;  %vm485_vm0 = vcmask 261120   ;;  %v484_v7 = vld [vmem:[%s7499_s15 + $0x8] sm:$0xff] }
  0xa4   : > { %486 = vst.msk [vmem:[%s7531_s27] sm:$0xff] %vm485_vm0, %v483_v6  ;;  %487 = vst.msk [vmem:[%s7531_s27 + $0x8] sm:$0xff] %vm485_vm0, %v484_v7 }
  0xa5 PF: > { %v7538_v8 = vld [vmem:[#allocation8 + $0x18] sm:$0xff]  ;;  %v634_v9 = vld [vmem:[#allocation8 + $0x10] sm:$0xff]  ;;  %v633_v10 = vld [vmem:[#allocation8 + $0x8] sm:$0xff]  ;;  %v8958_v12 = vmov 0.0   ;;  %vm638_vm1 = vcmask 130048   ;;  %v731_v35 = vlaneseq  ;;  %vm2196_vm2 = vcmask 1041409  }
  0xa6   : > { %673 = vmatprep.subr.mxu0 %v7538_v8  ;;  %v632_v11 = vld [vmem:[#allocation8] sm:$0xff]  ;;  %709 = vmatprep.mubr.f32.mxu0 %v8958_v12  ;;  %v637_v14 = vld [vmem:[%s7513_s21 + $0x8] sm:$0xff]  ;;  %v494_v16 = vld [vmem:[%s7507_s18 + $0x30] sm:$0xff]  ;;  %v7256_v33 = vmov 1966171168   ;;  %vm2199_vm3 = vcmask 1042434  }
  0xa7   : > { %674 = vmatpush1.msra.mxu0 %v634_v9  ;;  %v636_v13 = vld [vmem:[%s7513_s21] sm:$0xff]  ;;  %v495_v15 = vld [vmem:[%s7507_s18 + $0x38] sm:$0xff]  ;;  %v493_v19 = vld [vmem:[%s7507_s18 + $0x28] sm:$0xff]  ;;  %v729_v34 = vunpack.c.l.s4 %v7256_v33  ;;  %v732_v37 = vshrl.u32 %v731_v35, 7  ;;  %vm2202_vm4 = vcmask 1043459   ;;  %vm2205_vm5 = vcmask 1044484  }
  0xa8   : > { %675 = vmatprep.subr.mxu0 %v633_v10  ;;  %1029 = vmatprep.subr.mxu1 %v495_v15  ;;  %v503_v17 = vld [vmem:[%s7507_s18 + $0x78] sm:$0xff]  ;;  %v502_v18 = vld [vmem:[%s7507_s18 + $0x70] sm:$0xff]  ;;  %v492_v20 = vld [vmem:[%s7507_s18 + $0x20] sm:$0xff]  ;;  %vm2208_vm6 = vcmask 1045509   ;;  %vm2211_vm7 = vcmask 1046534   ;;  %vm2214_vm8 = vcmask 1047559  }
  0xa9   : > { %676 = vmatpush1.msra.mxu0 %v632_v11  ;;  %1030 = vmatpush1.xpose.msra.mxu1 %v494_v16  ;;  %v501_v21 = vld [vmem:[%s7507_s18 + $0x68] sm:$0xff]  ;;  %v500_v22 = vld [vmem:[%s7507_s18 + $0x60] sm:$0xff]  ;;  %v491_v23 = vld [vmem:[%s7507_s18 + $0x18] sm:$0xff]  ;;  %v730_v36 = vunpack.c.0.s8 %v729_v34  ;;  %v7568_v43 = vsub.s32 0, %v732_v37  ;;  %v7570_v44 = vsub.s32 1, %v732_v37  ;;  %vm2230_vm9 = vcmask 261120  }
  0xaa   : > { %6533 = vmatmul.mubr.msk.f32.vlgmr.msra.gmra.mxu0 %vm638_vm1, %v636_v13  ;;  %1102 = vmatprep.subr.mxu0 %v503_v17  ;;  %v490_v24 = vld [vmem:[%s7507_s18 + $0x10] sm:$0xff]  ;;  %v499_v25 = vld [vmem:[%s7507_s18 + $0x58] sm:$0xff]  ;;  %v489_v27 = vld [vmem:[%s7507_s18 + $0x8] sm:$0xff]  ;;  %s9300_s8 = sld [smem:[#allocation21_spill]]  ;;  %s6335_s14 = sshll.u32 %s7531_s27, 4  ;;  %s8867_s14 = int_to_ptr.vmem [resolvable:$true] %s6335_s14 }
  0xab   : > { %715 = vmatprep.mubr.f32.mxu0 %v8958_v12  ;;  %1103 = vmatpush1.xpose.msra.mxu0 %v502_v18  ;;  %v498_v26 = vld [vmem:[%s7507_s18 + $0x50] sm:$0xff]  ;;  %v497_v28 = vld [vmem:[%s7507_s18 + $0x48] sm:$0xff]  ;;  %v488_v29 = vld [vmem:[%s7507_s18] sm:$0xff]  ;;  %v7565_v39 = vsub.s32 %v730_v36, %v732_v37  ;;  %s9301_s19 = sld [smem:[#allocation27_spill]]  ;;  %s6322_s9 = scalar_lea.sflag [#allocation4], %s7495_s26 }
  0xac   : > { %1031 = vmatprep.subr.mxu1 %v493_v19  ;;  %1104 = vmatprep.subr.mxu0 %v501_v21  ;;  %v496_v30 = vld [vmem:[%s7507_s18 + $0x40] sm:$0xff]  ;;  %v511_v31 = vld [vmem:[%s7507_s18 + $0xb8] sm:$0xff]  ;;  %v617_v59 = vld [vmem:[%s7529_s2 + $0x8] sm:$0x77]  ;;  %s9302_s13 = sld [smem:[#allocation133_spill]]  ;;  %s7257_s16 = smov [#allocation11]  }
  0xad   : > { %1032 = vmatpush1.xpose.msra.mxu1 %v492_v20  ;;  %v519_v32 = vld [vmem:[%s7507_s18 + $0xf8] sm:$0xff]  ;;  %v616_v52 = vld [vmem:[%s7529_s2] sm:$0x77]  ;;  %v618_v60 = vld [vmem:[%s7529_s2 + $0x10] sm:$0x77]  ;;  %s7113_s0 = sshll.u32 %s7257_s16, 4  ;;  %s7114_s0 = int_to_ptr.vmem [resolvable:$false] %s7113_s0 }
  0xae   : > { %6534 = vmatmul.mubr.msk.f32.gmra.mxu0 %vm638_vm1, %v637_v14  ;;  %1033 = vmatprep.subr.mxu1 %v491_v23  ;;  %v619_v5 = vld [vmem:[%s7529_s2 + $0x18] sm:$0x77]  ;;  %v510_v10 = vld [vmem:[%s7507_s18 + $0xb0] sm:$0xff]  ;;  %v509_v15 = vld [vmem:[%s7507_s18 + $0xa8] sm:$0xff]  ;;  %s7115_s4 = scalar_lea.vmem %s7114_s0, 512  ;;  %p7116_p7 = scmp.lt.s32.totalorder %s8867_s14, %s7114_s0 }
  0xaf   : > { %1105 = vmatpush1.xpose.msra.mxu0 %v500_v22  ;;  %v518_v17 = vld [vmem:[%s7507_s18 + $0xf0] sm:$0xff]  ;;  %v517_v20 = vld [vmem:[%s7507_s18 + $0xe8] sm:$0xff]  ;;  %v508_v21 = vld [vmem:[%s7507_s18 + $0xa0] sm:$0xff] }
  0xb0   : > { %1106 = vmatprep.subr.mxu0 %v499_v25  ;;  %v507_v22 = vld [vmem:[%s7507_s18 + $0x98] sm:$0xff]  ;;  %v516_v25 = vld [vmem:[%s7507_s18 + $0xe0] sm:$0xff]  ;;  %v513_v34 = vld [vmem:[%s7507_s18 + $0xc8] sm:$0xff]  ;;  %s6568_s15 = sshll.u32 %s9300_s8, 8 }
  0xb1   : > { %1034 = vmatpush1.xpose.msra.mxu1 %v490_v24  ;;  %v620_v33 = vld [vmem:[%s7529_s2 + $0x20] sm:$0x77]  ;;  %v621_v37 = vld [vmem:[%s7529_s2 + $0x28] sm:$0x77]  ;;  %p9303_p12 = scmp.ne.s32.totalorder %s9301_s19, 0 }
  0xb2   : > { %1035 = vmatprep.subr.mxu1 %v489_v27  ;;  %v504_v36 = vld [vmem:[%s7507_s18 + $0x80] sm:$0xff] }
  0xb3   : > { %1107 = vmatpush1.xpose.msra.mxu0 %v498_v26  ;;  %v515_v26 = vld [vmem:[%s7507_s18 + $0xd8] sm:$0xff] }
  0xb4   : > { %1108 = vmatprep.subr.mxu0 %v497_v28 }
  0xb5   : > { %1036 = vmatpush1.xpose.msra.mxu1 %v488_v29  ;;  %v506_v29 = vld [vmem:[%s7507_s18 + $0x90] sm:$0xff] }
  0xb6   : > { %1175 = vmatprep.subr.mxu1 %v511_v31 }
  0xb7   : > { %1109 = vmatpush1.xpose.msra.mxu0 %v496_v30  ;;  %v505_v30 = vld [vmem:[%s7507_s18 + $0x88] sm:$0xff] }
  0xb8   : > { %1248 = vmatprep.subr.mxu0 %v519_v32  ;;  %v514_v32 = vld [vmem:[%s7507_s18 + $0xd0] sm:$0xff] }
 0x16a   : > { %v711_v38 = vpop.f32.mrf.mxu0 }
 0x16c   : > { %v713_v40 = vpop.f32.mrf.mxu0 }
 0x16d   : > { %v726_v41 = vcombine.low %v711_v38, %v713_v40  ;;  %v727_v47 = vcombine.high %v711_v38, %v713_v40  ;;  %v527_v38 = vld [vmem:[%s7507_s18 + $0x138] sm:$0xff] }
 0x16f   : > { %v734_v42 = vrot.slane %v726_v41, %v7565_v39  ;;  %v741_v57 = vrot.slane %v727_v47, %v7565_v39  ;;  %v512_v41 = vld [vmem:[%s7507_s18 + $0xc0] sm:$0xff]  ;;  %v526_v47 = vld [vmem:[%s7507_s18 + $0x130] sm:$0xff] }
 0x171   : > { %v742_v45 = vcombine.high %v734_v42, %v734_v42  ;;  %v750_v46 = vrot.slane %v734_v42, %v7565_v39  ;;  %v743_v6 = vcombine.high %v741_v57, %v741_v57  ;;  %v757_v14 = vrot.slane %v741_v57, %v7565_v39  ;;  %v7612_v42 = vpop.f32.mrf.mxu0  ;;  %v523_v57 = vld [vmem:[%s7507_s18 + $0x118] sm:$0xff] }
 0x173   : > { %v764_v48 = vrot.slane %v742_v45, %v7565_v39  ;;  %v772_v49 = vcombine.high %v750_v46, %v750_v46  ;;  %v829_v50 = vrot.slane %v750_v46, %v7568_v43  ;;  %v833_v51 = vrot.slane %v750_v46, %v7570_v44  ;;  %v535_v45 = vld [vmem:[%s7507_s18 + $0x178] sm:$0xff] }
 0x174   : > { %v771_v18 = vrot.slane %v743_v6, %v7565_v39  ;;  %v861_v23 = vrot.slane %v757_v14, %v7568_v43  ;;  %v865_v24 = vrot.slane %v757_v14, %v7570_v44  ;;  %v622_v6 = vld [vmem:[%s7529_s2 + $0x30] sm:$0x77] }
 0x175   : > { %v837_v53 = vrot.slane %v764_v48, %v7568_v43  ;;  %v841_v54 = vrot.slane %v764_v48, %v7570_v44  ;;  %v845_v55 = vrot.slane %v772_v49, %v7568_v43  ;;  %v849_v56 = vrot.slane %v772_v49, %v7570_v44 }
 0x176   : > { %v954_v58 = vcombine.low %v829_v50, %v833_v51  ;;  %v774_v61 = vcombine.high %v764_v48, %v764_v48  ;;  %v869_v27 = vrot.slane %v771_v18, %v7568_v43  ;;  %v873_v28 = vrot.slane %v771_v18, %v7570_v44  ;;  %v525_v50 = vld [vmem:[%s7507_s18 + $0x128] sm:$0xff]  ;;  %v534_v51 = vld [vmem:[%s7507_s18 + $0x170] sm:$0xff] }
 0x177   : > { %v955_v62 = vcombine.low %v837_v53, %v841_v54  ;;  %v956_v63 = vcombine.low %v845_v55, %v849_v56  ;;  %v958_v31 = vcombine.low %v861_v23, %v865_v24  ;;  %v773_v48 = vcombine.high %v757_v14, %v757_v14  ;;  %v533_v54 = vld [vmem:[%s7507_s18 + $0x168] sm:$0xff]  ;;  %v524_v56 = vld [vmem:[%s7507_s18 + $0x120] sm:$0xff]  ;;  %v550_v24 = vld [vmem:[%s7507_s18 + $0x1f0] sm:$0xff] }
 0x178   : > { %v986_v0 = vmul.f32 %v954_v58, %v616_v52  ;;  %v853_v1 = vrot.slane %v774_v61, %v7568_v43  ;;  %v857_v2 = vrot.slane %v774_v61, %v7570_v44  ;;  %v959_v35 = vcombine.low %v869_v27, %v873_v28  ;;  %v7622_v52 = vpop.f32.mrf.mxu0  ;;  %v532_v61 = vld [vmem:[%s7507_s18 + $0x160] sm:$0xff] }
 0x179   : > { %v987_v3 = vmul.f32 %v955_v62, %v617_v59  ;;  %v988_v4 = vmul.f32 %v956_v63, %v618_v60  ;;  %v7609_v40 = vmul.f32 %v958_v31, %v620_v33  ;;  %v775_v55 = vcombine.high %v771_v18, %v771_v18  ;;  %v531_v62 = vld [vmem:[%s7507_s18 + $0x158] sm:$0xff]  ;;  %v548_v33 = vld [vmem:[%s7507_s18 + $0x1e0] sm:$0xff] }
 0x17a   : > { %v1003_v7 = vcombine.high %v986_v0, %v986_v0  ;;  %v957_v9 = vcombine.low %v853_v1, %v857_v2  ;;  %v7615_v46 = vmul.f32 %v959_v35, %v621_v37  ;;  %v877_v58 = vrot.slane %v773_v48, %v7568_v43  ;;  %v522_v1 = vld [vmem:[%s7507_s18 + $0x110] sm:$0xff]  ;;  %v521_v2 = vld [vmem:[%s7507_s18 + $0x108] sm:$0xff]  ;;  %v624_v37 = vld [vmem:[%s7529_s2 + $0x40] sm:$0x77] }
 0x17b   : > { %v1076_v11 = vcombine.high %v987_v3, %v987_v3  ;;  %v1149_v13 = vcombine.high %v988_v4, %v988_v4  ;;  %v1295_v49 = vcombine.high %v7609_v40, %v7609_v40  ;;  %v881_v59 = vrot.slane %v773_v48, %v7570_v44  ;;  %v536_v48 = vld [vmem:[%s7507_s18 + $0x180] sm:$0xff] }
 0x17c   : > { %1069 = vmatprep.mubr.f32.mxu1 %v1003_v7  ;;  %v989_v16 = vmul.f32 %v957_v9, %v619_v5  ;;  %v1368_v53 = vcombine.high %v7615_v46, %v7615_v46  ;;  %v776_v60 = vcombine.low %v7612_v42, %v7622_v52  ;;  %v885_v63 = vrot.slane %v775_v55, %v7568_v43  ;;  %v530_v5 = vld [vmem:[%s7507_s18 + $0x150] sm:$0xff]  ;;  %v529_v7 = vld [vmem:[%s7507_s18 + $0x148] sm:$0xff] }
 0x17d   : > { %1070 = vmatmul.mubr.f32.vlgmr.msra.gmra.mxu1 %v986_v0  ;;  %1142 = vmatprep.mubr.f32.mxu0 %v1076_v11  ;;  %v889_v0 = vrot.slane %v775_v55, %v7570_v44  ;;  %v623_v11 = vld [vmem:[%s7529_s2 + $0x38] sm:$0x77] }
 0x17e   : > { %1176 = vmatpush1.xpose.msra.mxu1 %v510_v10  ;;  %1215 = vmatprep.mubr.f32.mxu1 %v1149_v13  ;;  %v1222_v19 = vcombine.high %v989_v16, %v989_v16  ;;  %v520_v10 = vld [vmem:[%s7507_s18 + $0x100] sm:$0xff]  ;;  %v543_v13 = vld [vmem:[%s7507_s18 + $0x1b8] sm:$0xff] }
 0x17f   : > { %1143 = vmatmul.mubr.f32.vlgmr.msra.gmra.mxu0 %v987_v3  ;;  %1177 = vmatprep.subr.mxu1 %v509_v15  ;;  %v960_v3 = vcombine.low %v877_v58, %v881_v59  ;;  %v961_v9 = vcombine.low %v885_v63, %v889_v0  ;;  %v556_v0 = vld [vmem:[%s7507_s18 + $0x220] sm:$0xff] }
 0x180   : > { %1249 = vmatpush1.xpose.msra.mxu0 %v518_v17  ;;  %1288 = vmatprep.mubr.f32.mxu0 %v1222_v19  ;;  %v551_v17 = vld [vmem:[%s7507_s18 + $0x1f8] sm:$0xff] }
 0x181   : > { %1250 = vmatprep.subr.mxu0 %v517_v20  ;;  %v7646_v14 = vmul.f32 %v960_v3, %v622_v6  ;;  %v7650_v18 = vmul.f32 %v961_v9, %v623_v11  ;;  %v542_v20 = vld [vmem:[%s7507_s18 + $0x1b0] sm:$0xff]  ;;  %v563_v6 = vld [vmem:[%s7507_s18 + $0x258] sm:$0xff]  ;;  %v553_v11 = vld [vmem:[%s7507_s18 + $0x208] sm:$0xff] }
 0x182   : > { %1178 = vmatpush1.xpose.msra.mxu1 %v508_v21  ;;  %v554_v9 = vld [vmem:[%s7507_s18 + $0x210] sm:$0xff] }
 0x183   : > { %1179 = vmatprep.subr.mxu1 %v507_v22  ;;  %v1441_v21 = vcombine.high %v7646_v14, %v7646_v14  ;;  %v541_v22 = vld [vmem:[%s7507_s18 + $0x1a8] sm:$0xff] }
 0x184   : > { %1251 = vmatpush1.xpose.msra.mxu0 %v516_v25  ;;  %v1514_v25 = vcombine.high %v7650_v18, %v7650_v18 }
 0x185   : > { %1252 = vmatprep.subr.mxu0 %v515_v26  ;;  %v549_v26 = vld [vmem:[%s7507_s18 + $0x1e8] sm:$0xff] }
 0x186   : > { %1180 = vmatpush1.xpose.msra.mxu1 %v506_v29  ;;  %v540_v29 = vld [vmem:[%s7507_s18 + $0x1a0] sm:$0xff] }
 0x187   : > { %1181 = vmatprep.subr.mxu1 %v505_v30  ;;  %v539_v30 = vld [vmem:[%s7507_s18 + $0x198] sm:$0xff] }
 0x188   : > { %1253 = vmatpush1.xpose.msra.mxu0 %v514_v32 }
 0x189   : > { %1254 = vmatprep.subr.mxu0 %v513_v34  ;;  %v547_v34 = vld [vmem:[%s7507_s18 + $0x1d8] sm:$0xff] }
 0x18a   : > { %1182 = vmatpush1.xpose.msra.mxu1 %v504_v36  ;;  %v538_v36 = vld [vmem:[%s7507_s18 + $0x190] sm:$0xff] }
 0x18b   : > { %1321 = vmatprep.subr.mxu1 %v527_v38  ;;  %v537_v38 = vld [vmem:[%s7507_s18 + $0x188] sm:$0xff] }
 0x18c   : > { %1255 = vmatpush1.xpose.msra.mxu0 %v512_v41  ;;  %v546_v41 = vld [vmem:[%s7507_s18 + $0x1d0] sm:$0xff] }
 0x18d   : > { %1216 = vmatmul.mubr.f32.vlgmr.msra.gmra.mxu1 %v988_v4  ;;  %1394 = vmatprep.subr.mxu0 %v535_v45  ;;  %v784_v4 = vrot.slane %v776_v60, %v7565_v39  ;;  %v625_v45 = vld [vmem:[%s7529_s2 + $0x48] sm:$0x77]  ;;  %v566_v60 = vld [vmem:[%s7507_s18 + $0x270] sm:$0xff] }
 0x18e   : > { %1322 = vmatpush1.xpose.msra.mxu1 %v526_v47  ;;  %1361 = vmatprep.mubr.f32.mxu1 %v1295_v49  ;;  %v559_v49 = vld [vmem:[%s7507_s18 + $0x238] sm:$0xff] }
 0x18f   : > { %1289 = vmatmul.mubr.f32.vlgmr.msra.gmra.mxu0 %v989_v16  ;;  %1323 = vmatprep.subr.mxu1 %v525_v50  ;;  %v792_v15 = vcombine.high %v784_v4, %v784_v4  ;;  %v528_v16 = vld [vmem:[%s7507_s18 + $0x140] sm:$0xff]  ;;  %v800_v19 = vrot.slane %v784_v4, %v7565_v39 }
 0x190   : > { %1395 = vmatpush1.xpose.msra.mxu0 %v534_v51  ;;  %1434 = vmatprep.mubr.f32.mxu0 %v1368_v53  ;;  %v544_v51 = vld [vmem:[%s7507_s18 + $0x1c0] sm:$0xff] }
 0x191   : > { %1396 = vmatprep.subr.mxu0 %v533_v54  ;;  %v814_v23 = vrot.slane %v792_v15, %v7565_v39  ;;  %v893_v27 = vrot.slane %v800_v19, %v7568_v43  ;;  %v897_v28 = vrot.slane %v800_v19, %v7570_v44  ;;  %v822_v53 = vcombine.high %v800_v19, %v800_v19  ;;  %v567_v54 = vld [vmem:[%s7507_s18 + $0x278] sm:$0xff]  ;;  %v564_v4 = vld [vmem:[%s7507_s18 + $0x260] sm:$0xff] }
 0x192   : > { %1324 = vmatpush1.xpose.msra.mxu1 %v524_v56  ;;  %v558_v56 = vld [vmem:[%s7507_s18 + $0x230] sm:$0xff]  ;;  %v627_v15 = vld [vmem:[%s7529_s2 + $0x58] sm:$0x77] }
 0x193   : > { %1325 = vmatprep.subr.mxu1 %v523_v57  ;;  %v901_v31 = vrot.slane %v814_v23, %v7568_v43  ;;  %v905_v32 = vrot.slane %v814_v23, %v7570_v44  ;;  %v962_v35 = vcombine.low %v893_v27, %v897_v28  ;;  %v557_v57 = vld [vmem:[%s7507_s18 + $0x228] sm:$0xff]  ;;  %v824_v59 = vcombine.high %v814_v23, %v814_v23  ;;  %v583_v23 = vld [vmem:[%s7507_s18 + $0x2f8] sm:$0xff]  ;;  %v7732_v28 = vld [vmem:[%s7507_s18 + $0x2f0] sm:$0xff] }
 0x194   : > { %1397 = vmatpush1.xpose.msra.mxu0 %v532_v61  ;;  %v565_v61 = vld [vmem:[%s7507_s18 + $0x268] sm:$0xff]  ;;  %v913_v63 = vrot.slane %v822_v53, %v7570_v44 }
 0x195   : > { %1398 = vmatprep.subr.mxu0 %v531_v62  ;;  %v7678_v47 = vmul.f32 %v962_v35, %v624_v37  ;;  %v909_v62 = vrot.slane %v822_v53, %v7568_v43  ;;  %v921_v3 = vrot.slane %v824_v59, %v7570_v44  ;;  %v7728_v27 = vld [vmem:[%s7507_s18 + $0x2a8] sm:$0xff]  ;;  %v7751_v35 = vld [vmem:[%s7507_s18 + $0x2e0] sm:$0xff]  ;;  %v7787_v53 = vld [vmem:[%s7507_s18 + $0x338] sm:$0xff] }
 0x196   : > { %1326 = vmatpush1.xpose.msra.mxu1 %v522_v1  ;;  %v555_v1 = vld [vmem:[%s7507_s18 + $0x218] sm:$0xff] }
 0x197   : > { %1327 = vmatprep.subr.mxu1 %v521_v2  ;;  %v1587_v55 = vcombine.high %v7678_v47, %v7678_v47  ;;  %v917_v2 = vrot.slane %v824_v59, %v7568_v43 }
 0x198   : > { %1399 = vmatpush1.xpose.msra.mxu0 %v530_v5  ;;  %v777_v5 = vcombine.high %v7612_v42, %v7622_v52  ;;  %v561_v42 = vld [vmem:[%s7507_s18 + $0x248] sm:$0xff] }
 0x199   : > { %1400 = vmatprep.subr.mxu0 %v529_v7  ;;  %v964_v7 = vcombine.low %v909_v62, %v913_v63  ;;  %v7810_v62 = vld [vmem:[%s7507_s18 + $0x370] sm:$0xff] }
 0x19a   : > { %1328 = vmatpush1.xpose.msra.mxu1 %v520_v10  ;;  %v626_v10 = vld [vmem:[%s7529_s2 + $0x50] sm:$0x77] }
 0x19b   : > { %1467 = vmatprep.subr.mxu1 %v543_v13  ;;  %v965_v13 = vcombine.low %v917_v2, %v921_v3  ;;  %v7713_v52 = vmul.f32 %v964_v7, %v626_v10  ;;  %v7819_v2 = vld [vmem:[%s7507_s18 + $0x320] sm:$0xff]  ;;  %v7823_v3 = vld [vmem:[%s7507_s18 + $0x318] sm:$0xff] }
 0x19c   : > { %1401 = vmatpush1.xpose.msra.mxu0 %v528_v16  ;;  %v791_v16 = vrot.slane %v777_v5, %v7565_v39  ;;  %v7833_v7 = vld [vmem:[%s7507_s18 + $0x358] sm:$0xff] }
 0x19d   : > { %1362 = vmatmul.mubr.f32.vlgmr.msra.gmra.mxu1 %v7609_v40  ;;  %1540 = vmatprep.subr.mxu0 %v551_v17  ;;  %v963_v40 = vcombine.low %v901_v31, %v905_v32  ;;  %v552_v17 = vld [vmem:[%s7507_s18 + $0x200] sm:$0xff]  ;;  %v7717_v19 = vmul.f32 %v965_v13, %v627_v15  ;;  %v7745_v32 = vld [vmem:[%s7507_s18 + $0x298] sm:$0xff]  ;;  %v7843_v13 = vld [vmem:[%s7507_s18 + $0x308] sm:$0xff] }
 0x19e   : > { %1468 = vmatpush1.xpose.msra.mxu1 %v542_v20  ;;  %1507 = vmatprep.mubr.f32.mxu1 %v1441_v21  ;;  %v560_v20 = vld [vmem:[%s7507_s18 + $0x240] sm:$0xff]  ;;  %v793_v21 = vcombine.high %v791_v16, %v791_v16  ;;  %v7847_v15 = vld [vmem:[%s7507_s18 + $0x350] sm:$0xff] }
 0x19f   : > { %1435 = vmatmul.mubr.f32.vlgmr.msra.gmra.mxu0 %v7615_v46  ;;  %1469 = vmatprep.subr.mxu1 %v541_v22  ;;  %v545_v46 = vld [vmem:[%s7507_s18 + $0x1c8] sm:$0xff]  ;;  %v7682_v50 = vmul.f32 %v963_v40, %v625_v45  ;;  %v1733_v22 = vcombine.high %v7713_v52, %v7713_v52  ;;  %v7741_v31 = vld [vmem:[%s7507_s18 + $0x2a0] sm:$0xff]  ;;  %v7761_v40 = vld [vmem:[%s7507_s18 + $0x290] sm:$0xff] }
 0x1a0   : > { %1541 = vmatpush1.xpose.msra.mxu0 %v550_v24  ;;  %1580 = vmatprep.mubr.f32.mxu0 %v1514_v25  ;;  %v574_v24 = vld [vmem:[%s7507_s18 + $0x2b0] sm:$0xff]  ;;  %v807_v25 = vrot.slane %v791_v16, %v7565_v39 }
 0x1a1   : > { %1542 = vmatprep.subr.mxu0 %v549_v26  ;;  %v1660_v58 = vcombine.high %v7682_v50, %v7682_v50  ;;  %v1806_v26 = vcombine.high %v7717_v19, %v7717_v19  ;;  %v7850_v16 = vld [vmem:[%s7529_s2 + $0x70] sm:$0x77] }
 0x1a2   : > { %1470 = vmatpush1.xpose.msra.mxu1 %v540_v29  ;;  %v821_v29 = vrot.slane %v793_v21, %v7565_v39  ;;  %v823_v59 = vcombine.high %v807_v25, %v807_v25  ;;  %v7870_v21 = vld [vmem:[%s7507_s18 + $0x340] sm:$0xff] }
 0x1a3   : > { %1471 = vmatprep.subr.mxu1 %v539_v30  ;;  %v7736_v30 = vld [vmem:[%s7507_s18 + $0x2e8] sm:$0xff]  ;;  %9100 = vst [vmem:[#allocation30_spill] sm:$0xff] %v7870_v21 }
 0x1a4   : > { %1543 = vmatpush1.xpose.msra.mxu0 %v548_v33  ;;  %v925_v33 = vrot.slane %v807_v25, %v7568_v43  ;;  %v933_v37 = vrot.slane %v821_v29, %v7568_v43  ;;  %v945_v5 = vrot.slane %v823_v59, %v7570_v44 }
 0x1a5   : > { %1544 = vmatprep.subr.mxu0 %v547_v34  ;;  %v929_v34 = vrot.slane %v807_v25, %v7570_v44 }
 0x1a6   : > { %1472 = vmatpush1.xpose.msra.mxu1 %v538_v36  ;;  %v7755_v36 = vld [vmem:[%s7507_s18 + $0x2d8] sm:$0xff] }
 0x1a7   : > { %1473 = vmatprep.subr.mxu1 %v537_v38  ;;  %v937_v38 = vrot.slane %v821_v29, %v7570_v44  ;;  %v966_v45 = vcombine.low %v925_v33, %v929_v34  ;;  %v7891_v34 = vld [vmem:[%s7507_s18 + $0x3e8] sm:$0xff] }
 0x1a8   : > { %1545 = vmatpush1.xpose.msra.mxu0 %v546_v41  ;;  %v7765_v41 = vld [vmem:[%s7507_s18 + $0x288] sm:$0xff]  ;;  %9105 = vst [vmem:[#allocation35_spill] sm:$0xff] %v7891_v34 }
 0x1a9   : > { %1546 = vmatprep.subr.mxu0 %v545_v46  ;;  %v7769_v46 = vld [vmem:[%s7507_s18 + $0x2d0] sm:$0xff] }
 0x1aa   : > { %1474 = vmatpush1.xpose.msra.mxu1 %v536_v48  ;;  %v7776_v48 = vld [vmem:[%s7507_s18 + $0x2c8] sm:$0xff] }
 0x1ab   : > { %1613 = vmatprep.subr.mxu1 %v559_v49  ;;  %v967_v49 = vcombine.low %v933_v37, %v937_v38  ;;  %v7895_v37 = vld [vmem:[%s7507_s18 + $0x3a0] sm:$0xff]  ;;  %v7899_v38 = vld [vmem:[%s7507_s18 + $0x398] sm:$0xff] }
 0x1ac   : > { %1547 = vmatpush1.xpose.msra.mxu0 %v544_v51  ;;  %v7783_v51 = vld [vmem:[%s7529_s2 + $0x68] sm:$0x77]  ;;  %9106 = vst [vmem:[#allocation36_spill] sm:$0xff] %v7895_v37  ;;  %9107 = vst [vmem:[#allocation37_spill] sm:$0xff] %v7899_v38 }
 0x1ad   : > { %1508 = vmatmul.mubr.f32.vlgmr.msra.gmra.mxu1 %v7646_v14  ;;  %1686 = vmatprep.subr.mxu0 %v567_v54  ;;  %v562_v14 = vld [vmem:[%s7507_s18 + $0x250] sm:$0xff] }
 0x1ae   : > { %1614 = vmatpush1.xpose.msra.mxu1 %v558_v56  ;;  %1653 = vmatprep.mubr.f32.mxu1 %v1587_v55  ;;  %v7792_v55 = vld [vmem:[%s7507_s18 + $0x2c0] sm:$0xff]  ;;  %v7796_v56 = vld [vmem:[%s7507_s18 + $0x378] sm:$0xff] }
 0x1af   : > { %1581 = vmatmul.mubr.f32.vlgmr.msra.gmra.mxu0 %v7650_v18  ;;  %1615 = vmatprep.subr.mxu1 %v557_v57  ;;  %v575_v18 = vld [vmem:[%s7507_s18 + $0x2b8] sm:$0xff]  ;;  %v999_v57 = vmul.f32 %v967_v49, %v7783_v51 }
 0x1b0   : > { %1687 = vmatpush1.xpose.msra.mxu0 %v566_v60  ;;  %1726 = vmatprep.mubr.f32.mxu0 %v1660_v58  ;;  %v7801_v58 = vld [vmem:[%s7507_s18 + $0x330] sm:$0xff]  ;;  %v7907_v49 = vld [vmem:[%s7507_s18 + $0x3d8] sm:$0xff] }
 0x1b1   : > { %1688 = vmatprep.subr.mxu0 %v565_v61  ;;  %v7805_v61 = vld [vmem:[%s7507_s18 + $0x328] sm:$0xff]  ;;  %v1952_v63 = vcombine.high %v999_v57, %v999_v57  ;;  %9109 = vst [vmem:[#allocation39_spill] sm:$0xff] %v7907_v49 }
 0x1b2   : > { %1616 = vmatpush1.xpose.msra.mxu1 %v556_v0  ;;  %v7814_v0 = vld [vmem:[%s7507_s18 + $0x368] sm:$0xff] }
 0x1b3   : > { %1617 = vmatprep.subr.mxu1 %v555_v1  ;;  %v825_v1 = vcombine.high %v821_v29, %v821_v29  ;;  %v7887_v29 = vld [vmem:[%s7507_s18 + $0x3f0] sm:$0xff] }
 0x1b4   : > { %1689 = vmatpush1.xpose.msra.mxu0 %v564_v4  ;;  %v941_v4 = vrot.slane %v823_v59, %v7568_v43  ;;  %9104 = vst [vmem:[#allocation34_spill] sm:$0xff] %v7887_v29  ;;  %v7919_v59 = vld [vmem:[%s7507_s18 + $0x3d0] sm:$0xff] }
 0x1b5   : > { %1690 = vmatprep.subr.mxu0 %v563_v6  ;;  %v7829_v6 = vld [vmem:[%s7507_s18 + $0x360] sm:$0xff]  ;;  %v953_v10 = vrot.slane %v825_v1, %v7570_v44  ;;  %9112 = vst [vmem:[#allocation42_spill] sm:$0xff] %v7919_v59 }
 0x1b6   : > { %1618 = vmatpush1.xpose.msra.mxu1 %v554_v9  ;;  %v949_v9 = vrot.slane %v825_v1, %v7568_v43  ;;  %v7932_v1 = vld [vmem:[%s7507_s18 + $0x3c0] sm:$0xff] }
 0x1b7   : > { %1619 = vmatprep.subr.mxu1 %v553_v11  ;;  %v7839_v11 = vld [vmem:[%s7507_s18 + $0x310] sm:$0xff]  ;;  %9115 = vst [vmem:[#allocation45_spill] sm:$0xff] %v7932_v1 }
 0x1b8   : > { %1691 = vmatpush1.xpose.msra.mxu0 %v562_v14  ;;  %v968_v14 = vcombine.low %v941_v4, %v945_v5  ;;  %v2178_v4 = vld [vmem:[#allocation9 + $0x78] sm:$0xff] }
 0x1b9   : > { %1692 = vmatprep.subr.mxu0 %v561_v42  ;;  %v7854_v42 = vld [vmem:[%s7507_s18 + $0x348] sm:$0xff]  ;;  %v2173_v5 = vld [vmem:[#allocation9 + $0x18] sm:$0xff] }
 0x1ba   : > { %1620 = vmatpush1.xpose.msra.mxu1 %v552_v17  ;;  %v7858_v17 = vld [vmem:[%s7507_s18 + $0x300] sm:$0xff] }
 0x1bb   : > { %1759 = vmatprep.subr.mxu1 %v575_v18  ;;  %v7861_v18 = vld [vmem:[%s7529_s2 + $0x78] sm:$0x77] }
 0x1bc   : > { %1693 = vmatpush1.xpose.msra.mxu0 %v560_v20  ;;  %v1000_v20 = vmul.f32 %v968_v14, %v7850_v16  ;;  %v2176_v14 = vld [vmem:[#allocation9 + $0x68] sm:$0xff] }
 0x1bd   : > { %1654 = vmatmul.mubr.f32.vlgmr.msra.gmra.mxu1 %v7678_v47  ;;  %1832 = vmatprep.subr.mxu0 %v583_v23  ;;  %v7772_v47 = vld [vmem:[%s7529_s2 + $0x60] sm:$0x77] }
 0x1be   : > { %1760 = vmatpush1.xpose.msra.mxu1 %v574_v24  ;;  %1799 = vmatprep.mubr.f32.mxu1 %v1733_v22  ;;  %v998_v54 = vmul.f32 %v966_v45, %v7772_v47  ;;  %v7874_v22 = vld [vmem:[%s7507_s18 + $0x3f8] sm:$0xff]  ;;  %v7879_v24 = vld [vmem:[%s7507_s18 + $0x3b0] sm:$0xff]  ;;  %v2025_v25 = vcombine.high %v1000_v20, %v1000_v20  ;;  %v7903_v45 = vld [vmem:[%s7507_s18 + $0x3e0] sm:$0xff] }
 0x1bf   : > { %1727 = vmatmul.mubr.f32.vlgmr.msra.gmra.mxu0 %v7682_v50  ;;  %1761 = vmatprep.subr.mxu1 %v7728_v27  ;;  %v7780_v50 = vld [vmem:[%s7507_s18 + $0x280] sm:$0xff]  ;;  %9101 = vst [vmem:[#allocation31_spill] sm:$0xff] %v7874_v22  ;;  %9102 = vst [vmem:[#allocation32_spill] sm:$0xff] %v7879_v24 }
 0x1c0   : > { %1833 = vmatpush1.xpose.msra.mxu0 %v7732_v28  ;;  %1872 = vmatprep.mubr.f32.mxu0 %v1806_v26  ;;  %v1879_v60 = vcombine.high %v998_v54, %v998_v54  ;;  %v7883_v26 = vld [vmem:[%s7507_s18 + $0x3a8] sm:$0xff]  ;;  %9108 = vst [vmem:[#allocation38_spill] sm:$0xff] %v7903_v45 }
 0x1c1   : > { %1834 = vmatprep.subr.mxu0 %v7736_v30  ;;  %9103 = vst [vmem:[#allocation33_spill] sm:$0xff] %v7883_v26 }
 0x1c2   : > { %1762 = vmatpush1.xpose.msra.mxu1 %v7741_v31 }
 0x1c3   : > { %1763 = vmatprep.subr.mxu1 %v7745_v32 }
 0x1c4   : > { %1835 = vmatpush1.xpose.msra.mxu0 %v7751_v35 }
 0x1c5   : > { %1836 = vmatprep.subr.mxu0 %v7755_v36 }
 0x1c6   : > { %1764 = vmatpush1.xpose.msra.mxu1 %v7761_v40 }
 0x1c7   : > { %1765 = vmatprep.subr.mxu1 %v7765_v41 }
 0x1c8   : > { %1837 = vmatpush1.xpose.msra.mxu0 %v7769_v46 }
 0x1c9   : > { %1838 = vmatprep.subr.mxu0 %v7776_v48 }
 0x1ca   : > { %1766 = vmatpush1.xpose.msra.mxu1 %v7780_v50 }
 0x1cb   : > { %1905 = vmatprep.subr.mxu1 %v7787_v53 }
 0x1cc   : > { %1839 = vmatpush1.xpose.msra.mxu0 %v7792_v55 }
 0x1cd   : > { %1800 = vmatmul.mubr.f32.vlgmr.msra.gmra.mxu1 %v7713_v52  ;;  %1978 = vmatprep.subr.mxu0 %v7796_v56  ;;  %v969_v52 = vcombine.low %v949_v9, %v953_v10  ;;  %v2177_v9 = vld [vmem:[#allocation9 + $0x70] sm:$0xff] }
 0x1ce   : > { %1906 = vmatpush1.xpose.msra.mxu1 %v7801_v58  ;;  %1945 = vmatprep.mubr.f32.mxu1 %v1879_v60  ;;  %v7923_v60 = vld [vmem:[%s7507_s18 + $0x3c8] sm:$0xff]  ;;  %v2172_v10 = vld [vmem:[#allocation9 + $0x10] sm:$0xff] }
 0x1cf   : > { %1873 = vmatmul.mubr.f32.vlgmr.msra.gmra.mxu0 %v7717_v19  ;;  %1907 = vmatprep.subr.mxu1 %v7805_v61  ;;  %v7865_v19 = vld [vmem:[%s7507_s18 + $0x3b8] sm:$0xff]  ;;  %v1001_v23 = vmul.f32 %v969_v52, %v7861_v18  ;;  %9113 = vst [vmem:[#allocation43_spill] sm:$0xff] %v7923_v60  ;;  %v2171_v52 = vld [vmem:[#allocation9 + $0x8] sm:$0xff] }
 0x1d0   : > { %1979 = vmatpush1.xpose.msra.mxu0 %v7810_v62  ;;  %2018 = vmatprep.mubr.f32.mxu0 %v1952_v63  ;;  %9099 = vst [vmem:[#allocation29_spill] sm:$0xff] %v7865_v19  ;;  %v7927_v63 = vld [vmem:[%s7507_s18 + $0x380] sm:$0xff] }
 0x1d1   : > { %1980 = vmatprep.subr.mxu0 %v7814_v0  ;;  %v2098_v33 = vcombine.high %v1001_v23, %v1001_v23  ;;  %9114 = vst [vmem:[#allocation44_spill] sm:$0xff] %v7927_v63 }
 0x1d2   : > { %1908 = vmatpush1.xpose.msra.mxu1 %v7819_v2 }
 0x1d3   : > { %1909 = vmatprep.subr.mxu1 %v7823_v3 }
 0x1d4   : > { %1981 = vmatpush1.xpose.msra.mxu0 %v7829_v6 }
 0x1d5   : > { %1982 = vmatprep.subr.mxu0 %v7833_v7 }
 0x1d6   : > { %1910 = vmatpush1.xpose.msra.mxu1 %v7839_v11 }
 0x1d7   : > { %1911 = vmatprep.subr.mxu1 %v7843_v13 }
 0x1d8   : > { %1983 = vmatpush1.xpose.msra.mxu0 %v7847_v15 }
 0x1d9   : > { %1984 = vmatprep.subr.mxu0 %v7854_v42 }
 0x1da   : > { %1912 = vmatpush1.xpose.msra.mxu1 %v7858_v17 }
 0x1db   : > { %2051 = vmatprep.subr.mxu1 %v7865_v19 }
 0x1dc   : > { %1985 = vmatpush1.xpose.msra.mxu0 %v7870_v21 }
 0x1dd   : > { %1946 = vmatmul.mubr.f32.vlgmr.msra.gmra.mxu1 %v998_v54  ;;  %2124 = vmatprep.subr.mxu0 %v7874_v22  ;;  %v7911_v54 = vld [vmem:[%s7507_s18 + $0x390] sm:$0xff] }
 0x1de   : > { %2052 = vmatpush1.xpose.msra.mxu1 %v7879_v24  ;;  %2091 = vmatprep.mubr.f32.mxu1 %v2025_v25  ;;  %9110 = vst [vmem:[#allocation40_spill] sm:$0xff] %v7911_v54  ;;  %v7936_v25 = vld [vmem:[#allocation9 + $0xd8] sm:$0xff] }
 0x1df   : > { %2019 = vmatmul.mubr.f32.vlgmr.msra.gmra.mxu0 %v999_v57  ;;  %2053 = vmatprep.subr.mxu1 %v7883_v26  ;;  %v7915_v57 = vld [vmem:[%s7507_s18 + $0x388] sm:$0xff] }
 0x1e0   : > { %2125 = vmatpush1.xpose.msra.mxu0 %v7887_v29  ;;  %2164 = vmatprep.mubr.f32.mxu0 %v2098_v33  ;;  %9111 = vst [vmem:[#allocation41_spill] sm:$0xff] %v7915_v57 }
 0x1e1   : > { %2126 = vmatprep.subr.mxu0 %v7891_v34 }
 0x1e2   : > { %2054 = vmatpush1.xpose.msra.mxu1 %v7895_v37 }
 0x1e3   : > { %2055 = vmatprep.subr.mxu1 %v7899_v38 }
 0x1e4   : > { %2127 = vmatpush1.xpose.msra.mxu0 %v7903_v45 }
 0x1e5   : > { %2128 = vmatprep.subr.mxu0 %v7907_v49 }
 0x1e6   : > { %2056 = vmatpush1.xpose.msra.mxu1 %v7911_v54 }
 0x1e7   : > { %2057 = vmatprep.subr.mxu1 %v7915_v57 }
 0x1e8   : > { %2129 = vmatpush1.xpose.msra.mxu0 %v7919_v59 }
 0x1e9   : > { %2130 = vmatprep.subr.mxu0 %v7923_v60 }
 0x1ea   : > { %2058 = vmatpush1.xpose.msra.mxu1 %v7927_v63 }
 0x1eb   : > { %6623 = vmatprep.subr.mxu1 %v2178_v4 }
 0x1ec   : > { %2131 = vmatpush1.xpose.msra.mxu0 %v7932_v1 }
 0x1ed   : > { %2092 = vmatmul.mubr.f32.vlgmr.msra.gmra.mxu1 %v1000_v20  ;;  %6634 = vmatprep.subr.mxu0 %v2173_v5  ;;  %v2175_v20 = vld [vmem:[#allocation9 + $0x60] sm:$0xff] }
 0x1ee   : > { %6624 = vmatpush3.msra.mxu1 %v2178_v4 }
 0x1ef   : > { %2165 = vmatmul.mubr.f32.vlgmr.msra.gmra.mxu0 %v1001_v23  ;;  %6625 = vmatprep.subr.mxu1 %v2177_v9  ;;  %v2170_v23 = vld [vmem:[#allocation9] sm:$0xff] }
 0x1f0   : > { %6635 = vmatpush3.msra.mxu0 %v2173_v5  ;;  %6626 = vmatpush3.msra.mxu1 %v2177_v9 }
 0x1f1   : > { %6636 = vmatprep.subr.mxu0 %v2172_v10  ;;  %6627 = vmatprep.subr.mxu1 %v2176_v14 }
 0x1f2   : > { %6637 = vmatpush3.msra.mxu0 %v2172_v10  ;;  %6628 = vmatpush3.msra.mxu1 %v2176_v14 }
 0x1f3   : > { %6638 = vmatprep.subr.mxu0 %v2171_v52  ;;  %6629 = vmatprep.subr.mxu1 %v2175_v20 }
 0x1f4   : > { %6639 = vmatpush3.msra.mxu0 %v2171_v52  ;;  %6630 = vmatpush3.msra.mxu1 %v2175_v20 }
 0x1f5   : > { %6640 = vmatprep.subr.mxu0 %v2170_v23  ;;  %6645 = vmatprep.subr.mxu1 %v7936_v25 }
 0x1f6   : > { %6641 = vmatpush3.msra.mxu0 %v2170_v23 }
 0x1f7   : > { %2568 = vmatprep.subr.mxu0 %v7538_v8 }
 0x23d   : > { %v1071_v33 = vpop.f32.mrf.mxu1 }
 0x23e   : > { %v2422_v9 = vrot.slane %v1071_v33, 2  ;;  %v2195_v49 = vrot.slane %v1071_v33, 1 }
 0x23f   : > { %v1073_v4 = vpop.f32.mrf.mxu1  ;;  %v1144_v5 = vpop.f32.mrf.mxu0 }
 0x240   : > { %v2423_v10 = vrot.slane %v1144_v5, 1  ;;  %v2310_v45 = vrot.slane %v1144_v5, 7 }
 0x241   : > { %v1146_v14 = vpop.f32.mrf.mxu0 }
 0x242   : > { %v2424_v52 = vsel %vm2196_vm2, %v2423_v10, %v2422_v9 }
 0x24d   : > { %v1217_v12 = vpop.f32.mrf.mxu1 }
 0x24e   : > { %v2425_v1 = vsel %vm2199_vm3, %v1217_v12, %v2424_v52  ;;  %v2198_v52 = vrot.slane %v1217_v12, 7  ;;  %v2312_v38 = vrot.slane %v1217_v12, 6 }
 0x24f   : > { %v1219_v63 = vpop.f32.mrf.mxu1  ;;  %v1290_v20 = vpop.f32.mrf.mxu0 }
 0x250   : > { %v2426_v23 = vrot.slane %v1290_v20, 7  ;;  %v2314_v37 = vrot.slane %v1290_v20, 5 }
 0x251   : > { %v1292_v60 = vpop.f32.mrf.mxu0 }
 0x252   : > { %v2427_v8 = vsel %vm2202_vm4, %v2426_v23, %v2425_v1  ;;  %v2197_v60 = vsel %vm2196_vm2, %v1144_v5, %v2195_v49  ;;  %v2311_v1 = vsel %vm2196_vm2, %v2310_v45, %v1071_v33  ;;  %v2201_v23 = vrot.slane %v1290_v20, 6 }
 0x253   : > { %v2313_v34 = vsel %vm2199_vm3, %v2312_v38, %v2311_v1 }
 0x254   : > { %v2315_v29 = vsel %vm2202_vm4, %v2314_v37, %v2313_v34 }
 0x25d   : > { %v1363_v59 = vpop.f32.mrf.mxu1 }
 0x25e   : > { %v2428_v4 = vrot.slane %v1363_v59, 6 }
 0x25f   : > { %v1365_v57 = vpop.f32.mrf.mxu1  ;;  %v1436_v54 = vpop.f32.mrf.mxu0 }
 0x260   : > { %v2429_v14 = vsel %vm2205_vm5, %v2428_v4, %v2427_v8  ;;  %v2430_v9 = vrot.slane %v1436_v54, 5  ;;  %v2200_v57 = vsel %vm2199_vm3, %v2198_v52, %v2197_v60  ;;  %v2204_v8 = vrot.slane %v1363_v59, 5 }
 0x261   : > { %v1438_v10 = vpop.f32.mrf.mxu0  ;;  %v2316_v4 = vrot.slane %v1363_v59, 4  ;;  %v2207_v26 = vrot.slane %v1436_v54, 4 }
 0x262   : > { %v2431_v63 = vsel %vm2208_vm6, %v2430_v9, %v2429_v14  ;;  %v2203_v10 = vsel %vm2202_vm4, %v2201_v23, %v2200_v57  ;;  %v2318_v14 = vrot.slane %v1436_v54, 3 }
 0x263   : > { %v2206_v12 = vsel %vm2205_vm5, %v2204_v8, %v2203_v10  ;;  %v2317_v49 = vsel %vm2205_vm5, %v2316_v4, %v2315_v29 }
 0x264   : > { %v2209_v38 = vsel %vm2208_vm6, %v2207_v26, %v2206_v12  ;;  %v2319_v59 = vsel %vm2208_vm6, %v2318_v14, %v2317_v49 }
 0x26d   : > { %v1509_v5 = vpop.f32.mrf.mxu1 }
 0x26e   : > { %v2210_v45 = vrot.slane %v1509_v5, 3  ;;  %v2320_v33 = vrot.slane %v1509_v5, 2  ;;  %v2432_v20 = vrot.slane %v1509_v5, 4 }
 0x26f   : > { %v1511_v9 = vpop.f32.mrf.mxu1  ;;  %v1582_v52 = vpop.f32.mrf.mxu0 }
 0x270   : > { %v2213_v34 = vrot.slane %v1582_v52, 2  ;;  %v2322_v37 = vrot.slane %v1582_v52, 1  ;;  %v2434_v54 = vrot.slane %v1582_v52, 3  ;;  %v2212_v60 = vsel %vm2211_vm7, %v2210_v45, %v2209_v38 }
 0x271   : > { %v1584_v1 = vpop.f32.mrf.mxu0  ;;  %v2321_v29 = vsel %vm2211_vm7, %v2320_v33, %v2319_v59  ;;  %v2433_v23 = vsel %vm2211_vm7, %v2432_v20, %v2431_v63 }
 0x272   : > { %v2215_v57 = vsel %vm2214_vm8, %v2213_v34, %v2212_v60  ;;  %v2323_v8 = vsel %vm2214_vm8, %v2322_v37, %v2321_v29  ;;  %v7961_v26 = vsel %vm2214_vm8, %v2434_v54, %v2433_v23 }
 0x273   : > { %6631 = vmatprep.mubr.msk.f32.mxu1 %vm2230_vm9, %v2215_v57  ;;  %6642 = vmatprep.mubr.msk.f32.mxu0 %vm2230_vm9, %v2323_v8 }
 0x27d   : > { %v1655_v4 = vpop.f32.mrf.mxu1 }
 0x27e   : > { %v2216_v38 = vrot.slane %v1655_v4, 1 }
 0x27f   : > { %v1657_v10 = vpop.f32.mrf.mxu1  ;;  %v1728_v14 = vpop.f32.mrf.mxu0 }
 0x280   : > { %v2324_v59 = vrot.slane %v1728_v14, 7  ;;  %v2217_v54 = vsel %vm2196_vm2, %v1728_v14, %v2216_v38  ;;  %v2436_v38 = vrot.slane %v1655_v4, 2 }
 0x281   : > { %v1730_v12 = vpop.f32.mrf.mxu0 }
 0x282   : > { %v2325_v1 = vsel %vm2196_vm2, %v2324_v59, %v1655_v4  ;;  %v2437_v12 = vrot.slane %v1728_v14, 1 }
 0x284   : > { %v2438_v19 = vsel %vm2196_vm2, %v2437_v12, %v2436_v38  ;;  %v2418_v38 = vld [vmem:[#allocation9 + $0xc0] sm:$0xff] }
 0x28d   : > { %v1801_v49 = vpop.f32.mrf.mxu1 }
 0x28e   : > { %v2218_v34 = vrot.slane %v1801_v49, 7  ;;  %v2326_v37 = vrot.slane %v1801_v49, 6  ;;  %v2439_v4 = vsel %vm2199_vm3, %v1801_v49, %v2438_v19  ;;  %v7986_v19 = vld [vmem:[#allocation8 + $0x10] sm:$0xff] }
 0x28f   : > { %v1803_v5 = vpop.f32.mrf.mxu1  ;;  %v1874_v45 = vpop.f32.mrf.mxu0 }
 0x290   : > { %v2220_v60 = vrot.slane %v1874_v45, 6  ;;  %v2219_v29 = vsel %vm2199_vm3, %v2218_v34, %v2217_v54  ;;  %v2328_v23 = vrot.slane %v1874_v45, 5  ;;  %v2327_v8 = vsel %vm2199_vm3, %v2326_v37, %v2325_v1 }
 0x291   : > { %v1876_v33 = vpop.f32.mrf.mxu0  ;;  %v2440_v21 = vrot.slane %v1874_v45, 7 }
 0x292   : > { %v2221_v5 = vsel %vm2202_vm4, %v2220_v60, %v2219_v29 }
 0x29d   : > { %v1947_v63 = vpop.f32.mrf.mxu1 }
 0x29e   : > { %v2222_v57 = vrot.slane %v1947_v63, 5  ;;  %v2330_v10 = vrot.slane %v1947_v63, 4  ;;  %v2442_v37 = vrot.slane %v1947_v63, 6 }
 0x29f   : > { %v1949_v20 = vpop.f32.mrf.mxu1  ;;  %v2020_v9 = vpop.f32.mrf.mxu0 }
 0x2a0   : > { %v2224_v33 = vrot.slane %v2020_v9, 4  ;;  %v2329_v20 = vsel %vm2202_vm4, %v2328_v23, %v2327_v8  ;;  %v2332_v24 = vrot.slane %v2020_v9, 3 }
 0x2a1   : > { %v2022_v52 = vpop.f32.mrf.mxu0  ;;  %v2331_v22 = vsel %vm2205_vm5, %v2330_v10, %v2329_v20  ;;  %v2444_v20 = vrot.slane %v2020_v9, 5 }
 0x2a2   : > { %v2223_v52 = vsel %vm2205_vm5, %v2222_v57, %v2221_v5  ;;  %v2333_v29 = vsel %vm2208_vm6, %v2332_v24, %v2331_v22  ;;  %v2441_v5 = vsel %vm2202_vm4, %v2440_v21, %v2439_v4  ;;  %v2419_v21 = vld [vmem:[#allocation9 + $0xc8] sm:$0xff]  ;;  %v8036_v4 = vld [vmem:[%s7507_s18 + $0x60] sm:$0xff] }
 0x2a3   : > { %v2225_v14 = vsel %vm2208_vm6, %v2224_v33, %v2223_v52  ;;  %v2420_v33 = vld [vmem:[#allocation9 + $0xd0] sm:$0xff]  ;;  %v2443_v22 = vsel %vm2205_vm5, %v2442_v37, %v2441_v5  ;;  %v7992_v52 = vld [vmem:[#allocation8 + $0x8] sm:$0xff]  ;;  %9119 = vst [vmem:[#allocation48_spill] sm:$0xff] %v8036_v4 }
 0x2a4   : > { %v2445_v49 = vsel %vm2208_vm6, %v2444_v20, %v2443_v22  ;;  %v6542_v37 = vld [vmem:[%s7513_s21 + $0x18] sm:$0xff]  ;;  %v8048_v5 = vld [vmem:[%s7507_s18 + $0x10] sm:$0xff]  ;;  %v8068_v22 = vld [vmem:[%s7507_s18 + $0x40] sm:$0xff] }
 0x2a5   : > { %9122 = vst [vmem:[#allocation51_spill] sm:$0xff] %v8048_v5  ;;  %v8052_v20 = vld [vmem:[%s7507_s18 + $0x50] sm:$0xff]  ;;  %9127 = vst [vmem:[#allocation56_spill] sm:$0xff] %v8068_v22 }
 0x2a6   : > { %9123 = vst [vmem:[#allocation52_spill] sm:$0xff] %v8052_v20 }
 0x2ad   : > { %v2093_v59 = vpop.f32.mrf.mxu1 }
 0x2ae   : > { %v2226_v34 = vrot.slane %v2093_v59, 3  ;;  %v2334_v54 = vrot.slane %v2093_v59, 2  ;;  %v2446_v24 = vrot.slane %v2093_v59, 4  ;;  %v7996_v59 = vld [vmem:[#allocation8] sm:$0xff] }
 0x2af   : > { %v2095_v1 = vpop.f32.mrf.mxu1  ;;  %v2166_v60 = vpop.f32.mrf.mxu0 }
 0x2b0   : > { %v2228_v23 = vrot.slane %v2166_v60, 2  ;;  %v2336_v8 = vrot.slane %v2166_v60, 1  ;;  %v2227_v57 = vsel %vm2211_vm7, %v2226_v34, %v2225_v14  ;;  %v2335_v45 = vsel %vm2211_vm7, %v2334_v54, %v2333_v29  ;;  %v8007_v14 = vld [vmem:[%s7507_s18 + $0x38] sm:$0xff]  ;;  %v8011_v1 = vld [vmem:[%s7507_s18 + $0x30] sm:$0xff] }
 0x2b1   : > { %v2168_v10 = vpop.f32.mrf.mxu0  ;;  %v2448_v9 = vrot.slane %v2166_v60, 3  ;;  %v9116_v34 = vmov 0.0   ;;  %v8015_v60 = vld [vmem:[%s7507_s18 + $0x78] sm:$0xff]  ;;  %v8020_v29 = vld [vmem:[%s7507_s18 + $0x70] sm:$0xff] }
 0x2b2   : > { %v2229_v63 = vsel %vm2214_vm8, %v2228_v23, %v2227_v57  ;;  %v2337_v12 = vsel %vm2214_vm8, %v2336_v8, %v2335_v45  ;;  %v8024_v23 = vld [vmem:[%s7507_s18 + $0x28] sm:$0xff]  ;;  %v8032_v57 = vld [vmem:[%s7507_s18 + $0x20] sm:$0xff]  ;;  %v8040_v10 = vld [vmem:[%s7507_s18 + $0x18] sm:$0xff] }
 0x2b3   : > { %6632 = vmatmul.mubr.msk.f32.vlgmr.msra.gmra.mxu1 %vm2230_vm9, %v2229_v63  ;;  %6643 = vmatmul.mubr.msk.f32.vlgmr.msra.gmra.mxu0 %vm2230_vm9, %v2337_v12  ;;  %v8028_v8 = vld [vmem:[%s7507_s18 + $0x68] sm:$0xff]  ;;  %9118 = vst [vmem:[#allocation47_spill] sm:$0xff] %v8032_v57  ;;  %9120 = vst [vmem:[#allocation49_spill] sm:$0xff] %v8040_v10  ;;  %v8044_v45 = vld [vmem:[%s7507_s18 + $0x58] sm:$0xff] }
 0x2b4   : > { %6646 = vmatpush3.msra.mxu1 %v7936_v25  ;;  %2569 = vmatpush1.msra.mxu0 %v7986_v19  ;;  %v6541_v25 = vld [vmem:[%s7513_s21 + $0x10] sm:$0xff]  ;;  %9117 = vst [vmem:[#allocation46_spill] sm:$0xff] %v8028_v8  ;;  %9121 = vst [vmem:[#allocation50_spill] sm:$0xff] %v8044_v45  ;;  %v8056_v63 = vld [vmem:[%s7507_s18 + $0x8] sm:$0xff] }
 0x2b5   : > { %6647 = vmatprep.subr.mxu1 %v2420_v33  ;;  %6653 = vmatprep.mubr.msk.f32.mxu1 %vm2230_vm9, %v7961_v26  ;;  %v2447_v26 = vsel %vm2211_vm7, %v2446_v24, %v2445_v49  ;;  %9124 = vst [vmem:[#allocation53_spill] sm:$0xff] %v8056_v63  ;;  %v8060_v12 = vld [vmem:[%s7507_s18 + $0x48] sm:$0xff]  ;;  %v8072_v24 = vld [vmem:[%s7507_s18 + $0xb8] sm:$0xff] }
 0x2b6   : > { %2570 = vmatprep.subr.mxu0 %v7992_v52  ;;  %6648 = vmatpush3.msra.mxu1 %v2420_v33  ;;  %v2449_v54 = vsel %vm2214_vm8, %v2448_v9, %v2447_v26  ;;  %9125 = vst [vmem:[#allocation54_spill] sm:$0xff] %v8060_v12  ;;  %v8064_v33 = vld [vmem:[%s7507_s18] sm:$0xff]  ;;  %9128 = vst [vmem:[#allocation57_spill] sm:$0xff] %v8072_v24 }
 0x2b7   : > { %2571 = vmatpush1.msra.mxu0 %v7996_v59  ;;  %6649 = vmatprep.subr.mxu1 %v2419_v21  ;;  %9126 = vst [vmem:[#allocation55_spill] sm:$0xff] %v8064_v33 }
 0x2b8   : > { %2604 = vmatprep.mubr.f32.mxu0 %v9116_v34  ;;  %6650 = vmatpush3.msra.mxu1 %v2419_v21  ;;  %v8076_v21 = vld [vmem:[%s7507_s18 + $0xf8] sm:$0xff] }
 0x2b9   : > { %6543 = vmatmul.mubr.msk.f32.vlgmr.msra.gmra.mxu0 %vm638_vm1, %v6541_v25  ;;  %6651 = vmatprep.subr.mxu1 %v2418_v38  ;;  %9129 = vst [vmem:[#allocation58_spill] sm:$0xff] %v8076_v21 }
 0x2ba   : > { %6652 = vmatpush3.msra.mxu1 %v2418_v38  ;;  %2610 = vmatprep.mubr.f32.mxu0 %v9116_v34 }
 0x2bb   : > { %6654 = vmatmul.mubr.msk.f32.vlgmr.msra.gmra.mxu1 %vm2230_vm9, %v2449_v54  ;;  %2924 = vmatprep.subr.mxu0 %v8007_v14 }
 0x2bc   : > { %2925 = vmatpush1.xpose.msra.mxu0 %v8011_v1  ;;  %2997 = vmatprep.subr.mxu1 %v8015_v60 }
 0x2bd   : > { %6544 = vmatmul.mubr.msk.f32.gmra.mxu0 %vm638_vm1, %v6542_v37  ;;  %2998 = vmatpush1.xpose.msra.mxu1 %v8020_v29 }
 0x2be   : > { %2926 = vmatprep.subr.mxu0 %v8024_v23  ;;  %2999 = vmatprep.subr.mxu1 %v8028_v8  ;;  %v8104_v8 = vld [vmem:[%s7529_s2 + $0x10] sm:$0x77] }
 0x2c0   : > { %2927 = vmatpush1.xpose.msra.mxu0 %v8032_v57  ;;  %v8100_v57 = vld [vmem:[%s7529_s2 + $0x8] sm:$0x77] }
 0x2c1   : > { %3000 = vmatpush1.xpose.msra.mxu1 %v8036_v4  ;;  %2928 = vmatprep.subr.mxu0 %v8040_v10 }
 0x2c2   : > { %3001 = vmatprep.subr.mxu1 %v8044_v45 }
 0x2c4   : > { %2929 = vmatpush1.xpose.msra.mxu0 %v8048_v5 }
 0x2c5   : > { %3002 = vmatpush1.xpose.msra.mxu1 %v8052_v20  ;;  %2930 = vmatprep.subr.mxu0 %v8056_v63 }
 0x2c6   : > { %3003 = vmatprep.subr.mxu1 %v8060_v12 }
 0x2c8   : > { %2931 = vmatpush1.xpose.msra.mxu0 %v8064_v33 }
 0x2c9   : > { %3004 = vmatpush1.xpose.msra.mxu1 %v8068_v22  ;;  %3070 = vmatprep.subr.mxu0 %v8072_v24 }
 0x2ca   : > { %3143 = vmatprep.subr.mxu1 %v8076_v21 }
 0x373   : > { %v6633_v49 = vpop.f32.mrf.mxu1  ;;  %v6644_v9 = vpop.f32.mrf.mxu0 }
 0x374   : > { %v2414_v25 = vadd.f32 %v6644_v9, %v6633_v49 }
 0x375   : > { %v2301_v38 = vpop.f32.mrf.mxu1  ;;  %v2408_v26 = vpop.f32.mrf.mxu0 }
 0x376   : > { %v8079_v54 = vadd.f32 %v2408_v26, %v2301_v38 }
 0x378   : > { %9130 = vst [vmem:[#allocation59_spill] sm:$0xff] %v8079_v54  ;;  %v8094_v54 = vld [vmem:[%s7529_s2] sm:$0x77] }
 0x379   : > { %v2606_v37 = vpop.f32.mrf.mxu0 }
 0x37b   : > { %v2608_v33 = vpop.f32.mrf.mxu0  ;;  %v6655_v12 = vpop.f32.mrf.mxu1 }
 0x37c   : > { %v2621_v63 = vcombine.low %v2606_v37, %v2608_v33  ;;  %v8081_v22 = vadd.f32 %v6655_v12, %v2414_v25  ;;  %v2622_v21 = vcombine.high %v2606_v37, %v2608_v33 }
 0x37e   : > { %9131 = vst [vmem:[#allocation60_spill] sm:$0xff] %v8081_v22  ;;  %v2629_v20 = vrot.slane %v2621_v63, %v7565_v39 }
 0x380   : > { %v2637_v24 = vcombine.high %v2629_v20, %v2629_v20  ;;  %v2645_v5 = vrot.slane %v2629_v20, %v7565_v39  ;;  %v2636_v20 = vrot.slane %v2622_v21, %v7565_v39 }
 0x382   : > { %v2659_v45 = vrot.slane %v2637_v24, %v7565_v39  ;;  %v2667_v49 = vcombine.high %v2645_v5, %v2645_v5  ;;  %v2724_v9 = vrot.slane %v2645_v5, %v7568_v43  ;;  %v2728_v38 = vrot.slane %v2645_v5, %v7570_v44 }
 0x383   : > { %v2638_v21 = vcombine.high %v2636_v20, %v2636_v20 }
 0x384   : > { %v2732_v26 = vrot.slane %v2659_v45, %v7568_v43  ;;  %v2736_v12 = vrot.slane %v2659_v45, %v7570_v44  ;;  %v2740_v63 = vrot.slane %v2667_v49, %v7568_v43  ;;  %v2744_v25 = vrot.slane %v2667_v49, %v7570_v44 }
 0x385   : > { %v2849_v33 = vcombine.low %v2724_v9, %v2728_v38  ;;  %v2669_v37 = vcombine.high %v2659_v45, %v2659_v45 }
 0x386   : > { %v2850_v24 = vcombine.low %v2732_v26, %v2736_v12  ;;  %v2851_v22 = vcombine.low %v2740_v63, %v2744_v25  ;;  %v2652_v63 = vrot.slane %v2636_v20, %v7565_v39  ;;  %v8109_v25 = vld [vmem:[%s7529_s2 + $0x18] sm:$0x77]  ;;  %v8122_v20 = vld [vmem:[%s7507_s18 + $0xf0] sm:$0xff] }
 0x387   : > { %v2881_v5 = vmul.f32 %v8094_v54, %v2849_v33  ;;  %v2748_v10 = vrot.slane %v2669_v37, %v7568_v43  ;;  %v2752_v4 = vrot.slane %v2669_v37, %v7570_v44  ;;  %9132 = vst [vmem:[#allocation61_spill] sm:$0xff] %v8109_v25  ;;  %v8114_v37 = vld [vmem:[%s7507_s18 + $0xb0] sm:$0xff]  ;;  %9135 = vst [vmem:[#allocation64_spill] sm:$0xff] %v8122_v20 }
 0x388   : > { %v2882_v49 = vmul.f32 %v8100_v57, %v2850_v24  ;;  %v2883_v45 = vmul.f32 %v8104_v8, %v2851_v22  ;;  %v2666_v22 = vrot.slane %v2638_v21, %v7565_v39  ;;  %9133 = vst [vmem:[#allocation62_spill] sm:$0xff] %v8114_v37  ;;  %v2756_v24 = vrot.slane %v2652_v63, %v7568_v43  ;;  %v8128_v21 = vld [vmem:[%s7507_s18 + $0xe8] sm:$0xff] }
 0x389   : > { %v2898_v9 = vcombine.high %v2881_v5, %v2881_v5  ;;  %v2852_v38 = vcombine.low %v2748_v10, %v2752_v4  ;;  %v8118_v10 = vld [vmem:[%s7507_s18 + $0xa8] sm:$0xff]  ;;  %9136 = vst [vmem:[#allocation65_spill] sm:$0xff] %v8128_v21 }
 0x38a   : > { %v2971_v26 = vcombine.high %v2882_v49, %v2882_v49  ;;  %v3044_v12 = vcombine.high %v2883_v45, %v2883_v45  ;;  %9134 = vst [vmem:[#allocation63_spill] sm:$0xff] %v8118_v10 }
 0x38b   : > { %2964 = vmatprep.mubr.f32.mxu0 %v2898_v9  ;;  %v2884_v33 = vmul.f32 %v8109_v25, %v2852_v38  ;;  %v2764_v9 = vrot.slane %v2666_v22, %v7568_v43  ;;  %v2768_v38 = vrot.slane %v2666_v22, %v7570_v44  ;;  %v8325_v25 = vld [vmem:[%s7507_s18 + $0x1d8] sm:$0xff] }
 0x38c   : > { %2965 = vmatmul.mubr.f32.vlgmr.msra.gmra.mxu0 %v2881_v5  ;;  %3037 = vmatprep.mubr.f32.mxu1 %v2971_v26  ;;  %v2760_v5 = vrot.slane %v2652_v63, %v7570_v44  ;;  %v8138_v26 = vld [vmem:[%s7507_s18 + $0x98] sm:$0xff]  ;;  %9174 = vst [vmem:[#allocation103_spill] sm:$0xff] %v8325_v25 }
 0x38d   : > { %3071 = vmatpush1.xpose.msra.mxu0 %v8114_v37  ;;  %3110 = vmatprep.mubr.f32.mxu0 %v3044_v12  ;;  %v3117_v4 = vcombine.high %v2884_v33, %v2884_v33  ;;  %9138 = vst [vmem:[#allocation67_spill] sm:$0xff] %v8138_v26  ;;  %v8142_v12 = vld [vmem:[%s7507_s18 + $0xe0] sm:$0xff]  ;;  %v8245_v37 = vld [vmem:[%s7507_s18 + $0x108] sm:$0xff] }
 0x38e   : > { %3038 = vmatmul.mubr.f32.vlgmr.msra.gmra.mxu1 %v2882_v49  ;;  %3072 = vmatprep.subr.mxu0 %v8118_v10  ;;  %v8132_v49 = vld [vmem:[%s7507_s18 + $0xa0] sm:$0xff]  ;;  %9139 = vst [vmem:[#allocation68_spill] sm:$0xff] %v8142_v12  ;;  %v8154_v10 = vld [vmem:[%s7507_s18 + $0x88] sm:$0xff]  ;;  %9160 = vst [vmem:[#allocation89_spill] sm:$0xff] %v8245_v37 }
 0x38f   : > { %3144 = vmatpush1.xpose.msra.mxu1 %v8122_v20  ;;  %3183 = vmatprep.mubr.f32.mxu1 %v3117_v4  ;;  %9137 = vst [vmem:[#allocation66_spill] sm:$0xff] %v8132_v49  ;;  %v2853_v4 = vcombine.low %v2756_v24, %v2760_v5  ;;  %v2854_v20 = vcombine.low %v2764_v9, %v2768_v38  ;;  %9142 = vst [vmem:[#allocation71_spill] sm:$0xff] %v8154_v10  ;;  %v8162_v24 = vld [vmem:[%s7529_s2 + $0x20] sm:$0x77]  ;;  %v8171_v9 = vpop.f32.mrf.mxu0 }
 0x390   : > { %3145 = vmatprep.subr.mxu1 %v8128_v21  ;;  %v8146_v21 = vld [vmem:[%s7507_s18 + $0xd8] sm:$0xff]  ;;  %9144 = vst [vmem:[#allocation73_spill] sm:$0xff] %v8162_v24  ;;  %v8174_v38 = vld [vmem:[%s7507_s18 + $0x80] sm:$0xff] }
 0x391   : > { %3073 = vmatpush1.xpose.msra.mxu0 %v8132_v49  ;;  %9140 = vst [vmem:[#allocation69_spill] sm:$0xff] %v8146_v21  ;;  %v8150_v49 = vld [vmem:[%s7507_s18 + $0x90] sm:$0xff]  ;;  %v8165_v5 = vmul.f32 %v8162_v24, %v2853_v4  ;;  %9146 = vst [vmem:[#allocation75_spill] sm:$0xff] %v8174_v38  ;;  %v2668_v4 = vcombine.high %v2652_v63, %v2652_v63 }
 0x392   : > { %3074 = vmatprep.subr.mxu0 %v8138_v26  ;;  %9141 = vst [vmem:[#allocation70_spill] sm:$0xff] %v8150_v49  ;;  %v8158_v26 = vld [vmem:[%s7507_s18 + $0xd0] sm:$0xff] }
 0x393   : > { %3146 = vmatpush1.xpose.msra.mxu1 %v8142_v12  ;;  %9143 = vst [vmem:[#allocation72_spill] sm:$0xff] %v8158_v26  ;;  %v3190_v24 = vcombine.high %v8165_v5, %v8165_v5 }
 0x394   : > { %3147 = vmatprep.subr.mxu1 %v8146_v21  ;;  %v8168_v21 = vld [vmem:[%s7507_s18 + $0xc8] sm:$0xff] }
 0x395   : > { %3075 = vmatpush1.xpose.msra.mxu0 %v8150_v49  ;;  %9145 = vst [vmem:[#allocation74_spill] sm:$0xff] %v8168_v21  ;;  %v8184_v49 = vld [vmem:[%s7507_s18 + $0x138] sm:$0xff] }
 0x396   : > { %3076 = vmatprep.subr.mxu0 %v8154_v10  ;;  %v8178_v10 = vld [vmem:[%s7529_s2 + $0x28] sm:$0x77]  ;;  %9148 = vst [vmem:[#allocation77_spill] sm:$0xff] %v8184_v49 }
 0x397   : > { %3148 = vmatpush1.xpose.msra.mxu1 %v8158_v26  ;;  %9147 = vst [vmem:[#allocation76_spill] sm:$0xff] %v8178_v10  ;;  %v8181_v26 = vmul.f32 %v8178_v10, %v2854_v20  ;;  %v8197_v20 = vpop.f32.mrf.mxu0  ;;  %v8200_v10 = vld [vmem:[%s7507_s18 + $0x130] sm:$0xff] }
 0x398   : > { %3149 = vmatprep.subr.mxu1 %v8168_v21  ;;  %v8188_v21 = vld [vmem:[%s7507_s18 + $0xc0] sm:$0xff]  ;;  %9151 = vst [vmem:[#allocation80_spill] sm:$0xff] %v8200_v10 }
 0x399   : > { %3077 = vmatpush1.xpose.msra.mxu0 %v8174_v38  ;;  %9149 = vst [vmem:[#allocation78_spill] sm:$0xff] %v8188_v21  ;;  %v8194_v38 = vld [vmem:[%s7507_s18 + $0x178] sm:$0xff]  ;;  %v3263_v63 = vcombine.high %v8181_v26, %v8181_v26 }
 0x39a   : > { %3216 = vmatprep.subr.mxu0 %v8184_v49  ;;  %9150 = vst [vmem:[#allocation79_spill] sm:$0xff] %v8194_v38  ;;  %v8232_v49 = vld [vmem:[%s7507_s18 + $0x160] sm:$0xff] }
 0x39b   : > { %3150 = vmatpush1.xpose.msra.mxu1 %v8188_v21  ;;  %v2670_v21 = vcombine.high %v2666_v22, %v2666_v22  ;;  %v2671_v22 = vcombine.low %v8171_v9, %v8197_v20  ;;  %9157 = vst [vmem:[#allocation86_spill] sm:$0xff] %v8232_v49 }
 0x39c   : > { %3111 = vmatmul.mubr.f32.vlgmr.msra.gmra.mxu0 %v2883_v45  ;;  %3289 = vmatprep.subr.mxu1 %v8194_v38  ;;  %v8206_v45 = vld [vmem:[%s7507_s18 + $0x128] sm:$0xff]  ;;  %v8210_v38 = vld [vmem:[%s7507_s18 + $0x170] sm:$0xff] }
 0x39d   : > { %3217 = vmatpush1.xpose.msra.mxu0 %v8200_v10  ;;  %3256 = vmatprep.mubr.f32.mxu0 %v3190_v24  ;;  %9152 = vst [vmem:[#allocation81_spill] sm:$0xff] %v8206_v45  ;;  %9153 = vst [vmem:[#allocation82_spill] sm:$0xff] %v8210_v38  ;;  %v2772_v10 = vrot.slane %v2668_v4, %v7568_v43  ;;  %v2776_v24 = vrot.slane %v2668_v4, %v7570_v44  ;;  %v8228_v4 = vld [vmem:[%s7507_s18 + $0x118] sm:$0xff] }
 0x39e   : > { %3184 = vmatmul.mubr.f32.vlgmr.msra.gmra.mxu1 %v2884_v33  ;;  %3218 = vmatprep.subr.mxu0 %v8206_v45  ;;  %v8218_v33 = vld [vmem:[%s7507_s18 + $0x168] sm:$0xff]  ;;  %v8222_v45 = vld [vmem:[%s7507_s18 + $0x120] sm:$0xff]  ;;  %9156 = vst [vmem:[#allocation85_spill] sm:$0xff] %v8228_v4  ;;  %v2679_v12 = vrot.slane %v2671_v22, %v7565_v39 }
 0x39f   : > { %3290 = vmatpush1.xpose.msra.mxu1 %v8210_v38  ;;  %3329 = vmatprep.mubr.f32.mxu1 %v3263_v63  ;;  %9154 = vst [vmem:[#allocation83_spill] sm:$0xff] %v8218_v33  ;;  %9155 = vst [vmem:[#allocation84_spill] sm:$0xff] %v8222_v45  ;;  %v2780_v63 = vrot.slane %v2670_v21, %v7568_v43  ;;  %v2784_v38 = vrot.slane %v2670_v21, %v7570_v44  ;;  %v8241_v21 = vld [vmem:[%s7507_s18 + $0x110] sm:$0xff] }
 0x3a0   : > { %3291 = vmatprep.subr.mxu1 %v8218_v33  ;;  %v2855_v33 = vcombine.low %v2772_v10, %v2776_v24  ;;  %9159 = vst [vmem:[#allocation88_spill] sm:$0xff] %v8241_v21  ;;  %v8249_v10 = vld [vmem:[%s7507_s18 + $0x150] sm:$0xff] }
 0x3a1   : > { %3219 = vmatpush1.xpose.msra.mxu0 %v8222_v45  ;;  %v8237_v45 = vld [vmem:[%s7507_s18 + $0x158] sm:$0xff]  ;;  %9161 = vst [vmem:[#allocation90_spill] sm:$0xff] %v8249_v10  ;;  %v8253_v24 = vld [vmem:[%s7529_s2 + $0x30] sm:$0x77] }
 0x3a2   : > { %3220 = vmatprep.subr.mxu0 %v8228_v4  ;;  %9158 = vst [vmem:[#allocation87_spill] sm:$0xff] %v8237_v45  ;;  %v2856_v4 = vcombine.low %v2780_v63, %v2784_v38  ;;  %9162 = vst [vmem:[#allocation91_spill] sm:$0xff] %v8253_v24  ;;  %v8256_v22 = vmul.f32 %v8253_v24, %v2855_v33  ;;  %v8263_v38 = vld [vmem:[%s7507_s18 + $0x100] sm:$0xff]  ;;  %v8267_v63 = vld [vmem:[%s7529_s2 + $0x38] sm:$0x77] }
 0x3a3   : > { %3292 = vmatpush1.xpose.msra.mxu1 %v8232_v49  ;;  %v8259_v49 = vld [vmem:[%s7507_s18 + $0x148] sm:$0xff]  ;;  %9164 = vst [vmem:[#allocation93_spill] sm:$0xff] %v8263_v38  ;;  %9165 = vst [vmem:[#allocation94_spill] sm:$0xff] %v8267_v63  ;;  %v8274_v33 = vld [vmem:[%s7507_s18 + $0x1b8] sm:$0xff] }
 0x3a4   : > { %3293 = vmatprep.subr.mxu1 %v8237_v45  ;;  %v2687_v45 = vcombine.high %v2679_v12, %v2679_v12  ;;  %9163 = vst [vmem:[#allocation92_spill] sm:$0xff] %v8259_v49  ;;  %9166 = vst [vmem:[#allocation95_spill] sm:$0xff] %v8274_v33  ;;  %v8278_v24 = vld [vmem:[%s7507_s18 + $0x140] sm:$0xff] }
 0x3a5   : > { %3221 = vmatpush1.xpose.msra.mxu0 %v8241_v21  ;;  %9167 = vst [vmem:[#allocation96_spill] sm:$0xff] %v8278_v24 }
 0x3a6   : > { %3222 = vmatprep.subr.mxu0 %v8245_v37  ;;  %v2695_v37 = vrot.slane %v2679_v12, %v7565_v39  ;;  %v8290_v12 = vld [vmem:[%s7507_s18 + $0x1b0] sm:$0xff] }
 0x3a7   : > { %3294 = vmatpush1.xpose.msra.mxu1 %v8249_v10  ;;  %v8270_v10 = vmul.f32 %v8267_v63, %v2856_v4  ;;  %v8286_v4 = vld [vmem:[%s7507_s18 + $0x1f8] sm:$0xff]  ;;  %9169 = vst [vmem:[#allocation98_spill] sm:$0xff] %v8290_v12  ;;  %v8309_v63 = vld [vmem:[%s7507_s18 + $0x1e8] sm:$0xff] }
 0x3a8   : > { %3295 = vmatprep.subr.mxu1 %v8259_v49  ;;  %v2709_v49 = vrot.slane %v2687_v45, %v7565_v39  ;;  %9168 = vst [vmem:[#allocation97_spill] sm:$0xff] %v8286_v4  ;;  %v2792_v45 = vrot.slane %v2695_v37, %v7570_v44  ;;  %9172 = vst [vmem:[#allocation101_spill] sm:$0xff] %v8309_v63 }
 0x3a9   : > { %3223 = vmatpush1.xpose.msra.mxu0 %v8263_v38  ;;  %v3336_v38 = vcombine.high %v8256_v22, %v8256_v22 }
 0x3aa   : > { %3362 = vmatprep.subr.mxu0 %v8274_v33  ;;  %v2788_v33 = vrot.slane %v2695_v37, %v7568_v43 }
 0x3ab   : > { %3296 = vmatpush1.xpose.msra.mxu1 %v8278_v24  ;;  %v3409_v24 = vcombine.high %v8270_v10, %v8270_v10 }
 0x3ac   : > { %3257 = vmatmul.mubr.f32.vlgmr.msra.gmra.mxu0 %v8165_v5  ;;  %3435 = vmatprep.subr.mxu1 %v8286_v4  ;;  %v8299_v5 = vld [vmem:[%s7507_s18 + $0x1a8] sm:$0xff]  ;;  %v8303_v4 = vld [vmem:[%s7507_s18 + $0x1f0] sm:$0xff] }
 0x3ad   : > { %3363 = vmatpush1.xpose.msra.mxu0 %v8290_v12  ;;  %3402 = vmatprep.mubr.f32.mxu0 %v3336_v38  ;;  %9170 = vst [vmem:[#allocation99_spill] sm:$0xff] %v8299_v5  ;;  %9171 = vst [vmem:[#allocation100_spill] sm:$0xff] %v8303_v4  ;;  %v2796_v38 = vrot.slane %v2709_v49, %v7568_v43  ;;  %v2800_v12 = vrot.slane %v2709_v49, %v7570_v44 }
 0x3ae   : > { %3330 = vmatmul.mubr.f32.vlgmr.msra.gmra.mxu1 %v8181_v26  ;;  %3364 = vmatprep.subr.mxu0 %v8299_v5  ;;  %v8313_v26 = vld [vmem:[%s7507_s18 + $0x1a0] sm:$0xff]  ;;  %v2857_v5 = vcombine.low %v2788_v33, %v2792_v45 }
 0x3af   : > { %3436 = vmatpush1.xpose.msra.mxu1 %v8303_v4  ;;  %3475 = vmatprep.mubr.f32.mxu1 %v3409_v24  ;;  %v8317_v4 = vld [vmem:[%s7507_s18 + $0x198] sm:$0xff]  ;;  %v8321_v24 = vld [vmem:[%s7507_s18 + $0x1e0] sm:$0xff]  ;;  %v2858_v21 = vcombine.low %v2796_v38, %v2800_v12  ;;  %v8343_v12 = vld [vmem:[%s7507_s18 + $0x1d0] sm:$0xff] }
 0x3b0   : > { %3437 = vmatprep.subr.mxu1 %v8309_v63  ;;  %9173 = vst [vmem:[#allocation102_spill] sm:$0xff] %v8317_v4  ;;  %v8329_v63 = vld [vmem:[%s7507_s18 + $0x190] sm:$0xff]  ;;  %v8333_v33 = vld [vmem:[%s7529_s2 + $0x40] sm:$0x77]  ;;  %9178 = vst [vmem:[#allocation107_spill] sm:$0xff] %v8343_v12 }
 0x3b1   : > { %3365 = vmatpush1.xpose.msra.mxu0 %v8313_v26  ;;  %9175 = vst [vmem:[#allocation104_spill] sm:$0xff] %v8329_v63  ;;  %9176 = vst [vmem:[#allocation105_spill] sm:$0xff] %v8333_v33  ;;  %v8336_v45 = vmul.f32 %v8333_v33, %v2857_v5  ;;  %v8347_v38 = vld [vmem:[%s7529_s2 + $0x48] sm:$0x77]  ;;  %v8357_v5 = vld [vmem:[%s7507_s18 + $0x180] sm:$0xff] }
 0x3b2   : > { %3366 = vmatprep.subr.mxu0 %v8317_v4  ;;  %v8339_v4 = vld [vmem:[%s7507_s18 + $0x188] sm:$0xff]  ;;  %9179 = vst [vmem:[#allocation108_spill] sm:$0xff] %v8347_v38  ;;  %9181 = vst [vmem:[#allocation110_spill] sm:$0xff] %v8357_v5 }
 0x3b3   : > { %3438 = vmatpush1.xpose.msra.mxu1 %v8321_v24  ;;  %9177 = vst [vmem:[#allocation106_spill] sm:$0xff] %v8339_v4  ;;  %v3482_v33 = vcombine.high %v8336_v45, %v8336_v45 }
 0x3b4   : > { %3439 = vmatprep.subr.mxu1 %v8325_v25  ;;  %v8350_v25 = vmul.f32 %v8347_v38, %v2858_v21  ;;  %v8367_v21 = vld [vmem:[%s7507_s18 + $0x1c0] sm:$0xff]  ;;  %v2719_v38 = vcombine.high %v2709_v49, %v2709_v49  ;;  %v8385_v49 = vld [vmem:[%s7507_s18 + $0x228] sm:$0xff] }
 0x3b5   : > { %3367 = vmatpush1.xpose.msra.mxu0 %v8329_v63  ;;  %v8353_v63 = vld [vmem:[%s7507_s18 + $0x1c8] sm:$0xff]  ;;  %9183 = vst [vmem:[#allocation112_spill] sm:$0xff] %v8367_v21  ;;  %9186 = vst [vmem:[#allocation115_spill] sm:$0xff] %v8385_v49 }
 0x3b6   : > { %3368 = vmatprep.subr.mxu0 %v8339_v4  ;;  %9180 = vst [vmem:[#allocation109_spill] sm:$0xff] %v8353_v63  ;;  %v2717_v4 = vcombine.high %v2695_v37, %v2695_v37  ;;  %v8374_v37 = vld [vmem:[%s7507_s18 + $0x278] sm:$0xff] }
 0x3b7   : > { %3440 = vmatpush1.xpose.msra.mxu1 %v8343_v12  ;;  %v8363_v12 = vld [vmem:[%s7507_s18 + $0x238] sm:$0xff]  ;;  %9184 = vst [vmem:[#allocation113_spill] sm:$0xff] %v8374_v37 }
 0x3b8   : > { %3441 = vmatprep.subr.mxu1 %v8353_v63  ;;  %9182 = vst [vmem:[#allocation111_spill] sm:$0xff] %v8363_v12  ;;  %v3555_v63 = vcombine.high %v8350_v25, %v8350_v25 }
 0x3b9   : > { %3369 = vmatpush1.xpose.msra.mxu0 %v8357_v5  ;;  %v8378_v5 = vld [vmem:[%s7507_s18 + $0x230] sm:$0xff] }
 0x3ba   : > { %3508 = vmatprep.subr.mxu0 %v8363_v12  ;;  %9185 = vst [vmem:[#allocation114_spill] sm:$0xff] %v8378_v5  ;;  %v2804_v12 = vrot.slane %v2717_v4, %v7568_v43 }
 0x3bb   : > { %3442 = vmatpush1.xpose.msra.mxu1 %v8367_v21  ;;  %v2808_v21 = vrot.slane %v2717_v4, %v7570_v44  ;;  %v8401_v4 = vld [vmem:[%s7507_s18 + $0x220] sm:$0xff] }
 0x3bc   : > { %3403 = vmatmul.mubr.f32.vlgmr.msra.gmra.mxu0 %v8256_v22  ;;  %3581 = vmatprep.subr.mxu1 %v8374_v37  ;;  %v8389_v22 = vld [vmem:[%s7507_s18 + $0x270] sm:$0xff]  ;;  %v8395_v37 = vld [vmem:[%s7507_s18 + $0x268] sm:$0xff] }
 0x3bd   : > { %3509 = vmatpush1.xpose.msra.mxu0 %v8378_v5  ;;  %3548 = vmatprep.mubr.f32.mxu0 %v3482_v33  ;;  %9187 = vst [vmem:[#allocation116_spill] sm:$0xff] %v8389_v22  ;;  %v2812_v33 = vrot.slane %v2719_v38, %v7568_v43  ;;  %v2816_v5 = vrot.slane %v2719_v38, %v7570_v44  ;;  %9188 = vst [vmem:[#allocation117_spill] sm:$0xff] %v8395_v37  ;;  %v8409_v38 = vld [vmem:[%s7507_s18 + $0x260] sm:$0xff] }
 0x3be   : > { %3476 = vmatmul.mubr.f32.vlgmr.msra.gmra.mxu1 %v8270_v10  ;;  %3510 = vmatprep.subr.mxu0 %v8385_v49  ;;  %v2672_v10 = vcombine.high %v8171_v9, %v8197_v20  ;;  %9190 = vst [vmem:[#allocation119_spill] sm:$0xff] %v8409_v38  ;;  %v8413_v49 = vld [vmem:[%s7507_s18 + $0x258] sm:$0xff]  ;;  %v8418_v20 = vld [vmem:[%s7507_s18 + $0x210] sm:$0xff] }
 0x3bf   : > { %3582 = vmatpush1.xpose.msra.mxu1 %v8389_v22  ;;  %3621 = vmatprep.mubr.f32.mxu1 %v3555_v63  ;;  %v2859_v63 = vcombine.low %v2804_v12, %v2808_v21  ;;  %v8405_v22 = vld [vmem:[%s7507_s18 + $0x218] sm:$0xff]  ;;  %9191 = vst [vmem:[#allocation120_spill] sm:$0xff] %v8413_v49  ;;  %9192 = vst [vmem:[#allocation121_spill] sm:$0xff] %v8418_v20  ;;  %v8422_v12 = vld [vmem:[%s7529_s2 + $0x50] sm:$0x77] }
 0x3c0   : > { %3583 = vmatprep.subr.mxu1 %v8395_v37  ;;  %9189 = vst [vmem:[#allocation118_spill] sm:$0xff] %v8405_v22  ;;  %v2860_v37 = vcombine.low %v2812_v33, %v2816_v5  ;;  %v2686_v9 = vrot.slane %v2672_v10, %v7565_v39  ;;  %9193 = vst [vmem:[#allocation122_spill] sm:$0xff] %v8422_v12  ;;  %v8430_v5 = vld [vmem:[%s7507_s18 + $0x250] sm:$0xff]  ;;  %v8434_v33 = vld [vmem:[%s7529_s2 + $0x58] sm:$0x77] }
 0x3c1   : > { %3511 = vmatpush1.xpose.msra.mxu0 %v8401_v4  ;;  %v2891_v21 = vmul.f32 %v8422_v12, %v2859_v63  ;;  %9195 = vst [vmem:[#allocation124_spill] sm:$0xff] %v8430_v5  ;;  %9196 = vst [vmem:[#allocation125_spill] sm:$0xff] %v8434_v33  ;;  %v8442_v12 = vld [vmem:[%s7507_s18 + $0x200] sm:$0xff] }
 0x3c2   : > { %3512 = vmatprep.subr.mxu0 %v8405_v22  ;;  %v8426_v22 = vld [vmem:[%s7507_s18 + $0x208] sm:$0xff]  ;;  %v2892_v10 = vmul.f32 %v8434_v33, %v2860_v37  ;;  %v2688_v63 = vcombine.high %v2686_v9, %v2686_v9  ;;  %9198 = vst [vmem:[#allocation127_spill] sm:$0xff] %v8442_v12  ;;  %v8461_v33 = vld [vmem:[%s7507_s18 + $0x2b0] sm:$0xff] }
 0x3c3   : > { %3584 = vmatpush1.xpose.msra.mxu1 %v8409_v38  ;;  %9194 = vst [vmem:[#allocation123_spill] sm:$0xff] %v8426_v22  ;;  %v8451_v38 = vld [vmem:[%s7507_s18 + $0x240] sm:$0xff]  ;;  %9199 = vst [vmem:[#allocation128_spill] sm:$0xff] %v8461_v33 }
 0x3c4   : > { %3585 = vmatprep.subr.mxu1 %v8413_v49  ;;  %v8438_v49 = vld [vmem:[%s7507_s18 + $0x248] sm:$0xff]  ;;  %v3701_v37 = vcombine.high %v2892_v10, %v2892_v10 }
 0x3c5   : > { %3513 = vmatpush1.xpose.msra.mxu0 %v8418_v20  ;;  %9197 = vst [vmem:[#allocation126_spill] sm:$0xff] %v8438_v49  ;;  %v8446_v20 = vld [vmem:[%s7507_s18 + $0x2b8] sm:$0xff] }
 0x3c6   : > { %3514 = vmatprep.subr.mxu0 %v8426_v22  ;;  %v3628_v22 = vcombine.high %v2891_v21, %v2891_v21 }
 0x3c7   : > { %3586 = vmatpush1.xpose.msra.mxu1 %v8430_v5  ;;  %v2702_v5 = vrot.slane %v2686_v9, %v7565_v39 }
 0x3c8   : > { %3587 = vmatprep.subr.mxu1 %v8438_v49  ;;  %v8456_v49 = vld [vmem:[%s7507_s18 + $0x2f8] sm:$0xff] }
 0x3c9   : > { %3515 = vmatpush1.xpose.msra.mxu0 %v8442_v12  ;;  %v2716_v12 = vrot.slane %v2688_v63, %v7565_v39  ;;  %v2824_v9 = vrot.slane %v2702_v5, %v7570_v44 }
 0x3ca   : > { %3654 = vmatprep.subr.mxu0 %v8446_v20 }
 0x3cb   : > { %3588 = vmatpush1.xpose.msra.mxu1 %v8451_v38  ;;  %v2828_v63 = vrot.slane %v2716_v12, %v7568_v43 }
 0x3cc   : > { %3549 = vmatmul.mubr.f32.vlgmr.msra.gmra.mxu0 %v8336_v45  ;;  %3727 = vmatprep.subr.mxu1 %v8456_v49  ;;  %v2820_v45 = vrot.slane %v2702_v5, %v7568_v43 }
 0x3cd   : > { %3655 = vmatpush1.xpose.msra.mxu0 %v8461_v33  ;;  %3694 = vmatprep.mubr.f32.mxu0 %v3628_v22  ;;  %v2832_v33 = vrot.slane %v2716_v12, %v7570_v44  ;;  %v9215_v22 = vld [vmem:[#allocation44_spill] sm:$0xff] }
 0x3ce   : > { %3622 = vmatmul.mubr.f32.vlgmr.msra.gmra.mxu1 %v8350_v25  ;;  %3656 = vmatprep.subr.mxu0 %v7728_v27  ;;  %v2861_v27 = vcombine.low %v2820_v45, %v2824_v9  ;;  %v9214_v25 = vld [vmem:[#allocation43_spill] sm:$0xff]  ;;  %v4197_v45 = vld [vmem:[#allocation9 + $0x88] sm:$0xff]  ;;  %v4066_v9 = vld [vmem:[#allocation9 + $0x20] sm:$0xff] }
 0x3cf   : > { %3728 = vmatpush1.xpose.msra.mxu1 %v7732_v28  ;;  %3767 = vmatprep.mubr.f32.mxu1 %v3701_v37  ;;  %v2862_v28 = vcombine.low %v2828_v63, %v2832_v33  ;;  %v4068_v33 = vld [vmem:[#allocation9 + $0x30] sm:$0xff]  ;;  %v4067_v37 = vld [vmem:[#allocation9 + $0x28] sm:$0xff]  ;;  %v4196_v63 = vld [vmem:[#allocation9 + $0x80] sm:$0xff] }
 0x3d0   : > { %3729 = vmatprep.subr.mxu1 %v7736_v30  ;;  %v2893_v30 = vmul.f32 %v2861_v27, %v7772_v47  ;;  %v8522_v27 = vld [vmem:[#allocation9 + $0xf8] sm:$0xff] }
 0x3d1   : > { %3657 = vmatpush1.xpose.msra.mxu0 %v7741_v31  ;;  %v2894_v31 = vmul.f32 %v2862_v28, %v7783_v51  ;;  %v6955_v28 = vld [vmem:[#allocation8 + $0x18] sm:$0xff] }
 0x3d2   : > { %3658 = vmatprep.subr.mxu0 %v7745_v32  ;;  %v2718_v32 = vcombine.high %v2702_v5, %v2702_v5  ;;  %v4199_v5 = vld [vmem:[#allocation9 + $0x98] sm:$0xff] }
 0x3d3   : > { %3730 = vmatpush1.xpose.msra.mxu1 %v7751_v35  ;;  %v3774_v35 = vcombine.high %v2893_v30, %v2893_v30 }
 0x3d4   : > { %3731 = vmatprep.subr.mxu1 %v7755_v36  ;;  %v3847_v36 = vcombine.high %v2894_v31, %v2894_v31 }
 0x3d5   : > { %3659 = vmatpush1.xpose.msra.mxu0 %v7761_v40  ;;  %v2720_v40 = vcombine.high %v2716_v12, %v2716_v12  ;;  %v9216_v12 = vld [vmem:[#allocation45_spill] sm:$0xff] }
 0x3d6   : > { %3660 = vmatprep.subr.mxu0 %v7765_v41  ;;  %v2836_v41 = vrot.slane %v2718_v32, %v7568_v43 }
 0x3d7   : > { %3732 = vmatpush1.xpose.msra.mxu1 %v7769_v46  ;;  %v2840_v46 = vrot.slane %v2718_v32, %v7570_v44  ;;  %v2844_v47 = vrot.slane %v2720_v40, %v7568_v43 }
 0x3d8   : > { %3733 = vmatprep.subr.mxu1 %v7776_v48  ;;  %v2848_v48 = vrot.slane %v2720_v40, %v7570_v44 }
 0x3d9   : > { %3661 = vmatpush1.xpose.msra.mxu0 %v7780_v50  ;;  %v2863_v50 = vcombine.low %v2836_v41, %v2840_v46 }
 0x3da   : > { %3800 = vmatprep.subr.mxu0 %v7787_v53  ;;  %v2864_v51 = vcombine.low %v2844_v47, %v2848_v48 }
 0x3db   : > { %3734 = vmatpush1.xpose.msra.mxu1 %v7792_v55  ;;  %v2895_v53 = vmul.f32 %v2863_v50, %v7850_v16  ;;  %v9210_v16 = vld [vmem:[#allocation39_spill] sm:$0xff] }
 0x3dc   : > { %3695 = vmatmul.mubr.f32.vlgmr.msra.gmra.mxu0 %v2891_v21  ;;  %3873 = vmatprep.subr.mxu1 %v7796_v56  ;;  %v2896_v55 = vmul.f32 %v2864_v51, %v7861_v18  ;;  %v9200_v56 = vld [vmem:[#allocation29_spill] sm:$0xff]  ;;  %v9213_v18 = vld [vmem:[#allocation42_spill] sm:$0xff]  ;;  %v4069_v21 = vld [vmem:[#allocation9 + $0x38] sm:$0xff] }
 0x3dd   : > { %3801 = vmatpush1.xpose.msra.mxu0 %v7801_v58  ;;  %3840 = vmatprep.mubr.f32.mxu0 %v3774_v35  ;;  %v9201_v58 = vld [vmem:[#allocation30_spill] sm:$0xff] }
 0x3de   : > { %3768 = vmatmul.mubr.f32.vlgmr.msra.gmra.mxu1 %v2892_v10  ;;  %3802 = vmatprep.subr.mxu0 %v7805_v61  ;;  %v3920_v61 = vcombine.high %v2895_v53, %v2895_v53  ;;  %v4198_v10 = vld [vmem:[#allocation9 + $0x90] sm:$0xff] }
 0x3df   : > { %3874 = vmatpush1.xpose.msra.mxu1 %v7810_v62  ;;  %3913 = vmatprep.mubr.f32.mxu1 %v3847_v36  ;;  %v9202_v62 = vld [vmem:[#allocation31_spill] sm:$0xff] }
 0x3e0   : > { %3875 = vmatprep.subr.mxu1 %v7814_v0  ;;  %v9203_v0 = vld [vmem:[#allocation32_spill] sm:$0xff] }
 0x3e1   : > { %3803 = vmatpush1.xpose.msra.mxu0 %v7819_v2  ;;  %v3993_v2 = vcombine.high %v2896_v55, %v2896_v55 }
 0x3e2   : > { %3804 = vmatprep.subr.mxu0 %v7823_v3  ;;  %v9204_v3 = vld [vmem:[#allocation33_spill] sm:$0xff] }
 0x3e3   : > { %3876 = vmatpush1.xpose.msra.mxu1 %v7829_v6  ;;  %v9205_v6 = vld [vmem:[#allocation34_spill] sm:$0xff] }
 0x3e4   : > { %3877 = vmatprep.subr.mxu1 %v7833_v7  ;;  %v9206_v7 = vld [vmem:[#allocation35_spill] sm:$0xff] }
 0x3e5   : > { %3805 = vmatpush1.xpose.msra.mxu0 %v7839_v11  ;;  %v9207_v11 = vld [vmem:[#allocation36_spill] sm:$0xff] }
 0x3e6   : > { %3806 = vmatprep.subr.mxu0 %v7843_v13  ;;  %v9208_v13 = vld [vmem:[#allocation37_spill] sm:$0xff] }
 0x3e7   : > { %3878 = vmatpush1.xpose.msra.mxu1 %v7847_v15  ;;  %v9209_v15 = vld [vmem:[#allocation38_spill] sm:$0xff] }
 0x3e8   : > { %3879 = vmatprep.subr.mxu1 %v7854_v42  ;;  %v9211_v42 = vld [vmem:[#allocation40_spill] sm:$0xff] }
 0x3e9   : > { %3807 = vmatpush1.xpose.msra.mxu0 %v7858_v17  ;;  %v9212_v17 = vld [vmem:[#allocation41_spill] sm:$0xff] }
 0x3ea   : > { %3946 = vmatprep.subr.mxu0 %v9200_v56 }
 0x3eb   : > { %3880 = vmatpush1.xpose.msra.mxu1 %v9201_v58 }
 0x3ec   : > { %3841 = vmatmul.mubr.f32.vlgmr.msra.gmra.mxu0 %v2893_v30  ;;  %4019 = vmatprep.subr.mxu1 %v9202_v62  ;;  %v8525_v30 = vpop.f32.mrf.mxu1 }
 0x3ed   : > { %3947 = vmatpush1.xpose.msra.mxu0 %v9203_v0  ;;  %3986 = vmatprep.mubr.f32.mxu0 %v3920_v61 }
 0x3ee   : > { %3914 = vmatmul.mubr.f32.vlgmr.msra.gmra.mxu1 %v2894_v31  ;;  %3948 = vmatprep.subr.mxu0 %v9204_v3 }
 0x3ef   : > { %4020 = vmatpush1.xpose.msra.mxu1 %v9205_v6  ;;  %4059 = vmatprep.mubr.f32.mxu1 %v3993_v2 }
 0x3f0   : > { %4021 = vmatprep.subr.mxu1 %v9206_v7 }
 0x3f1   : > { %3949 = vmatpush1.xpose.msra.mxu0 %v9207_v11 }
 0x3f2   : > { %3950 = vmatprep.subr.mxu0 %v9208_v13 }
 0x3f3   : > { %4022 = vmatpush1.xpose.msra.mxu1 %v9209_v15 }
 0x3f4   : > { %4023 = vmatprep.subr.mxu1 %v9210_v16 }
 0x3f5   : > { %3951 = vmatpush1.xpose.msra.mxu0 %v9211_v42 }
 0x3f6   : > { %3952 = vmatprep.subr.mxu0 %v9212_v17 }
 0x3f7   : > { %4024 = vmatpush1.xpose.msra.mxu1 %v9213_v18 }
 0x3f8   : > { %4025 = vmatprep.subr.mxu1 %v9214_v25 }
 0x3f9   : > { %3953 = vmatpush1.xpose.msra.mxu0 %v9215_v22 }
 0x3fa   : > { %6656 = vmatprep.subr.mxu0 %v4069_v21 }
 0x3fb   : > { %4026 = vmatpush1.xpose.msra.mxu1 %v9216_v12 }
 0x3fc   : > { %3987 = vmatmul.mubr.f32.vlgmr.msra.gmra.mxu0 %v2895_v53  ;;  %6667 = vmatprep.subr.mxu1 %v4199_v5 }
 0x3fd   : > { %6657 = vmatpush3.msra.mxu0 %v4069_v21 }
 0x3fe   : > { %4060 = vmatmul.mubr.f32.vlgmr.msra.gmra.mxu1 %v2896_v55  ;;  %6658 = vmatprep.subr.mxu0 %v4068_v33 }
 0x3ff   : > { %6668 = vmatpush3.msra.mxu1 %v4199_v5  ;;  %6659 = vmatpush3.msra.mxu0 %v4068_v33 }
 0x400   : > { %6669 = vmatprep.subr.mxu1 %v4198_v10  ;;  %6660 = vmatprep.subr.mxu0 %v4067_v37 }
 0x401   : > { %6670 = vmatpush3.msra.mxu1 %v4198_v10  ;;  %6661 = vmatpush3.msra.mxu0 %v4067_v37 }
 0x402   : > { %6671 = vmatprep.subr.mxu1 %v4197_v45  ;;  %6662 = vmatprep.subr.mxu0 %v4066_v9 }
 0x403   : > { %6672 = vmatpush3.msra.mxu1 %v4197_v45  ;;  %6663 = vmatpush3.msra.mxu0 %v4066_v9 }
 0x404   : > { %6673 = vmatprep.subr.mxu1 %v4196_v63  ;;  %6678 = vmatprep.subr.mxu0 %v8522_v27 }
 0x405   : > { %6674 = vmatpush3.msra.mxu1 %v4196_v63 }
 0x406   : > { %4460 = vmatprep.subr.mxu1 %v6955_v28 }
 0x44c   : > { %v2966_v31 = vpop.f32.mrf.mxu0 }
 0x44d   : > { %v4314_v36 = vrot.slane %v2966_v31, 2  ;;  %v4200_v7 = vrot.slane %v2966_v31, 1 }
 0x44e   : > { %v2968_v32 = vpop.f32.mrf.mxu0  ;;  %v3039_v35 = vpop.f32.mrf.mxu1 }
 0x44f   : > { %v4315_v40 = vrot.slane %v3039_v35, 1  ;;  %v4086_v11 = vrot.slane %v3039_v35, 7  ;;  %v4201_v17 = vsel %vm2196_vm2, %v3039_v35, %v4200_v7 }
 0x450   : > { %v3041_v41 = vpop.f32.mrf.mxu1 }
 0x451   : > { %v4316_v46 = vsel %vm2196_vm2, %v4315_v40, %v4314_v36  ;;  %v4087_v42 = vsel %vm2196_vm2, %v4086_v11, %v2966_v31 }
 0x45c   : > { %v3112_v47 = vpop.f32.mrf.mxu0 }
 0x45d   : > { %v4317_v48 = vsel %vm2199_vm3, %v3112_v47, %v4316_v46  ;;  %v4088_v15 = vrot.slane %v3112_v47, 6  ;;  %v4202_v16 = vrot.slane %v3112_v47, 7 }
 0x45e   : > { %v3114_v50 = vpop.f32.mrf.mxu0  ;;  %v3185_v51 = vpop.f32.mrf.mxu1 }
 0x45f   : > { %v4318_v53 = vrot.slane %v3185_v51, 7  ;;  %v4090_v18 = vrot.slane %v3185_v51, 5  ;;  %v4204_v25 = vrot.slane %v3185_v51, 6  ;;  %v4089_v22 = vsel %vm2199_vm3, %v4088_v15, %v4087_v42 }
 0x460   : > { %v3187_v55 = vpop.f32.mrf.mxu1  ;;  %v4203_v12 = vsel %vm2199_vm3, %v4202_v16, %v4201_v17 }
 0x461   : > { %v4319_v56 = vsel %vm2202_vm4, %v4318_v53, %v4317_v48  ;;  %v4091_v33 = vsel %vm2202_vm4, %v4090_v18, %v4089_v22  ;;  %v4205_v10 = vsel %vm2202_vm4, %v4204_v25, %v4203_v12 }
 0x46c   : > { %v3258_v58 = vpop.f32.mrf.mxu0 }
 0x46d   : > { %v4320_v61 = vrot.slane %v3258_v58, 6  ;;  %v4092_v21 = vrot.slane %v3258_v58, 4  ;;  %v4206_v5 = vrot.slane %v3258_v58, 5 }
 0x46e   : > { %v3260_v62 = vpop.f32.mrf.mxu0  ;;  %v3331_v0 = vpop.f32.mrf.mxu1 }
 0x46f   : > { %v4321_v2 = vsel %vm2205_vm5, %v4320_v61, %v4319_v56  ;;  %v4322_v3 = vrot.slane %v3331_v0, 5  ;;  %v4094_v37 = vrot.slane %v3331_v0, 3  ;;  %v4208_v45 = vrot.slane %v3331_v0, 4 }
 0x470   : > { %v3333_v6 = vpop.f32.mrf.mxu1  ;;  %v4093_v9 = vsel %vm2205_vm5, %v4092_v21, %v4091_v33  ;;  %v4207_v63 = vsel %vm2205_vm5, %v4206_v5, %v4205_v10 }
 0x471   : > { %v4323_v13 = vsel %vm2208_vm6, %v4322_v3, %v4321_v2  ;;  %v4095_v41 = vsel %vm2208_vm6, %v4094_v37, %v4093_v9  ;;  %v4209_v46 = vsel %vm2208_vm6, %v4208_v45, %v4207_v63 }
 0x47c   : > { %v3404_v28 = vpop.f32.mrf.mxu0 }
 0x47d   : > { %v4096_v31 = vrot.slane %v3404_v28, 2  ;;  %v4210_v32 = vrot.slane %v3404_v28, 3  ;;  %v4324_v35 = vrot.slane %v3404_v28, 4 }
 0x47e   : > { %v3406_v36 = vpop.f32.mrf.mxu0  ;;  %v3477_v40 = vpop.f32.mrf.mxu1 }
 0x47f   : > { %v4098_v47 = vrot.slane %v3477_v40, 1  ;;  %v4212_v48 = vrot.slane %v3477_v40, 2  ;;  %v4326_v50 = vrot.slane %v3477_v40, 3  ;;  %v4097_v51 = vsel %vm2211_vm7, %v4096_v31, %v4095_v41 }
 0x480   : > { %v3479_v53 = vpop.f32.mrf.mxu1  ;;  %v4211_v55 = vsel %vm2211_vm7, %v4210_v32, %v4209_v46  ;;  %v4325_v56 = vsel %vm2211_vm7, %v4324_v35, %v4323_v13 }
 0x481   : > { %v4099_v58 = vsel %vm2214_vm8, %v4098_v47, %v4097_v51  ;;  %v4213_v61 = vsel %vm2214_vm8, %v4212_v48, %v4211_v55  ;;  %v8548_v62 = vsel %vm2214_vm8, %v4326_v50, %v4325_v56 }
 0x482   : > { %6664 = vmatprep.mubr.msk.f32.mxu0 %vm2230_vm9, %v4099_v58  ;;  %6675 = vmatprep.mubr.msk.f32.mxu1 %vm2230_vm9, %v4213_v61 }
 0x48c   : > { %v3550_v0 = vpop.f32.mrf.mxu0 }
 0x48d   : > { %v4214_v22 = vrot.slane %v3550_v0, 1  ;;  %v4328_v46 = vrot.slane %v3550_v0, 2 }
 0x48e   : > { %v3552_v2 = vpop.f32.mrf.mxu0  ;;  %v3623_v3 = vpop.f32.mrf.mxu1 }
 0x48f   : > { %v4100_v25 = vrot.slane %v3623_v3, 7  ;;  %v4215_v10 = vsel %vm2196_vm2, %v3623_v3, %v4214_v22  ;;  %v4329_v31 = vrot.slane %v3623_v3, 1 }
 0x490   : > { %v3625_v6 = vpop.f32.mrf.mxu1 }
 0x491   : > { %v4101_v5 = vsel %vm2196_vm2, %v4100_v25, %v3550_v0  ;;  %v4330_v55 = vsel %vm2196_vm2, %v4329_v31, %v4328_v46  ;;  %v9229_v31 = vld [vmem:[#allocation58_spill] sm:$0xff] }
 0x49c   : > { %v3696_v7 = vpop.f32.mrf.mxu0 }
 0x49d   : > { %v4102_v12 = vrot.slane %v3696_v7, 6  ;;  %v4216_v21 = vrot.slane %v3696_v7, 7  ;;  %v4331_v0 = vsel %vm2199_vm3, %v3696_v7, %v4330_v55  ;;  %v4311_v7 = vld [vmem:[#allocation9 + $0xe8] sm:$0xff] }
 0x49e   : > { %v3698_v11 = vpop.f32.mrf.mxu0  ;;  %v3769_v15 = vpop.f32.mrf.mxu1 }
 0x49f   : > { %v4104_v33 = vrot.slane %v3769_v15, 5  ;;  %v4103_v37 = vsel %vm2199_vm3, %v4102_v12, %v4101_v5  ;;  %v4218_v45 = vrot.slane %v3769_v15, 6  ;;  %v4217_v63 = vsel %vm2199_vm3, %v4216_v21, %v4215_v10  ;;  %v4312_v12 = vld [vmem:[#allocation9 + $0xf0] sm:$0xff] }
 0x4a0   : > { %v3771_v16 = vpop.f32.mrf.mxu1  ;;  %v4332_v50 = vrot.slane %v3769_v15, 7  ;;  %v6551_v10 = vld [vmem:[%s7513_s21 + $0x20] sm:$0xff] }
 0x4a1   : > { %v4105_v32 = vsel %vm2202_vm4, %v4104_v33, %v4103_v37  ;;  %v4219_v36 = vsel %vm2202_vm4, %v4218_v45, %v4217_v63  ;;  %v4310_v37 = vld [vmem:[#allocation9 + $0xe0] sm:$0xff]  ;;  %v9225_v63 = vld [vmem:[#allocation54_spill] sm:$0xff] }
 0x4a2   : > { %v9220_v45 = vld [vmem:[#allocation49_spill] sm:$0xff] }
 0x4ac   : > { %v3842_v13 = vpop.f32.mrf.mxu0 }
 0x4ad   : > { %v4106_v9 = vrot.slane %v3842_v13, 4  ;;  %v4220_v28 = vrot.slane %v3842_v13, 5  ;;  %v4334_v56 = vrot.slane %v3842_v13, 6 }
 0x4ae   : > { %v3844_v42 = vpop.f32.mrf.mxu0  ;;  %v3915_v17 = vpop.f32.mrf.mxu1 }
 0x4af   : > { %v4108_v35 = vrot.slane %v3915_v17, 3  ;;  %v4107_v40 = vsel %vm2205_vm5, %v4106_v9, %v4105_v32  ;;  %v4222_v41 = vrot.slane %v3915_v17, 4  ;;  %v4221_v47 = vsel %vm2205_vm5, %v4220_v28, %v4219_v36  ;;  %v9221_v9 = vld [vmem:[#allocation50_spill] sm:$0xff]  ;;  %v9228_v28 = vld [vmem:[#allocation57_spill] sm:$0xff]  ;;  %v9230_v36 = vld [vmem:[#allocation59_spill] sm:$0xff] }
 0x4b0   : > { %v3917_v18 = vpop.f32.mrf.mxu1  ;;  %v4336_v25 = vrot.slane %v3915_v17, 5 }
 0x4b1   : > { %v4109_v58 = vsel %vm2208_vm6, %v4108_v35, %v4107_v40  ;;  %v4223_v3 = vsel %vm2208_vm6, %v4222_v41, %v4221_v47  ;;  %v4333_v18 = vsel %vm2202_vm4, %v4332_v50, %v4331_v0  ;;  %v2529_v40 = vadd.f32 %v8525_v30, %v9230_v36  ;;  %v9231_v41 = vld [vmem:[#allocation60_spill] sm:$0xff]  ;;  %v9238_v36 = vld [vmem:[#allocation67_spill] sm:$0xff] }
 0x4b2   : > { %v4335_v21 = vsel %vm2205_vm5, %v4334_v56, %v4333_v18 }
 0x4b3   : > { %v4337_v17 = vsel %vm2208_vm6, %v4336_v25, %v4335_v21 }
 0x4bc   : > { %v3988_v48 = vpop.f32.mrf.mxu0 }
 0x4bd   : > { %v4110_v51 = vrot.slane %v3988_v48, 2  ;;  %v4224_v53 = vrot.slane %v3988_v48, 3  ;;  %v4338_v5 = vrot.slane %v3988_v48, 4 }
 0x4be   : > { %v3990_v61 = vpop.f32.mrf.mxu0  ;;  %v4061_v2 = vpop.f32.mrf.mxu1 }
 0x4bf   : > { %v4112_v6 = vrot.slane %v4061_v2, 1  ;;  %v4226_v11 = vrot.slane %v4061_v2, 2  ;;  %v4111_v16 = vsel %vm2211_vm7, %v4110_v51, %v4109_v58  ;;  %v4225_v15 = vsel %vm2211_vm7, %v4224_v53, %v4223_v3 }
 0x4c0   : > { %v4063_v42 = vpop.f32.mrf.mxu1  ;;  %v4340_v33 = vrot.slane %v4061_v2, 3 }
 0x4c1   : > { %v4113_v13 = vsel %vm2214_vm8, %v4112_v6, %v4111_v16  ;;  %v4227_v22 = vsel %vm2214_vm8, %v4226_v11, %v4225_v15 }
 0x4c2   : > { %6665 = vmatmul.mubr.msk.f32.vlgmr.msra.gmra.mxu0 %vm2230_vm9, %v4113_v13  ;;  %6676 = vmatmul.mubr.msk.f32.vlgmr.msra.gmra.mxu1 %vm2230_vm9, %v4227_v22 }
 0x4c3   : > { %6679 = vmatpush3.msra.mxu0 %v8522_v27  ;;  %4461 = vmatpush1.msra.mxu1 %v7986_v19  ;;  %v4339_v27 = vsel %vm2211_vm7, %v4338_v5, %v4337_v17 }
 0x4c4   : > { %6680 = vmatprep.subr.mxu0 %v4312_v12  ;;  %6686 = vmatprep.mubr.msk.f32.mxu0 %vm2230_vm9, %v8548_v62  ;;  %v4341_v19 = vsel %vm2214_vm8, %v4340_v33, %v4339_v27  ;;  %v9218_v62 = vld [vmem:[#allocation47_spill] sm:$0xff] }
 0x4c5   : > { %4462 = vmatprep.subr.mxu1 %v7992_v52  ;;  %6681 = vmatpush3.msra.mxu0 %v4312_v12  ;;  %v6552_v52 = vld [vmem:[%s7513_s21 + $0x28] sm:$0xff]  ;;  %s7109_s21 = scalar_lea.vmem %s8867_s14, 256 }
 0x4c6   : > { %4463 = vmatpush1.msra.mxu1 %v7996_v59  ;;  %6682 = vmatprep.subr.mxu0 %v4311_v7  ;;  %v9217_v59 = vld [vmem:[#allocation46_spill] sm:$0xff]  ;;  %p7110_p2 = scmp.ne.s32.totalorder %s8867_s14, %s7109_s21  ;;  %p7117_p13 = scmp.lt.s32.totalorder %s7115_s4, %s7109_s21 }
 0x4c7   : > { %4496 = vmatprep.mubr.f32.mxu1 %v9116_v34  ;;  %6683 = vmatpush3.msra.mxu0 %v4311_v7 }
 0x4c8   : > { %6553 = vmatmul.mubr.msk.f32.vlgmr.msra.gmra.mxu1 %vm638_vm1, %v6551_v10  ;;  %6684 = vmatprep.subr.mxu0 %v4310_v37  ;;  %p7111_p5 = pnand %p7110_p2, %p9303_p12  ;;  %p7118_p10 = por %p7117_p13, %p7116_p7 }
 0x4c9   : > { %6685 = vmatpush3.msra.mxu0 %v4310_v37  ;;  %4502 = vmatprep.mubr.f32.mxu1 %v9116_v34  ;;  %v9219_v34 = vld [vmem:[#allocation48_spill] sm:$0xff] }
 0x4ca   : > { %6687 = vmatmul.mubr.msk.f32.vlgmr.msra.gmra.mxu0 %vm2230_vm9, %v4341_v19  ;;  %4816 = vmatprep.subr.mxu1 %v8007_v14  ;;  %v9222_v14 = vld [vmem:[#allocation51_spill] sm:$0xff]  ;;  %p7112_p6 = pneg %p7111_p5 }
 0x4cb   : > { %4817 = vmatpush1.xpose.msra.mxu1 %v8011_v1  ;;  %4889 = vmatprep.subr.mxu0 %v8015_v60  ;;  %v9223_v1 = vld [vmem:[#allocation52_spill] sm:$0xff]  ;;  %v9224_v60 = vld [vmem:[#allocation53_spill] sm:$0xff] }
 0x4cc   : > { %6554 = vmatmul.mubr.msk.f32.gmra.mxu1 %vm638_vm1, %v6552_v52  ;;  %4890 = vmatpush1.xpose.msra.mxu0 %v8020_v29  ;;  %v9226_v29 = vld [vmem:[#allocation55_spill] sm:$0xff]  ;;  %p7119_p1 = pnand %p7118_p10, %p7112_p6 }
 0x4cd   : > { %4818 = vmatprep.subr.mxu1 %v8024_v23  ;;  %4891 = vmatprep.subr.mxu0 %v9217_v59  ;;  %v9227_v23 = vld [vmem:[#allocation56_spill] sm:$0xff] }
 0x4cf   : > { %4819 = vmatpush1.xpose.msra.mxu1 %v9218_v62 }
 0x4d0   : > { %4892 = vmatpush1.xpose.msra.mxu0 %v9219_v34  ;;  %4820 = vmatprep.subr.mxu1 %v9220_v45 }
 0x4d1   : > { %4893 = vmatprep.subr.mxu0 %v9221_v9 }
 0x4d3   : > { %4821 = vmatpush1.xpose.msra.mxu1 %v9222_v14  ;;  %v9232_v14 = vld [vmem:[#allocation61_spill] sm:$0xff] }
 0x4d4   : > { %4894 = vmatpush1.xpose.msra.mxu0 %v9223_v1  ;;  %4822 = vmatprep.subr.mxu1 %v9224_v60  ;;  %v9233_v60 = vld [vmem:[#allocation62_spill] sm:$0xff] }
 0x4d5   : > { %4895 = vmatprep.subr.mxu0 %v9225_v63  ;;  %v9235_v63 = vld [vmem:[#allocation64_spill] sm:$0xff] }
 0x4d7   : > { %4823 = vmatpush1.xpose.msra.mxu1 %v9226_v29 }
 0x4d8   : > { %4896 = vmatpush1.xpose.msra.mxu0 %v9227_v23  ;;  %4962 = vmatprep.subr.mxu1 %v9228_v28  ;;  %v9236_v28 = vld [vmem:[#allocation65_spill] sm:$0xff] }
 0x4d9   : > { %5035 = vmatprep.subr.mxu0 %v9229_v31  ;;  %v9237_v31 = vld [vmem:[#allocation66_spill] sm:$0xff] }
 0x582   : > { %v6666_v32 = vpop.f32.mrf.mxu0  ;;  %v6677_v35 = vpop.f32.mrf.mxu1 }
 0x583   : > { %v4194_v46 = vadd.f32 %v6666_v32, %v9231_v41 }
 0x584   : > { %v4184_v47 = vpop.f32.mrf.mxu0  ;;  %v4298_v48 = vpop.f32.mrf.mxu1 }
 0x585   : > { %v4308_v50 = vadd.f32 %v6677_v35, %v4194_v46  ;;  %v4193_v51 = vadd.f32 %v4184_v47, %v2529_v40  ;;  %v9239_v40 = vld [vmem:[#allocation68_spill] sm:$0xff]  ;;  %v9240_v46 = vld [vmem:[#allocation69_spill] sm:$0xff]  ;;  %v9241_v47 = vld [vmem:[#allocation70_spill] sm:$0xff] }
 0x587   : > { %v8609_v53 = vadd.f32 %v4298_v48, %v4193_v51  ;;  %v9243_v51 = vld [vmem:[#allocation72_spill] sm:$0xff] }
 0x588   : > { %v4498_v55 = vpop.f32.mrf.mxu1 }
 0x58a   : > { %v4500_v56 = vpop.f32.mrf.mxu1  ;;  %v6688_v58 = vpop.f32.mrf.mxu0 }
 0x58b   : > { %v4513_v61 = vcombine.low %v4498_v55, %v4500_v56  ;;  %v8611_v2 = vadd.f32 %v6688_v58, %v4308_v50  ;;  %v4514_v30 = vcombine.high %v4498_v55, %v4500_v56  ;;  %v9242_v50 = vld [vmem:[#allocation71_spill] sm:$0xff]  ;;  %v9244_v55 = vld [vmem:[#allocation73_spill] sm:$0xff]  ;;  %v9245_v58 = vld [vmem:[#allocation74_spill] sm:$0xff] }
 0x58d   : > { %v4521_v3 = vrot.slane %v4513_v61, %v7565_v39  ;;  %v4528_v12 = vrot.slane %v4514_v30, %v7565_v39  ;;  %v8648_v61 = vpop.f32.mrf.mxu1  ;;  %v9248_v30 = vld [vmem:[#allocation77_spill] sm:$0xff] }
 0x58f   : > { %v4529_v6 = vcombine.high %v4521_v3, %v4521_v3  ;;  %v4537_v11 = vrot.slane %v4521_v3, %v7565_v39  ;;  %v4530_v52 = vcombine.high %v4528_v12, %v4528_v12  ;;  %v4544_v9 = vrot.slane %v4528_v12, %v7565_v39  ;;  %v9246_v3 = vld [vmem:[#allocation75_spill] sm:$0xff]  ;;  %v9252_v12 = vld [vmem:[#allocation81_spill] sm:$0xff] }
 0x591   : > { %v4551_v16 = vrot.slane %v4529_v6, %v7565_v39  ;;  %v4559_v0 = vcombine.high %v4537_v11, %v4537_v11  ;;  %v4616_v42 = vrot.slane %v4537_v11, %v7568_v43  ;;  %v4620_v15 = vrot.slane %v4537_v11, %v7570_v44  ;;  %v9247_v6 = vld [vmem:[#allocation76_spill] sm:$0xff] }
 0x592   : > { %v4648_v29 = vrot.slane %v4544_v9, %v7568_v43  ;;  %v4652_v23 = vrot.slane %v4544_v9, %v7570_v44 }
 0x593   : > { %v4624_v18 = vrot.slane %v4551_v16, %v7568_v43  ;;  %v4628_v25 = vrot.slane %v4551_v16, %v7570_v44  ;;  %v4632_v13 = vrot.slane %v4559_v0, %v7568_v43  ;;  %v4636_v22 = vrot.slane %v4559_v0, %v7570_v44  ;;  %v9249_v0 = vld [vmem:[#allocation78_spill] sm:$0xff] }
 0x594   : > { %v4741_v21 = vcombine.low %v4616_v42, %v4620_v15  ;;  %v4561_v5 = vcombine.high %v4551_v16, %v4551_v16  ;;  %v4745_v41 = vcombine.low %v4648_v29, %v4652_v23  ;;  %v4560_v16 = vcombine.high %v4544_v9, %v4544_v9  ;;  %v9250_v15 = vld [vmem:[#allocation79_spill] sm:$0xff]  ;;  %v9265_v29 = vld [vmem:[#allocation94_spill] sm:$0xff] }
 0x595   : > { %v4742_v7 = vcombine.low %v4624_v18, %v4628_v25  ;;  %v4743_v17 = vcombine.low %v4632_v13, %v4636_v22  ;;  %v8655_v18 = vpop.f32.mrf.mxu1  ;;  %v9251_v25 = vld [vmem:[#allocation80_spill] sm:$0xff] }
 0x596   : > { %v4773_v33 = vmul.f32 %v8094_v54, %v4741_v21  ;;  %v4640_v10 = vrot.slane %v4561_v5, %v7568_v43  ;;  %v4644_v37 = vrot.slane %v4561_v5, %v7570_v44  ;;  %v4558_v54 = vrot.slane %v4530_v52, %v7565_v39  ;;  %v9253_v21 = vld [vmem:[#allocation82_spill] sm:$0xff] }
 0x597   : > { %v4774_v27 = vmul.f32 %v8100_v57, %v4742_v7  ;;  %v4775_v19 = vmul.f32 %v8104_v8, %v4743_v17  ;;  %v9234_v8 = vld [vmem:[#allocation63_spill] sm:$0xff]  ;;  %v4777_v56 = vmul.f32 %v9244_v55, %v4745_v41  ;;  %v4664_v5 = vrot.slane %v4560_v16, %v7568_v43  ;;  %v9257_v52 = vld [vmem:[#allocation86_spill] sm:$0xff] }
 0x598   : > { %v4790_v59 = vcombine.high %v4773_v33, %v4773_v33  ;;  %v4744_v62 = vcombine.low %v4640_v10, %v4644_v37  ;;  %v4656_v32 = vrot.slane %v4558_v54, %v7568_v43  ;;  %v4660_v35 = vrot.slane %v4558_v54, %v7570_v44  ;;  %v9255_v10 = vld [vmem:[#allocation84_spill] sm:$0xff]  ;;  %v9269_v41 = vld [vmem:[#allocation98_spill] sm:$0xff] }
 0x599   : > { %v4863_v34 = vcombine.high %v4774_v27, %v4774_v27  ;;  %v4936_v45 = vcombine.high %v4775_v19, %v4775_v19  ;;  %v5082_v42 = vcombine.high %v4777_v56, %v4777_v56  ;;  %v4562_v22 = vcombine.high %v4558_v54, %v4558_v54  ;;  %v9262_v54 = vld [vmem:[#allocation91_spill] sm:$0xff] }
 0x59a   : > { %4856 = vmatprep.mubr.f32.mxu1 %v4790_v59  ;;  %v4776_v1 = vmul.f32 %v9232_v14, %v4744_v62  ;;  %v4746_v48 = vcombine.low %v4656_v32, %v4660_v35  ;;  %v4668_v7 = vrot.slane %v4560_v16, %v7570_v44  ;;  %v4563_v17 = vcombine.low %v8648_v61, %v8655_v18  ;;  %v9260_v14 = vld [vmem:[#allocation89_spill] sm:$0xff]  ;;  %v9267_v32 = vld [vmem:[#allocation96_spill] sm:$0xff] }
 0x59b   : > { %4857 = vmatmul.mubr.f32.vlgmr.msra.gmra.mxu1 %v4773_v33  ;;  %4929 = vmatprep.mubr.f32.mxu0 %v4863_v34  ;;  %v9254_v33 = vld [vmem:[#allocation83_spill] sm:$0xff]  ;;  %v4672_v37 = vrot.slane %v4562_v22, %v7568_v43  ;;  %v9275_v16 = vld [vmem:[#allocation104_spill] sm:$0xff] }
 0x59c   : > { %4963 = vmatpush1.xpose.msra.mxu1 %v9233_v60  ;;  %5002 = vmatprep.mubr.f32.mxu1 %v4936_v45  ;;  %v5009_v57 = vcombine.high %v4776_v1, %v4776_v1  ;;  %v4778_v11 = vmul.f32 %v9247_v6, %v4746_v48  ;;  %v4747_v59 = vcombine.low %v4664_v5, %v4668_v7  ;;  %v9258_v34 = vld [vmem:[#allocation87_spill] sm:$0xff]  ;;  %v9259_v45 = vld [vmem:[#allocation88_spill] sm:$0xff]  ;;  %v9273_v6 = vld [vmem:[#allocation102_spill] sm:$0xff] }
 0x59d   : > { %4930 = vmatmul.mubr.f32.vlgmr.msra.gmra.mxu0 %v4774_v27  ;;  %4964 = vmatprep.subr.mxu1 %v9234_v8  ;;  %v4676_v27 = vrot.slane %v4562_v22, %v7570_v44  ;;  %v4571_v62 = vrot.slane %v4563_v17, %v7565_v39  ;;  %v9263_v8 = vld [vmem:[#allocation92_spill] sm:$0xff] }
 0x59e   : > { %5036 = vmatpush1.xpose.msra.mxu0 %v9235_v63  ;;  %5075 = vmatprep.mubr.f32.mxu0 %v5009_v57  ;;  %v5155_v13 = vcombine.high %v4778_v11, %v4778_v11  ;;  %v4779_v60 = vmul.f32 %v9262_v54, %v4747_v59  ;;  %v9264_v63 = vld [vmem:[#allocation93_spill] sm:$0xff]  ;;  %v9283_v7 = vld [vmem:[#allocation112_spill] sm:$0xff]  ;;  %v9290_v54 = vld [vmem:[#allocation119_spill] sm:$0xff] }
 0x59f   : > { %5037 = vmatprep.subr.mxu0 %v9236_v28  ;;  %v4748_v9 = vcombine.low %v4672_v37, %v4676_v27  ;;  %v4579_v57 = vcombine.high %v4571_v62, %v4571_v62  ;;  %v4587_v28 = vrot.slane %v4571_v62, %v7565_v39  ;;  %v9285_v37 = vld [vmem:[#allocation114_spill] sm:$0xff]  ;;  %v9287_v59 = vld [vmem:[#allocation116_spill] sm:$0xff] }
 0x5a0   : > { %4965 = vmatpush1.xpose.msra.mxu1 %v9237_v31  ;;  %v9266_v31 = vld [vmem:[#allocation95_spill] sm:$0xff]  ;;  %v5228_v35 = vcombine.high %v4779_v60, %v4779_v60 }
 0x5a1   : > { %4966 = vmatprep.subr.mxu1 %v9238_v36  ;;  %v4780_v23 = vmul.f32 %v9265_v29, %v4748_v9  ;;  %v4601_v36 = vrot.slane %v4579_v57, %v7565_v39  ;;  %v4684_v48 = vrot.slane %v4587_v28, %v7570_v44  ;;  %v4564_v9 = vcombine.high %v8648_v61, %v8655_v18  ;;  %v9291_v57 = vld [vmem:[#allocation120_spill] sm:$0xff]  ;;  %v9293_v29 = vld [vmem:[#allocation122_spill] sm:$0xff]  ;;  %v9296_v61 = vld [vmem:[#allocation125_spill] sm:$0xff] }
 0x5a2   : > { %5038 = vmatpush1.xpose.msra.mxu0 %v9239_v40  ;;  %v9268_v40 = vld [vmem:[#allocation97_spill] sm:$0xff]  ;;  %v9297_v18 = vld [vmem:[#allocation126_spill] sm:$0xff] }
 0x5a3   : > { %5039 = vmatprep.subr.mxu0 %v9240_v46  ;;  %v5301_v46 = vcombine.high %v4780_v23, %v4780_v23  ;;  %v4688_v55 = vrot.slane %v4601_v36, %v7568_v43 }
 0x5a4   : > { %4967 = vmatpush1.xpose.msra.mxu1 %v9241_v47  ;;  %v4680_v47 = vrot.slane %v4587_v28, %v7568_v43 }
 0x5a5   : > { %4968 = vmatprep.subr.mxu1 %v9242_v50  ;;  %v9270_v50 = vld [vmem:[#allocation99_spill] sm:$0xff] }
 0x5a6   : > { %5040 = vmatpush1.xpose.msra.mxu0 %v9243_v51  ;;  %v9271_v51 = vld [vmem:[#allocation100_spill] sm:$0xff] }
 0x5a7   : > { %5041 = vmatprep.subr.mxu0 %v9245_v58  ;;  %v9272_v58 = vld [vmem:[#allocation101_spill] sm:$0xff] }
 0x5a8   : > { %4969 = vmatpush1.xpose.msra.mxu1 %v9246_v3  ;;  %v4749_v3 = vcombine.low %v4680_v47, %v4684_v48  ;;  %v9299_v47 = vld [vmem:[#allocation128_spill] sm:$0xff]  ;;  %v6957_v48 = vld [vmem:[%s7507_s18 + $0x2f0] sm:$0xff] }
 0x5a9   : > { %5108 = vmatprep.subr.mxu1 %v9248_v30 }
 0x5aa   : > { %5042 = vmatpush1.xpose.msra.mxu0 %v9249_v0  ;;  %v9276_v0 = vld [vmem:[#allocation105_spill] sm:$0xff] }
 0x5ab   : > { %5003 = vmatmul.mubr.f32.vlgmr.msra.gmra.mxu1 %v4775_v19  ;;  %5181 = vmatprep.subr.mxu0 %v9250_v15  ;;  %v9256_v19 = vld [vmem:[#allocation85_spill] sm:$0xff]  ;;  %v9277_v15 = vld [vmem:[#allocation106_spill] sm:$0xff] }
 0x5ac   : > { %5109 = vmatpush1.xpose.msra.mxu1 %v9251_v25  ;;  %5148 = vmatprep.mubr.f32.mxu1 %v5082_v42  ;;  %v4781_v42 = vmul.f32 %v9276_v0, %v4749_v3  ;;  %v9278_v25 = vld [vmem:[#allocation107_spill] sm:$0xff] }
 0x5ad   : > { %5076 = vmatmul.mubr.f32.vlgmr.msra.gmra.mxu0 %v4776_v1  ;;  %5110 = vmatprep.subr.mxu1 %v9252_v12  ;;  %v9261_v1 = vld [vmem:[#allocation90_spill] sm:$0xff]  ;;  %v9280_v12 = vld [vmem:[#allocation109_spill] sm:$0xff]  ;;  %v6965_v0 = vld [vmem:[%s7507_s18 + $0x2d0] sm:$0xff] }
 0x5ae   : > { %5182 = vmatpush1.xpose.msra.mxu0 %v9253_v21  ;;  %5221 = vmatprep.mubr.f32.mxu0 %v5155_v13  ;;  %v9279_v13 = vld [vmem:[#allocation108_spill] sm:$0xff]  ;;  %v4609_v21 = vcombine.high %v4587_v28, %v4587_v28  ;;  %v5374_v5 = vcombine.high %v4781_v42, %v4781_v42  ;;  %v9294_v28 = vld [vmem:[#allocation123_spill] sm:$0xff] }
 0x5af   : > { %5183 = vmatprep.subr.mxu0 %v9254_v33  ;;  %v4611_v33 = vcombine.high %v4601_v36, %v4601_v36 }
 0x5b0   : > { %5111 = vmatpush1.xpose.msra.mxu1 %v9255_v10  ;;  %v9284_v10 = vld [vmem:[#allocation113_spill] sm:$0xff]  ;;  %v4696_v27 = vrot.slane %v4609_v21, %v7568_v43 }
 0x5b1   : > { %5112 = vmatprep.subr.mxu1 %v9256_v19  ;;  %v4700_v19 = vrot.slane %v4609_v21, %v7570_v44  ;;  %v4704_v62 = vrot.slane %v4611_v33, %v7568_v43 }
 0x5b2   : > { %5184 = vmatpush1.xpose.msra.mxu0 %v9257_v52  ;;  %v9286_v52 = vld [vmem:[#allocation115_spill] sm:$0xff] }
 0x5b3   : > { %5185 = vmatprep.subr.mxu0 %v9258_v34  ;;  %v4708_v34 = vrot.slane %v4611_v33, %v7570_v44 }
 0x5b4   : > { %5113 = vmatpush1.xpose.msra.mxu1 %v9259_v45  ;;  %v9288_v45 = vld [vmem:[#allocation117_spill] sm:$0xff] }
 0x5b5   : > { %5114 = vmatprep.subr.mxu1 %v9260_v14  ;;  %v4751_v14 = vcombine.low %v4696_v27, %v4700_v19  ;;  %v6975_v27 = vld [vmem:[%s7507_s18 + $0x370] sm:$0xff] }
 0x5b6   : > { %5186 = vmatpush1.xpose.msra.mxu0 %v9261_v1  ;;  %v9289_v1 = vld [vmem:[#allocation118_spill] sm:$0xff] }
 0x5b7   : > { %5187 = vmatprep.subr.mxu0 %v9263_v8  ;;  %v4578_v8 = vrot.slane %v4564_v9, %v7565_v39  ;;  %v6978_v9 = vld [vmem:[%s7507_s18 + $0x318] sm:$0xff] }
 0x5b8   : > { %5115 = vmatpush1.xpose.msra.mxu1 %v9264_v63  ;;  %v9292_v63 = vld [vmem:[#allocation121_spill] sm:$0xff] }
 0x5b9   : > { %5254 = vmatprep.subr.mxu1 %v9266_v31  ;;  %v9295_v31 = vld [vmem:[#allocation124_spill] sm:$0xff] }
 0x5ba   : > { %5188 = vmatpush1.xpose.msra.mxu0 %v9267_v32  ;;  %v4580_v32 = vcombine.high %v4578_v8, %v4578_v8 }
 0x5bb   : > { %5149 = vmatmul.mubr.f32.vlgmr.msra.gmra.mxu1 %v4777_v56  ;;  %5327 = vmatprep.subr.mxu0 %v9268_v40  ;;  %v4692_v56 = vrot.slane %v4601_v36, %v7570_v44  ;;  %v4594_v40 = vrot.slane %v4578_v8, %v7565_v39  ;;  %v6982_v8 = vld [vmem:[%s7507_s18 + $0x308] sm:$0xff] }
 0x5bc   : > { %5255 = vmatpush1.xpose.msra.mxu1 %v9269_v41  ;;  %5294 = vmatprep.mubr.f32.mxu1 %v5228_v35  ;;  %v9298_v35 = vld [vmem:[#allocation127_spill] sm:$0xff] }
 0x5bd   : > { %5222 = vmatmul.mubr.f32.vlgmr.msra.gmra.mxu0 %v4778_v11  ;;  %5256 = vmatprep.subr.mxu1 %v9270_v50  ;;  %v4750_v30 = vcombine.low %v4688_v55, %v4692_v56  ;;  %v9274_v11 = vld [vmem:[#allocation103_spill] sm:$0xff]  ;;  %v4716_v50 = vrot.slane %v4594_v40, %v7570_v44  ;;  %v6960_v56 = vld [vmem:[%s7507_s18 + $0x298] sm:$0xff]  ;;  %v4610_v21 = vcombine.high %v4594_v40, %v4594_v40 }
 0x5be   : > { %5328 = vmatpush1.xpose.msra.mxu0 %v9271_v51  ;;  %5367 = vmatprep.mubr.f32.mxu0 %v5301_v46  ;;  %v4608_v46 = vrot.slane %v4580_v32, %v7565_v39  ;;  %v6959_v39 = vld [vmem:[%s7507_s18 + $0x2a0] sm:$0xff]  ;;  %v6990_v32 = vld [vmem:[%s7507_s18 + $0x3f8] sm:$0xff] }
 0x5bf   : > { %5329 = vmatprep.subr.mxu0 %v9272_v58  ;;  %v4782_v22 = vmul.f32 %v9279_v13, %v4750_v30  ;;  %v6961_v58 = vld [vmem:[%s7507_s18 + $0x2e0] sm:$0xff]  ;;  %v6963_v30 = vld [vmem:[%s7507_s18 + $0x290] sm:$0xff]  ;;  %v4728_v19 = vrot.slane %v4610_v21, %v7568_v43 }
 0x5c0   : > { %5257 = vmatpush1.xpose.msra.mxu1 %v8313_v26  ;;  %v9281_v26 = vld [vmem:[#allocation110_spill] sm:$0xff]  ;;  %v4720_v51 = vrot.slane %v4608_v46, %v7568_v43  ;;  %v4724_v55 = vrot.slane %v4608_v46, %v7570_v44  ;;  %v6968_v13 = vld [vmem:[%s7507_s18 + $0x280] sm:$0xff] }
 0x5c1   : > { %5258 = vmatprep.subr.mxu1 %v9273_v6  ;;  %v5447_v17 = vcombine.high %v4782_v22, %v4782_v22  ;;  %v6962_v6 = vld [vmem:[%s7507_s18 + $0x2d8] sm:$0xff] }
 0x5c2   : > { %5330 = vmatpush1.xpose.msra.mxu0 %v8321_v24  ;;  %v9282_v24 = vld [vmem:[#allocation111_spill] sm:$0xff] }
 0x5c3   : > { %5331 = vmatprep.subr.mxu0 %v9274_v11  ;;  %v4754_v11 = vcombine.low %v4720_v51, %v4724_v55  ;;  %v7002_v51 = vld [vmem:[%s7507_s18 + $0x3c8] sm:$0xff]  ;;  %v7003_v55 = vld [vmem:[%s7507_s18 + $0x380] sm:$0xff] }
 0x5c4   : > { %5259 = vmatpush1.xpose.msra.mxu1 %v9275_v16  ;;  %v6964_v16 = vld [vmem:[%s7507_s18 + $0x288] sm:$0xff] }
 0x5c5   : > { %5260 = vmatprep.subr.mxu1 %v9277_v15 }
 0x5c6   : > { %5332 = vmatpush1.xpose.msra.mxu0 %v9278_v25  ;;  %v6967_v25 = vld [vmem:[%s7507_s18 + $0x2c8] sm:$0xff] }
 0x5c7   : > { %5333 = vmatprep.subr.mxu0 %v9280_v12 }
 0x5c8   : > { %5261 = vmatpush1.xpose.msra.mxu1 %v9281_v26  ;;  %v6970_v26 = vld [vmem:[%s7507_s18 + $0x338] sm:$0xff] }
 0x5c9   : > { %5400 = vmatprep.subr.mxu1 %v9282_v24 }
 0x5ca   : > { %5334 = vmatpush1.xpose.msra.mxu0 %v9283_v7  ;;  %v6972_v7 = vld [vmem:[%s7507_s18 + $0x378] sm:$0xff] }
 0x5cb   : > { %5295 = vmatmul.mubr.f32.vlgmr.msra.gmra.mxu1 %v4779_v60  ;;  %5473 = vmatprep.subr.mxu0 %v9284_v10  ;;  %v4752_v60 = vcombine.low %v4704_v62, %v4708_v34  ;;  %v4612_v10 = vcombine.high %v4608_v46, %v4608_v46  ;;  %v6977_v62 = vld [vmem:[%s7507_s18 + $0x320] sm:$0xff]  ;;  %v6994_v46 = vld [vmem:[%s7507_s18 + $0x3e8] sm:$0xff] }
 0x5cc   : > { %5401 = vmatpush1.xpose.msra.mxu1 %v9285_v37  ;;  %5440 = vmatprep.mubr.f32.mxu1 %v5374_v5  ;;  %v6971_v5 = vld [vmem:[%s7507_s18 + $0x2c0] sm:$0xff]  ;;  %v6974_v37 = vld [vmem:[%s7507_s18 + $0x328] sm:$0xff] }
 0x5cd   : > { %5368 = vmatmul.mubr.f32.vlgmr.msra.gmra.mxu0 %v4780_v23  ;;  %5402 = vmatprep.subr.mxu1 %v9286_v52  ;;  %v4783_v23 = vmul.f32 %v9293_v29, %v4751_v14  ;;  %v4732_v52 = vrot.slane %v4610_v21, %v7570_v44  ;;  %v4736_v34 = vrot.slane %v4612_v10, %v7568_v43  ;;  %v6979_v14 = vld [vmem:[%s7507_s18 + $0x360] sm:$0xff]  ;;  %v6985_v29 = vld [vmem:[%s7507_s18 + $0x348] sm:$0xff] }
 0x5ce   : > { %5474 = vmatpush1.xpose.msra.mxu0 %v9287_v59  ;;  %5513 = vmatprep.mubr.f32.mxu0 %v5447_v17  ;;  %v6973_v17 = vld [vmem:[%s7507_s18 + $0x330] sm:$0xff]  ;;  %v6976_v59 = vld [vmem:[%s7507_s18 + $0x368] sm:$0xff] }
 0x5cf   : > { %5475 = vmatprep.subr.mxu0 %v9288_v45  ;;  %v5520_v36 = vcombine.high %v4783_v23, %v4783_v23  ;;  %v4740_v45 = vrot.slane %v4612_v10, %v7570_v44  ;;  %v6984_v44 = vld [vmem:[%s7529_s2 + $0x70] sm:$0x77] }
 0x5d0   : > { %5403 = vmatpush1.xpose.msra.mxu1 %v8401_v4  ;;  %v8726_v4 = vmul.f32 %v9296_v61, %v4752_v60  ;;  %v6981_v60 = vld [vmem:[%s7507_s18 + $0x310] sm:$0xff]  ;;  %v6988_v61 = vld [vmem:[%s7507_s18 + $0x3b8] sm:$0xff] }
 0x5d1   : > { %5404 = vmatprep.subr.mxu1 %v9289_v1  ;;  %v4755_v1 = vcombine.low %v4728_v19, %v4732_v52 }
 0x5d2   : > { %5476 = vmatpush1.xpose.msra.mxu0 %v9290_v54  ;;  %v5593_v41 = vcombine.high %v8726_v4, %v8726_v4  ;;  %v6980_v54 = vld [vmem:[%s7507_s18 + $0x358] sm:$0xff] }
 0x5d3   : > { %5477 = vmatprep.subr.mxu0 %v9291_v57  ;;  %v4756_v57 = vcombine.low %v4736_v34, %v4740_v45 }
 0x5d4   : > { %5405 = vmatpush1.xpose.msra.mxu1 %v9292_v63  ;;  %v4787_v63 = vmul.f32 %v6984_v44, %v4755_v1 }
 0x5d5   : > { %5406 = vmatprep.subr.mxu1 %v9294_v28  ;;  %v6987_v28 = vld [vmem:[%s7529_s2 + $0x78] sm:$0x77] }
 0x5d6   : > { %5478 = vmatpush1.xpose.msra.mxu0 %v9295_v31  ;;  %v4788_v31 = vmul.f32 %v6987_v28, %v4756_v57 }
 0x5d7   : > { %5479 = vmatprep.subr.mxu0 %v9297_v18  ;;  %v5812_v18 = vcombine.high %v4787_v63, %v4787_v63 }
 0x5d8   : > { %5407 = vmatpush1.xpose.msra.mxu1 %v9298_v35  ;;  %v6991_v35 = vld [vmem:[%s7507_s18 + $0x3b0] sm:$0xff] }
 0x5d9   : > { %5546 = vmatprep.subr.mxu1 %v8446_v20  ;;  %v6956_v20 = vld [vmem:[%s7507_s18 + $0x2a8] sm:$0xff] }
 0x5da   : > { %5480 = vmatpush1.xpose.msra.mxu0 %v8451_v38  ;;  %v4712_v38 = vrot.slane %v4594_v40, %v7568_v43  ;;  %v6983_v43 = vld [vmem:[%s7507_s18 + $0x350] sm:$0xff]  ;;  %v6992_v40 = vld [vmem:[%s7507_s18 + $0x3a8] sm:$0xff] }
 0x5db   : > { %5441 = vmatmul.mubr.f32.vlgmr.msra.gmra.mxu1 %v4781_v42  ;;  %5619 = vmatprep.subr.mxu0 %v8456_v49  ;;  %v6958_v49 = vld [vmem:[%s7507_s18 + $0x2e8] sm:$0xff]  ;;  %v6966_v42 = vld [vmem:[%s7529_s2 + $0x60] sm:$0x77] }
 0x5dc   : > { %5547 = vmatpush1.xpose.msra.mxu1 %v9299_v47  ;;  %5586 = vmatprep.mubr.f32.mxu1 %v5520_v36  ;;  %v4753_v3 = vcombine.low %v4712_v38, %v4716_v50  ;;  %v5885_v36 = vcombine.high %v4788_v31, %v4788_v31  ;;  %v6995_v47 = vld [vmem:[%s7507_s18 + $0x3a0] sm:$0xff]  ;;  %v6998_v38 = vld [vmem:[%s7507_s18 + $0x3d8] sm:$0xff]  ;;  %v6999_v50 = vld [vmem:[%s7507_s18 + $0x390] sm:$0xff] }
 0x5dd   : > { %5514 = vmatmul.mubr.f32.vlgmr.msra.gmra.mxu0 %v4782_v22  ;;  %5548 = vmatprep.subr.mxu1 %v6956_v20  ;;  %v6969_v22 = vld [vmem:[%s7529_s2 + $0x68] sm:$0x77]  ;;  %v6996_v20 = vld [vmem:[%s7507_s18 + $0x398] sm:$0xff] }
 0x5de   : > { %5620 = vmatpush1.xpose.msra.mxu0 %v6957_v48  ;;  %5659 = vmatprep.mubr.f32.mxu0 %v5593_v41  ;;  %v4785_v15 = vmul.f32 %v6966_v42, %v4753_v3  ;;  %v8756_v12 = vmul.f32 %v6969_v22, %v4754_v11  ;;  %v6993_v41 = vld [vmem:[%s7507_s18 + $0x3f0] sm:$0xff]  ;;  %v6997_v48 = vld [vmem:[%s7507_s18 + $0x3e0] sm:$0xff]  ;;  %v6091_v3 = vld [vmem:[#allocation9 + $0xb8] sm:$0xff] }
 0x5df   : > { %5621 = vmatprep.subr.mxu0 %v6958_v49  ;;  %v7000_v49 = vld [vmem:[%s7507_s18 + $0x388] sm:$0xff]  ;;  %v6088_v42 = vld [vmem:[#allocation9 + $0xa0] sm:$0xff] }
 0x5e0   : > { %5549 = vmatpush1.xpose.msra.mxu1 %v6959_v39  ;;  %v5666_v24 = vcombine.high %v4785_v15, %v4785_v15  ;;  %v5739_v33 = vcombine.high %v8756_v12, %v8756_v12  ;;  %v7001_v39 = vld [vmem:[%s7507_s18 + $0x3d0] sm:$0xff]  ;;  %v5959_v11 = vld [vmem:[#allocation9 + $0x48] sm:$0xff] }
 0x5e1   : > { %5550 = vmatprep.subr.mxu1 %v6960_v56  ;;  %v7004_v56 = vld [vmem:[%s7507_s18 + $0x3c0] sm:$0xff] }
 0x5e2   : > { %5622 = vmatpush1.xpose.msra.mxu0 %v6961_v58  ;;  %v5961_v58 = vld [vmem:[#allocation9 + $0x58] sm:$0xff] }
 0x5e3   : > { %5623 = vmatprep.subr.mxu0 %v6962_v6  ;;  %v5960_v6 = vld [vmem:[#allocation9 + $0x50] sm:$0xff] }
 0x5e4   : > { %5551 = vmatpush1.xpose.msra.mxu1 %v6963_v30  ;;  %v6090_v30 = vld [vmem:[#allocation9 + $0xb0] sm:$0xff] }
 0x5e5   : > { %5552 = vmatprep.subr.mxu1 %v6964_v16  ;;  %v6089_v16 = vld [vmem:[#allocation9 + $0xa8] sm:$0xff] }
 0x5e6   : > { %5624 = vmatpush1.xpose.msra.mxu0 %v6965_v0  ;;  %v5958_v0 = vld [vmem:[#allocation9 + $0x40] sm:$0xff] }
 0x5e7   : > { %5625 = vmatprep.subr.mxu0 %v6967_v25  ;;  %v8804_v25 = vpop.f32.mrf.mxu0 }
 0x5e8   : > { %5553 = vmatpush1.xpose.msra.mxu1 %v6968_v13 }
 0x5e9   : > { %5692 = vmatprep.subr.mxu1 %v6970_v26 }
 0x5ea   : > { %5626 = vmatpush1.xpose.msra.mxu0 %v6971_v5 }
 0x5eb   : > { %5587 = vmatmul.mubr.f32.vlgmr.msra.gmra.mxu1 %v4783_v23  ;;  %5765 = vmatprep.subr.mxu0 %v6972_v7  ;;  %v6986_v23 = vld [vmem:[%s7507_s18 + $0x300] sm:$0xff] }
 0x5ec   : > { %5693 = vmatpush1.xpose.msra.mxu1 %v6973_v17  ;;  %5732 = vmatprep.mubr.f32.mxu1 %v5666_v24 }
 0x5ed   : > { %5660 = vmatmul.mubr.f32.vlgmr.msra.gmra.mxu0 %v8726_v4  ;;  %5694 = vmatprep.subr.mxu1 %v6974_v37  ;;  %v6989_v4 = vld [vmem:[%s7507_s18 + $0x340] sm:$0xff]  ;;  %s8865_s18 = scalar_lea.hbm %s9302_s13, %s6568_s15 }
 0x5ee   : > { %5766 = vmatpush1.xpose.msra.mxu0 %v6975_v27  ;;  %5805 = vmatprep.mubr.f32.mxu0 %v5739_v33 }
 0x5ef   : > { %5767 = vmatprep.subr.mxu0 %v6976_v59 }
 0x5f0   : > { %5695 = vmatpush1.xpose.msra.mxu1 %v6977_v62 }
 0x5f1   : > { %5696 = vmatprep.subr.mxu1 %v6978_v9 }
 0x5f2   : > { %5768 = vmatpush1.xpose.msra.mxu0 %v6979_v14 }
 0x5f3   : > { %5769 = vmatprep.subr.mxu0 %v6980_v54 }
 0x5f4   : > { %5697 = vmatpush1.xpose.msra.mxu1 %v6981_v60 }
 0x5f5   : > { %5698 = vmatprep.subr.mxu1 %v6982_v8 }
 0x5f6   : > { %5770 = vmatpush1.xpose.msra.mxu0 %v6983_v43 }
 0x5f7   : > { %5771 = vmatprep.subr.mxu0 %v6985_v29 }
 0x5f8   : > { %5699 = vmatpush1.xpose.msra.mxu1 %v6986_v23 }
 0x5f9   : > { %5838 = vmatprep.subr.mxu1 %v6988_v61 }
 0x5fa   : > { %5772 = vmatpush1.xpose.msra.mxu0 %v6989_v4 }
 0x5fb   : > { %5733 = vmatmul.mubr.f32.vlgmr.msra.gmra.mxu1 %v4785_v15  ;;  %5911 = vmatprep.subr.mxu0 %v6990_v32  ;;  %v8801_v15 = vld [vmem:[#allocation9 + $0x118] sm:$0xff] }
 0x5fc   : > { %5839 = vmatpush1.xpose.msra.mxu1 %v6991_v35  ;;  %5878 = vmatprep.mubr.f32.mxu1 %v5812_v18 }
 0x5fd   : > { %5806 = vmatmul.mubr.f32.vlgmr.msra.gmra.mxu0 %v8756_v12  ;;  %5840 = vmatprep.subr.mxu1 %v6992_v40 }
 0x5fe   : > { %5912 = vmatpush1.xpose.msra.mxu0 %v6993_v41  ;;  %5951 = vmatprep.mubr.f32.mxu0 %v5885_v36 }
 0x5ff   : > { %5913 = vmatprep.subr.mxu0 %v6994_v46 }
 0x600   : > { %5841 = vmatpush1.xpose.msra.mxu1 %v6995_v47 }
 0x601   : > { %5842 = vmatprep.subr.mxu1 %v6996_v20 }
 0x602   : > { %5914 = vmatpush1.xpose.msra.mxu0 %v6997_v48 }
 0x603   : > { %5915 = vmatprep.subr.mxu0 %v6998_v38 }
 0x604   : > { %5843 = vmatpush1.xpose.msra.mxu1 %v6999_v50 }
 0x605   : > { %5844 = vmatprep.subr.mxu1 %v7000_v49 }
 0x606   : > { %5916 = vmatpush1.xpose.msra.mxu0 %v7001_v39 }
 0x607   : > { %5917 = vmatprep.subr.mxu0 %v7002_v51 }
 0x608   : > { %5845 = vmatpush1.xpose.msra.mxu1 %v7003_v55 }
 0x609   : > { %6689 = vmatprep.subr.mxu1 %v5961_v58 }
 0x60a   : > { %5918 = vmatpush1.xpose.msra.mxu0 %v7004_v56 }
 0x60b   : > { %5879 = vmatmul.mubr.f32.vlgmr.msra.gmra.mxu1 %v4787_v63  ;;  %6700 = vmatprep.subr.mxu0 %v6091_v3 }
 0x60c   : > { %6690 = vmatpush3.msra.mxu1 %v5961_v58 }
 0x60d   : > { %5952 = vmatmul.mubr.f32.vlgmr.msra.gmra.mxu0 %v4788_v31  ;;  %6691 = vmatprep.subr.mxu1 %v5960_v6 }
 0x60e   : > { %6701 = vmatpush3.msra.mxu0 %v6091_v3  ;;  %6692 = vmatpush3.msra.mxu1 %v5960_v6 }
 0x60f   : > { %6702 = vmatprep.subr.mxu0 %v6090_v30  ;;  %6693 = vmatprep.subr.mxu1 %v5959_v11 }
 0x610   : > { %6703 = vmatpush3.msra.mxu0 %v6090_v30  ;;  %6694 = vmatpush3.msra.mxu1 %v5959_v11 }
 0x611   : > { %6704 = vmatprep.subr.mxu0 %v6089_v16  ;;  %6695 = vmatprep.subr.mxu1 %v5958_v0 }
 0x612   : > { %6705 = vmatpush3.msra.mxu0 %v6089_v16  ;;  %6696 = vmatpush3.msra.mxu1 %v5958_v0 }
 0x613   : > { %6706 = vmatprep.subr.mxu0 %v6088_v42  ;;  %6711 = vmatprep.subr.mxu1 %v8801_v15 }
 0x614   : > { %6707 = vmatpush3.msra.mxu0 %v6088_v42 }
 0x65b   : > { %v4858_v13 = vpop.f32.mrf.mxu1 }
 0x65c   : > { %v6206_v26 = vrot.slane %v4858_v13, 2  ;;  %v6092_v1 = vrot.slane %v4858_v13, 1 }
 0x65d   : > { %v4860_v22 = vpop.f32.mrf.mxu1  ;;  %v4931_v12 = vpop.f32.mrf.mxu0 }
 0x65e   : > { %v6207_v21 = vrot.slane %v4931_v12, 1  ;;  %v5978_v54 = vrot.slane %v4931_v12, 7  ;;  %v6093_v44 = vsel %vm2196_vm2, %v4931_v12, %v6092_v1 }
 0x65f   : > { %v4933_v5 = vpop.f32.mrf.mxu0 }
 0x660   : > { %v6208_v24 = vsel %vm2196_vm2, %v6207_v21, %v6206_v26  ;;  %v5979_v43 = vsel %vm2196_vm2, %v5978_v54, %v4858_v13 }
 0x66b   : > { %v5004_v7 = vpop.f32.mrf.mxu1 }
 0x66c   : > { %v6209_v17 = vsel %vm2199_vm3, %v5004_v7, %v6208_v24  ;;  %v5980_v57 = vrot.slane %v5004_v7, 6  ;;  %v6094_v8 = vrot.slane %v5004_v7, 7 }
 0x66d   : > { %v5006_v33 = vpop.f32.mrf.mxu1  ;;  %v5077_v10 = vpop.f32.mrf.mxu0 }
 0x66e   : > { %v6210_v37 = vrot.slane %v5077_v10, 7  ;;  %v5982_v63 = vrot.slane %v5077_v10, 5  ;;  %v6096_v29 = vrot.slane %v5077_v10, 6  ;;  %v5981_v23 = vsel %vm2199_vm3, %v5980_v57, %v5979_v43 }
 0x66f   : > { %v5079_v27 = vpop.f32.mrf.mxu0  ;;  %v6095_v28 = vsel %vm2199_vm3, %v6094_v8, %v6093_v44 }
 0x670   : > { %v6211_v19 = vsel %vm2202_vm4, %v6210_v37, %v6209_v17  ;;  %v5983_v4 = vsel %vm2202_vm4, %v5982_v63, %v5981_v23  ;;  %v6097_v18 = vsel %vm2202_vm4, %v6096_v29, %v6095_v28 }
 0x67b   : > { %v5150_v52 = vpop.f32.mrf.mxu1 }
 0x67c   : > { %v6212_v59 = vrot.slane %v5150_v52, 6  ;;  %v5984_v31 = vrot.slane %v5150_v52, 4  ;;  %v6098_v61 = vrot.slane %v5150_v52, 5 }
 0x67d   : > { %v5152_v62 = vpop.f32.mrf.mxu1  ;;  %v5223_v34 = vpop.f32.mrf.mxu0 }
 0x67e   : > { %v6213_v45 = vsel %vm2205_vm5, %v6212_v59, %v6211_v19  ;;  %v6214_v9 = vrot.slane %v5223_v34, 5  ;;  %v5986_v32 = vrot.slane %v5223_v34, 3  ;;  %v6100_v35 = vrot.slane %v5223_v34, 4 }
 0x67f   : > { %v5225_v14 = vpop.f32.mrf.mxu0  ;;  %v5985_v36 = vsel %vm2205_vm5, %v5984_v31, %v5983_v4  ;;  %v6099_v40 = vsel %vm2205_vm5, %v6098_v61, %v6097_v18 }
 0x680   : > { %v6215_v60 = vsel %vm2208_vm6, %v6214_v9, %v6213_v45  ;;  %v5987_v50 = vsel %vm2208_vm6, %v5986_v32, %v5985_v36  ;;  %v6101_v49 = vsel %vm2208_vm6, %v6100_v35, %v6099_v40 }
 0x68b   : > { %v5296_v41 = vpop.f32.mrf.mxu1 }
 0x68c   : > { %v5988_v46 = vrot.slane %v5296_v41, 2  ;;  %v6102_v47 = vrot.slane %v5296_v41, 3  ;;  %v6216_v20 = vrot.slane %v5296_v41, 4 }
 0x68d   : > { %v5298_v48 = vpop.f32.mrf.mxu1  ;;  %v5369_v38 = vpop.f32.mrf.mxu0 }
 0x68e   : > { %v5990_v39 = vrot.slane %v5369_v38, 1  ;;  %v6104_v51 = vrot.slane %v5369_v38, 2  ;;  %v6218_v55 = vrot.slane %v5369_v38, 3  ;;  %v5989_v56 = vsel %vm2211_vm7, %v5988_v46, %v5987_v50 }
 0x68f   : > { %v5371_v58 = vpop.f32.mrf.mxu0  ;;  %v6103_v3 = vsel %vm2211_vm7, %v6102_v47, %v6101_v49  ;;  %v6217_v6 = vsel %vm2211_vm7, %v6216_v20, %v6215_v60 }
 0x690   : > { %v5991_v30 = vsel %vm2214_vm8, %v5990_v39, %v5989_v56  ;;  %v6105_v11 = vsel %vm2214_vm8, %v6104_v51, %v6103_v3  ;;  %v6219_v16 = vsel %vm2214_vm8, %v6218_v55, %v6217_v6  ;;  %v6204_v55 = vld [vmem:[#allocation9 + $0x110] sm:$0xff]  ;;  %v6203_v3 = vld [vmem:[#allocation9 + $0x108] sm:$0xff] }
 0x691   : > { %6697 = vmatprep.mubr.msk.f32.mxu1 %vm2230_vm9, %v5991_v30  ;;  %6708 = vmatprep.mubr.msk.f32.mxu0 %vm2230_vm9, %v6105_v11  ;;  %v6202_v11 = vld [vmem:[#allocation9 + $0x100] sm:$0xff] }
 0x69b   : > { %v5442_v0 = vpop.f32.mrf.mxu1 }
 0x69c   : > { %v6106_v37 = vrot.slane %v5442_v0, 1  ;;  %v6220_v63 = vrot.slane %v5442_v0, 2 }
 0x69d   : > { %v5444_v42 = vpop.f32.mrf.mxu1  ;;  %v5515_v13 = vpop.f32.mrf.mxu0 }
 0x69e   : > { %v5992_v10 = vrot.slane %v5515_v13, 7  ;;  %v6107_v62 = vsel %vm2196_vm2, %v5515_v13, %v6106_v37  ;;  %v6221_v54 = vrot.slane %v5515_v13, 1  ;;  %v4421_v13 = vadd.f32 %v8804_v25, %v8609_v53  ;;  %v6315_v37 = vld [vmem:[%s7531_s27] sm:$0xff] }
 0x69f   : > { %v5517_v22 = vpop.f32.mrf.mxu0 }
 0x6a0   : > { %v5993_v52 = vsel %vm2196_vm2, %v5992_v10, %v5442_v0  ;;  %v6222_v4 = vsel %vm2196_vm2, %v6221_v54, %v6220_v63 }
 0x6ab   : > { %v5588_v12 = vpop.f32.mrf.mxu1 }
 0x6ac   : > { %v5994_v27 = vrot.slane %v5588_v12, 6  ;;  %v6108_v19 = vrot.slane %v5588_v12, 7  ;;  %v6223_v20 = vsel %vm2199_vm3, %v5588_v12, %v6222_v4 }
 0x6ad   : > { %v5590_v26 = vpop.f32.mrf.mxu1  ;;  %v5661_v21 = vpop.f32.mrf.mxu0 }
 0x6ae   : > { %v5996_v59 = vrot.slane %v5661_v21, 5  ;;  %v5995_v34 = vsel %vm2199_vm3, %v5994_v27, %v5993_v52  ;;  %v6110_v45 = vrot.slane %v5661_v21, 6  ;;  %v6109_v14 = vsel %vm2199_vm3, %v6108_v19, %v6107_v62 }
 0x6af   : > { %v5663_v5 = vpop.f32.mrf.mxu0  ;;  %v6224_v28 = vrot.slane %v5661_v21, 7 }
 0x6b0   : > { %v5997_v60 = vsel %vm2202_vm4, %v5996_v59, %v5995_v34  ;;  %v6111_v8 = vsel %vm2202_vm4, %v6110_v45, %v6109_v14 }
 0x6b1   : > { %v6225_v50 = vsel %vm2202_vm4, %v6224_v28, %v6223_v20 }
 0x6bb   : > { %v5734_v24 = vpop.f32.mrf.mxu1 }
 0x6bc   : > { %v5998_v9 = vrot.slane %v5734_v24, 4  ;;  %v6112_v1 = vrot.slane %v5734_v24, 5  ;;  %v6226_v18 = vrot.slane %v5734_v24, 6 }
 0x6bd   : > { %v5736_v7 = vpop.f32.mrf.mxu1  ;;  %v5807_v17 = vpop.f32.mrf.mxu0 }
 0x6be   : > { %v6000_v57 = vrot.slane %v5807_v17, 3  ;;  %v5999_v43 = vsel %vm2205_vm5, %v5998_v9, %v5997_v60  ;;  %v6114_v44 = vrot.slane %v5807_v17, 4  ;;  %v6113_v29 = vsel %vm2205_vm5, %v6112_v1, %v6111_v8  ;;  %v6316_v7 = vld [vmem:[%s7531_s27 + $0x8] sm:$0xff] }
 0x6bf   : > { %v5809_v33 = vpop.f32.mrf.mxu0  ;;  %v6228_v49 = vrot.slane %v5807_v17, 5  ;;  %v6227_v56 = vsel %vm2205_vm5, %v6226_v18, %v6225_v50 }
 0x6c0   : > { %v6001_v32 = vsel %vm2208_vm6, %v6000_v57, %v5999_v43  ;;  %v6115_v40 = vsel %vm2208_vm6, %v6114_v44, %v6113_v29 }
 0x6c1   : > { %v6229_v6 = vsel %vm2208_vm6, %v6228_v49, %v6227_v56 }
 0x6cb   : > { %v5880_v23 = vpop.f32.mrf.mxu1 }
 0x6cc   : > { %v6002_v31 = vrot.slane %v5880_v23, 2  ;;  %v6116_v61 = vrot.slane %v5880_v23, 3  ;;  %v6230_v58 = vrot.slane %v5880_v23, 4 }
 0x6cd   : > { %v5882_v35 = vpop.f32.mrf.mxu1  ;;  %v5953_v36 = vpop.f32.mrf.mxu0 }
 0x6ce   : > { %v6004_v41 = vrot.slane %v5953_v36, 1  ;;  %v6118_v46 = vrot.slane %v5953_v36, 2  ;;  %v6003_v47 = vsel %vm2211_vm7, %v6002_v31, %v6001_v32  ;;  %v6117_v38 = vsel %vm2211_vm7, %v6116_v61, %v6115_v40 }
 0x6cf   : > { %v5955_v48 = vpop.f32.mrf.mxu0  ;;  %v6232_v30 = vrot.slane %v5953_v36, 3  ;;  %v6231_v0 = vsel %vm2211_vm7, %v6230_v58, %v6229_v6 }
 0x6d0   : > { %v6005_v39 = vsel %vm2214_vm8, %v6004_v41, %v6003_v47  ;;  %v6119_v51 = vsel %vm2214_vm8, %v6118_v46, %v6117_v38 }
 0x6d1   : > { %6698 = vmatmul.mubr.msk.f32.vlgmr.msra.gmra.mxu1 %vm2230_vm9, %v6005_v39  ;;  %6709 = vmatmul.mubr.msk.f32.vlgmr.msra.gmra.mxu0 %vm2230_vm9, %v6119_v51 }
 0x6d2   : > { %6712 = vmatpush3.msra.mxu1 %v8801_v15  ;;  %6719 = vmatprep.mubr.msk.f32.mxu1 %vm2230_vm9, %v6219_v16  ;;  %v6233_v15 = vsel %vm2214_vm8, %v6232_v30, %v6231_v0 }
 0x6d3   : > { %6713 = vmatprep.subr.mxu1 %v6204_v55 }
 0x6d4   : > { %6714 = vmatpush3.msra.mxu1 %v6204_v55 }
 0x6d5   : > { %6715 = vmatprep.subr.mxu1 %v6203_v3 }
 0x6d6   : > { %6716 = vmatpush3.msra.mxu1 %v6203_v3 }
 0x6d7   : > { %6717 = vmatprep.subr.mxu1 %v6202_v11 }
 0x6d8   : > { %6718 = vmatpush3.msra.mxu1 %v6202_v11 }
 0x6d9   : > { %6720 = vmatmul.mubr.msk.f32.vlgmr.msra.gmra.mxu1 %vm2230_vm9, %v6233_v15 }
 0x791   : > { %v6699_v16 = vpop.f32.mrf.mxu1  ;;  %v6710_v12 = vpop.f32.mrf.mxu0 }
 0x792   : > { %v6086_v22 = vadd.f32 %v6699_v16, %v8611_v2 }
 0x793   : > { %v6076_v42 = vpop.f32.mrf.mxu1  ;;  %v6190_v5 = vpop.f32.mrf.mxu0 }
 0x794   : > { %v6085_v26 = vadd.f32 %v6076_v42, %v4421_v13  ;;  %v6200_v21 = vadd.f32 %v6710_v12, %v6086_v22 }
 0x796   : > { %v6199_v17 = vadd.f32 %v6190_v5, %v6085_v26 }
 0x799   : > { %v6721_v24 = vpop.f32.mrf.mxu1 }
 0x79a   : > { %v6314_v33 = vadd.f32 %v6721_v24, %v6200_v21 }
 0x79b   : > { %v6304_v10 = vpop.f32.mrf.mxu1 }
 0x79c   : > { %v6318_v27 = vadd.f32 %v6316_v7, %v6314_v33  ;;  %v6313_v53 = vadd.f32 %v6304_v10, %v6199_v17 }
 0x79e   : > { %6320 = vst.msk [vmem:[%s7531_s27 + $0x8] sm:$0xff] %vm2230_vm9, %v6318_v27  ;;  %v6317_v2 = vadd.f32 %v6315_v37, %v6313_v53 }
 0x7a0   : > { %6319 = vst.msk [vmem:[%s7531_s27] sm:$0xff] %vm2230_vm9, %v6317_v2 }
 0x7a1   : > { %7122 = shalt.err (!%p7119_p1)
}
 0x7a2   : > { %s7123_s20 = scalar_lea.hbm %s8865_s18, 256  ;;  %s7127_s24 = scalar_lea.hbm %s9302_s13, 512 }
 0x7a3   : > { %p7124_p4 = scmp.ne.s32.totalorder %s8865_s18, %s7123_s20  ;;  %p7128_p11 = scmp.lt.s32.totalorder %s8865_s18, %s9302_s13 }
 0x7a4   : > { %p7129_p0 = scmp.lt.s32.totalorder %s7127_s24, %s7123_s20 }
 0x7a5   : > { %p7125_p8 = pnand %p7124_p4, %p9303_p12 }
 0x7a6   : > { %p7130_p3 = por %p7129_p0, %p7128_p11 }
 0x7a7   : > { %p7126_p9 = pneg %p7125_p8 }
 0x7a9   : > { %p7131_p2 = pnand %p7130_p3, %p7126_p9 }
 0x7ab   : > { %7134 = shalt.err (!%p7131_p2)
}
 0x7ac   : > { %s7258_s5 = smov 128   ;;  %s7259_s10 = smov 8  }
 0x7ad   : > { %6737 = dma.vmem_to_hbm [thread:$0]  (%p9303_p12), %s8867_s14, 256, %s8865_s18, %s6322_s9, %s7258_s5, %s7258_s5, %s7259_s10  }
 0x7ae PF: > { %s9304_s2 = sld [smem:[#allocation18_spill]]  ;;  %p6754_p5 = scmp.ge.s32.totalorder %s7241_s7, 2 }
 0x7af   : > { %s9305_s27 = sld [smem:[#allocation28_spill]] }
 0x7b4   : > { %s6350_s8 = sand.u32 1, %s9304_s2  }
 0x7b5   : > { %p9306_p6 = scmp.ne.s32.totalorder %s9305_s27, 0  ;;  %s6351_s15 = scalar_lea.sflag [#allocation4], %s6350_s8 }
 0x7b7   : > { %p6747_p7 = pnand %p6754_p5, %p9306_p6 }
 0x7b9   : > { %p6748_p13 = pneg %p6747_p7 }
 0x7bb   : > { %7196 = dma.done.wait (%p6748_p13), %s6351_s15, 256  }
 0x7bc   : > { %7198 = vsyncadd (%p6748_p13), %s6351_s15, 4294967040  ;;  %s26_s7 = sadd.s32 1, %s7241_s7   ;;  %s9307_s21 = sld [smem:[#allocation17_spill]] }
 0x7bd   : > { %p23_p10 = scmp.ge.s32.totalorder %s26_s7, 6   ;;  %s9308_s19 = sld [smem:[#allocation25_spill]] }
 0x7be   : > { %s9309_s26 = sld [smem:[#allocation19_spill]]  ;;  %s9313_s22 = smov %s7209_s23 }
 0x7bf   : > { %s9310_s14 = sld [smem:[#allocation24_spill]]  ;;  %s9315_s24 = smov %s7217_s25 }
 0x7c0   : > { %s9311_s11 = sld [smem:[#allocation22_spill]]  ;;  %s9318_s27 = smov %s7233_s29 }
 0x7c1   : > { %s9312_s18 = sld [smem:[#allocation23_spill]]  ;;  %s9319_s28 = smov %s7237_s30 }
 0x7c3   : > { %s9314_s23 = smov %s9308_s19  ;;  %25 = sbr.rel (!%p23_p10) target bundleno = 18 (0x12), region = 173 }
 0x7c4   : > { %s9316_s25 = smov %s9309_s26 }
 0x7c5   : > { %s9317_s26 = smov %s9310_s14 }
 0x7c6   : > { %s9320_s29 = smov %s9311_s11 }
 0x7c7   : > { %s9321_s30 = smov %s9312_s18 }
 0x7c8   :  { %6356 = vsyncpa [#allocation3], 1 }
 0x7c9   :  { %6358 = vsyncpa [#allocation3 + $0x1], 1 }
 0x7ca   :  { %6359 = vsyncpa [#allocation6], 1 }
 0x7cb   :  { %6361 = vsyncpa [#allocation6 + $0x1], 1 }
 0x7cc   :  { %6362 = vsyncpa [#allocation10], 1 }
 0x7cd   :  { %6363 = vsyncpa [#allocation4], 1 }
 0x7ce   :  { %6365 = vsyncpa [#allocation4 + $0x1], 1 }

</bundles_post_ra>
